<compile_context>
chip_gen: v5e
topology: v5e:2x2
jax: 0.10.0
libtpu: 0.0.40
codegen_flags: <defaults>
</compile_context>

<pallas_src>
import jax
import jax.numpy as jnp
from jax.experimental import pallas as pl
from jax.experimental.pallas import tpu as pltpu

EPS = 1e-5
NEG_SLOPE = 0.01          # nn.LeakyReLU default
C1 = 32                   # conv1 output channels
C2 = 64                   # conv2..4 output channels


def _round_up(x, m):
    return (x + m - 1) // m * m


# ----------------------------------------------------------------------------
# Fused per-branch Pallas kernel
#   conv1(matmul)+BN+LeakyReLU -> maxpool -> [dropout=id]
#   -> 3 x (stride-1 conv + BN + LeakyReLU) -> maxpool
# All intermediates live in two ping-pong VMEM scratch buffers.
# ----------------------------------------------------------------------------
def _make_branch_kernel(cfg):
    kp1, pp1 = cfg["kp1"], cfg["pp1"]
    kp2, pp2 = cfg["kp2"], cfg["pp2"]
    k2, p2 = cfg["k2"], cfg["p2"]
    k3, p3 = cfg["k3"], cfg["p3"]
    k4, p4 = cfg["k4"], cfg["p4"]
    L1, Lp1 = cfg["L1"], cfg["Lp1"]
    L2, L3, L4, Lf = cfg["L2"], cfg["L3"], cfg["L4"], cfg["Lf"]

    n1 = min(L1, Lp1 * kp1 - pp1)     # conv1 rows actually consumed by pool1
    n2 = min(L4, Lf * kp2 - pp2)      # conv4 rows actually consumed by pool2

    def lrelu(y):
        return jnp.where(y >= 0.0, y, jnp.float32(NEG_SLOPE) * y)

    def winmax(slab):
        # max over axis 0 of a (k, C) value using only static slicing +
        # elementwise maximum (robust lowering, no cross-sublane reduce).
        k = slab.shape[0]
        while k > 1:
            h = (k + 1) // 2
            slab = jnp.maximum(slab[0:h, :], slab[k - h:k, :])
            k = h
        return slab                   # (1, C)

    def taps_conv(buf, w_ref, b_ref, k, lout, cin):
        # stride-1 Conv1d(+BN scale folded in) via k shifted MXU matmuls on a
        # zero-padded VMEM buffer; epilogue = bias + LeakyReLU in f32.
        acc = jnp.dot(buf[0:lout, 0:cin], w_ref[0],
                      preferred_element_type=jnp.float32)
        for j in range(1, k):
            acc = acc + jnp.dot(buf[j:j + lout, 0:cin], w_ref[j],
                                preferred_element_type=jnp.float32)
        return lrelu(acc + b_ref[...])

    def kernel(patches_ref, w1_ref, b1_ref, w2_ref, b2_ref,
               w3_ref, b3_ref, w4_ref, b4_ref, out_ref, buf_a, buf_b):
        # --- conv1 + BN + LeakyReLU: single MXU matmul (bf16 in, f32 acc) -----
        y1 = jnp.dot(patches_ref[0], w1_ref[...],
                     preferred_element_type=jnp.float32)          # (M1p, 32)
        y1 = lrelu(y1 + b1_ref[...])

        # --- maxpool1 (stride == kernel, -inf padding) ------------------------
        buf_a[...] = jnp.full(buf_a.shape, -jnp.inf, jnp.float32)
        buf_a[pp1:pp1 + n1, 0:C1] = y1[0:n1, :]
        # pooled rows go straight into conv2's zero-padded input slab
        buf_b[...] = jnp.zeros(buf_b.shape, jnp.float32)
        for i in range(Lp1):
            buf_b[p2 + i:p2 + i + 1, 0:C1] = winmax(
                buf_a[i * kp1:(i + 1) * kp1, 0:C1])
        # Dropout(0.5): identity in eval mode.

        # --- conv2 + BN + LeakyReLU -------------------------------------------
        x = taps_conv(buf_b, w2_ref, b2_ref, k2, L2, C1)           # (L2, 64)
        buf_a[...] = jnp.zeros(buf_a.shape, jnp.float32)
        buf_a[p3:p3 + L2, :] = x

        # --- conv3 + BN + LeakyReLU -------------------------------------------
        x = taps_conv(buf_a, w3_ref, b3_ref, k3, L3, C2)           # (L3, 64)
        buf_b[...] = jnp.zeros(buf_b.shape, jnp.float32)
        buf_b[p4:p4 + L3, :] = x

        # --- conv4 + BN + LeakyReLU -------------------------------------------
        x = taps_conv(buf_b, w4_ref, b4_ref, k4, L4, C2)           # (L4, 64)

        # --- maxpool2 (stride == kernel, -inf padding) -> output --------------
        buf_a[...] = jnp.full(buf_a.shape, -jnp.inf, jnp.float32)
        buf_a[pp2:pp2 + n2, :] = x[0:n2, :]
        for i in range(Lf):
            out_ref[0, i:i + 1, :] = winmax(buf_a[i * kp2:(i + 1) * kp2, :])

    return kernel


# ----------------------------------------------------------------------------
# Host-side (jit-fused) glue: im2col for the strided conv1, BN folding
# ----------------------------------------------------------------------------
def _im2col_1d(x_nlc, k, stride, pad, m_pad):
    N, L, C = x_nlc.shape
    Lout = (L + 2 * pad - k) // stride + 1
    xp = jnp.pad(x_nlc, ((0, 0), (pad, pad), (0, 0)))
    idx = jnp.arange(Lout)[:, None] * stride + jnp.arange(k)[None, :]  # (Lout,k)
    patches = xp[:, idx, :].reshape(N, Lout, k * C)                    # k-major, cin-minor
    if m_pad > Lout:
        patches = jnp.pad(patches, ((0, 0), (0, m_pad - Lout), (0, 0)))
    return patches


def _bn_fold(bn):
    gamma, beta, mean, var = bn
    scale = gamma / jnp.sqrt(var + EPS)
    bias = (beta - mean * scale).reshape(1, -1)
    return scale, bias


def _prep_conv1_weight(w, bn):
    # PyTorch w (Cout, Cin, K) -> (K*Cin, Cout), BN scale folded in.
    scale, bias = _bn_fold(bn)
    cout = w.shape[0]
    w_mat = jnp.transpose(w, (2, 1, 0)).reshape(-1, cout) * scale[None, :]
    return w_mat, bias


def _prep_tap_weight(w, bn):
    # PyTorch w (Cout, Cin, K) -> (K, Cin, Cout), BN scale folded in.
    scale, bias = _bn_fold(bn)
    w_taps = jnp.transpose(w, (2, 1, 0)) * scale[None, None, :]
    return w_taps, bias


_BRANCH1 = dict(k1=64, s1=8, p1=24, kp1=8, pp1=4,
                k2=8, p2=4, k3=8, p3=4, k4=8, p4=4, kp2=4, pp2=2)
_BRANCH2 = dict(k1=512, s1=64, p1=24, kp1=4, pp1=2,
                k2=6, p2=4, k3=6, p3=4, k4=6, p4=4, kp2=2, pp2=1)


def _branch_forward(x_nlc, p, arch):
    N, L, cin = x_nlc.shape
    k1, s1, p1 = arch["k1"], arch["s1"], arch["p1"]
    kp1, pp1, kp2, pp2 = arch["kp1"], arch["pp1"], arch["kp2"], arch["pp2"]
    k2, p2, k3, p3, k4, p4 = (arch["k2"], arch["p2"], arch["k3"],
                              arch["p3"], arch["k4"], arch["p4"])
    assert pp1 <= kp1 // 2 and pp2 <= kp2 // 2  # PyTorch MaxPool1d constraint

    # static shape math (mirrors PyTorch floor formulas)
    L1 = (L + 2 * p1 - k1) // s1 + 1
    Lp1 = (L1 + 2 * pp1 - kp1) // kp1 + 1
    L2 = Lp1 + 2 * p2 - k2 + 1
    L3 = L2 + 2 * p3 - k3 + 1
    L4 = L3 + 2 * p4 - k4 + 1
    Lf = (L4 + 2 * pp2 - kp2) // kp2 + 1

    M1p = _round_up(L1, 8)                       # sublane-aligned patch rows
    BUF = _round_up(max(Lp1 * kp1, Lp1 + 2 * p2, L2 + 2 * p3,
                        L3 + 2 * p4, Lf * kp2, 8), 8)
    KC1 = k1 * cin

    cfg = dict(arch, L1=L1, Lp1=Lp1, L2=L2, L3=L3, L4=L4, Lf=Lf)

    patches = _im2col_1d(x_nlc, k1, s1, p1, M1p)           # (N, M1p, KC1)
    w1m, b1 = _prep_conv1_weight(p["w1"], p["bn1"])        # (KC1, 32), (1, 32)
    w2t, b2 = _prep_tap_weight(p["w2"], p["bn2"])          # (k2, 32, 64), (1, 64)
    w3t, b3 = _prep_tap_weight(p["w3"], p["bn3"])
    w4t, b4 = _prep_tap_weight(p["w4"], p["bn4"])

    # bf16 inputs for the dominant first-layer matmul (MXU-native), f32 acc.
    patches = patches.astype(jnp.bfloat16)
    w1m = w1m.astype(jnp.bfloat16)

    kernel = _make_branch_kernel(cfg)
    out = pl.pallas_call(
        kernel,
        out_shape=jax.ShapeDtypeStruct((N, Lf, C2), jnp.float32),
        grid=(N,),
        in_specs=[
            pl.BlockSpec((1, M1p, KC1), lambda n: (n, 0, 0)),
            pl.BlockSpec((KC1, C1), lambda n: (0, 0)),
            pl.BlockSpec((1, C1), lambda n: (0, 0)),
            pl.BlockSpec((k2, C1, C2), lambda n: (0, 0, 0)),
            pl.BlockSpec((1, C2), lambda n: (0, 0)),
            pl.BlockSpec((k3, C2, C2), lambda n: (0, 0, 0)),
            pl.BlockSpec((1, C2), lambda n: (0, 0)),
            pl.BlockSpec((k4, C2, C2), lambda n: (0, 0, 0)),
            pl.BlockSpec((1, C2), lambda n: (0, 0)),
        ],
        out_specs=pl.BlockSpec((1, Lf, C2), lambda n: (n, 0, 0)),
        scratch_shapes=[pltpu.VMEM((BUF, C2), jnp.float32),
                        pltpu.VMEM((BUF, C2), jnp.float32)],
        compiler_params=pltpu.CompilerParams(
            dimension_semantics=("parallel",)),
    )(patches, w1m, b1, w2t, b2, w3t, b3, w4t, b4)
    return out                                              # (N, Lf, 64)


# ----------------------------------------------------------------------------
# Forward pass (mirrors Temporal_feature_multimodel.forward, eval mode)
# ----------------------------------------------------------------------------
def _forward(x_ncl, p1, p2):
    # x_ncl is (N, channels, L) like PyTorch; compute in NLC internally.
    if x_ncl.ndim == 2:
        x_ncl = x_ncl[None]
    x_nlc = jnp.transpose(x_ncl, (0, 2, 1)).astype(jnp.float32)
    f1 = _branch_forward(x_nlc, p1, _BRANCH1)   # (N, Lf1, 64)
    f2 = _branch_forward(x_nlc, p2, _BRANCH2)   # (N, Lf2, 64)
    # Flatten in PyTorch NCL order: view(N, C*L)
    x1 = jnp.transpose(f1, (0, 2, 1)).reshape(f1.shape[0], -1)
    x2 = jnp.transpose(f2, (0, 2, 1)).reshape(f2.shape[0], -1)
    return jnp.concatenate([x1, x2], axis=1)


temporal_feature_multimodel = jax.jit(_forward)


# ----------------------------------------------------------------------------
# Parameter construction (deterministic, synthetic)
# ----------------------------------------------------------------------------
def _make_conv(key, cout, cin, k):
    return jax.random.normal(key, (cout, cin, k), jnp.float32) * 0.05


def _make_bn(key, c):
    k1, k2, k3, k4 = jax.random.split(key, 4)
    gamma = jax.random.uniform(k1, (c,), jnp.float32, 0.5, 1.5)
    beta = jax.random.normal(k2, (c,), jnp.float32) * 0.1
    mean = jax.random.normal(k3, (c,), jnp.float32) * 0.1
    var = jax.random.uniform(k4, (c,), jnp.float32, 0.5, 1.5)
    return (gamma, beta, mean, var)


def init_params(key, channels):
    ks = jax.random.split(key, 16)
    p1 = {
        "w1": _make_conv(ks[0], 32, channels, 64), "bn1": _make_bn(ks[1], 32),
        "w2": _make_conv(ks[2], 64, 32, 8),        "bn2": _make_bn(ks[3], 64),
        "w3": _make_conv(ks[4], 64, 64, 8),        "bn3": _make_bn(ks[5], 64),
        "w4": _make_conv(ks[6], 64, 64, 8),        "bn4": _make_bn(ks[7], 64),
    }
    p2 = {
        "w1": _make_conv(ks[8], 32, channels, 512), "bn1": _make_bn(ks[9], 32),
        "w2": _make_conv(ks[10], 64, 32, 6),        "bn2": _make_bn(ks[11], 64),
        "w3": _make_conv(ks[12], 64, 64, 6),        "bn3": _make_bn(ks[13], 64),
        "w4": _make_conv(ks[14], 64, 64, 6),        "bn4": _make_bn(ks[15], 64),
    }
    return p1, p2


# ----------------------------------------------------------------------------
if __name__ == "__main__":
    key = jax.random.PRNGKey(0)
    k_x, k_p = jax.random.split(key)

    N, channels, L = 2, 2, 1024
    x = jax.random.normal(k_x, (N, channels, L), jnp.float32)
    p1, p2 = init_params(k_p, channels)

    out = jax.block_until_ready(temporal_feature_multimodel(x, p1, p2))

    # branch1: 64 ch * L=5 -> 320 ; branch2: 64 ch * L=7 -> 448 ; concat -> 768
    assert out.shape == (N, 768), out.shape
    assert bool(jnp.all(jnp.isfinite(out)))
    print("KERNEL_OK")
</pallas_src>

<mosaic_0001>
module attributes {stable_mosaic.version = 11 : i64} {
  func.func @kernel(%arg0: i32, %arg1: memref<1x16x1024xbf16, #tpu.memory_space<vmem>>, %arg2: memref<1024x32xbf16, #tpu.memory_space<vmem>>, %arg3: memref<1x32xf32, #tpu.memory_space<vmem>>, %arg4: memref<6x32x64xf32, #tpu.memory_space<vmem>>, %arg5: memref<1x64xf32, #tpu.memory_space<vmem>>, %arg6: memref<6x64x64xf32, #tpu.memory_space<vmem>>, %arg7: memref<1x64xf32, #tpu.memory_space<vmem>>, %arg8: memref<6x64x64xf32, #tpu.memory_space<vmem>>, %arg9: memref<1x64xf32, #tpu.memory_space<vmem>>, %arg10: memref<1x7x64xf32, #tpu.memory_space<vmem>>, %arg11: memref<24x64xf32, #tpu.memory_space<vmem>>, %arg12: memref<24x64xf32, #tpu.memory_space<vmem>>) attributes {dimension_semantics = [#tpu.dimension_semantics<parallel>], iteration_bounds = array<i64: 2>, scalar_prefetch = 0 : i64, scratch_operands = 2 : i64, tpu.core_type = #tpu.core_type<tc>, window_params = [{transform_indices = @transform_0, window_bounds = array<i64: 1, 16, 1024>}, {pipeline_mode = #tpu.pipeline_mode<synchronous>, transform_indices = @transform_1, window_bounds = array<i64: 1024, 32>}, {pipeline_mode = #tpu.pipeline_mode<synchronous>, transform_indices = @transform_2, window_bounds = array<i64: 1, 32>}, {pipeline_mode = #tpu.pipeline_mode<synchronous>, transform_indices = @transform_3, window_bounds = array<i64: 6, 32, 64>}, {pipeline_mode = #tpu.pipeline_mode<synchronous>, transform_indices = @transform_4, window_bounds = array<i64: 1, 64>}, {pipeline_mode = #tpu.pipeline_mode<synchronous>, transform_indices = @transform_5, window_bounds = array<i64: 6, 64, 64>}, {pipeline_mode = #tpu.pipeline_mode<synchronous>, transform_indices = @transform_6, window_bounds = array<i64: 1, 64>}, {pipeline_mode = #tpu.pipeline_mode<synchronous>, transform_indices = @transform_7, window_bounds = array<i64: 6, 64, 64>}, {pipeline_mode = #tpu.pipeline_mode<synchronous>, transform_indices = @transform_8, window_bounds = array<i64: 1, 64>}, {transform_indices = @transform_9, window_bounds = array<i64: 1, 7, 64>}]} {
    %c0 = arith.constant 0 : index
    %c0_0 = arith.constant 0 : index
    %c0_1 = arith.constant 0 : index
    %0 = vector.load %arg1[%c0, %c0_0, %c0_1] : memref<1x16x1024xbf16, #tpu.memory_space<vmem>>, vector<1x16x1024xbf16>
    %1 = vector.shape_cast %0 : vector<1x16x1024xbf16> to vector<16x1024xbf16>
    %c0_2 = arith.constant 0 : index
    %c0_3 = arith.constant 0 : index
    %2 = vector.load %arg2[%c0_2, %c0_3] : memref<1024x32xbf16, #tpu.memory_space<vmem>>, vector<1024x32xbf16>
    %cst = arith.constant dense<0.000000e+00> : vector<16x32xf32>
    %3 = tpu.matmul %1, %2, %cst {dimension_numbers = #tpu.dot_dimension_numbers<[1], [0], [0], [1], [0, 0, 1, 1], [], []>} : vector<16x1024xbf16>, vector<1024x32xbf16>, vector<16x32xf32> -> vector<16x32xf32>
    %c0_4 = arith.constant 0 : index
    %c0_5 = arith.constant 0 : index
    %4 = vector.load %arg3[%c0_4, %c0_5] : memref<1x32xf32, #tpu.memory_space<vmem>>, vector<1x32xf32>
    %5 = vector.broadcast %4 : vector<1x32xf32> to vector<16x32xf32>
    %6 = arith.addf %3, %5 : vector<16x32xf32>
    %cst_6 = arith.constant 0.000000e+00 : f32
    %7 = vector.broadcast %cst_6 : f32 to vector<16x32xf32>
    %8 = arith.cmpf oge, %6, %7 : vector<16x32xf32>
    %cst_7 = arith.constant 0.00999999977 : f32
    %9 = vector.broadcast %cst_7 : f32 to vector<16x32xf32>
    %10 = arith.mulf %9, %6 : vector<16x32xf32>
    %11 = arith.select %8, %6, %10 : vector<16x32xi1>, vector<16x32xf32>
    %cst_8 = arith.constant 0xFF800000 : f32
    %12 = vector.broadcast %cst_8 : f32 to vector<24x64xf32>
    %c0_9 = arith.constant 0 : index
    %c0_10 = arith.constant 0 : index
    %13 = vector.load %arg11[%c0_9, %c0_10] : memref<24x64xf32, #tpu.memory_space<vmem>>, vector<24x64xf32>
    tpu.vector_store %arg11[%c0_9, %c0_10], %12 {strides = array<i32>} : memref<24x64xf32, #tpu.memory_space<vmem>>, vector<24x64xf32>,
    %14 = vector.extract_strided_slice %11 {offsets = [0, 0], sizes = [9, 32], strides = [1, 1]} : vector<16x32xf32> to vector<9x32xf32>
    %c2 = arith.constant 2 : index
    %c0_11 = arith.constant 0 : index
    %15 = vector.load %arg11[%c2, %c0_11] : memref<24x64xf32, #tpu.memory_space<vmem>>, vector<9x32xf32>
    tpu.vector_store %arg11[%c2, %c0_11], %14 {strides = array<i32>} : memref<24x64xf32, #tpu.memory_space<vmem>>, vector<9x32xf32>,
    %cst_12 = arith.constant 0.000000e+00 : f32
    %16 = vector.broadcast %cst_12 : f32 to vector<24x64xf32>
    %c0_13 = arith.constant 0 : index
    %c0_14 = arith.constant 0 : index
    %17 = vector.load %arg12[%c0_13, %c0_14] : memref<24x64xf32, #tpu.memory_space<vmem>>, vector<24x64xf32>
    tpu.vector_store %arg12[%c0_13, %c0_14], %16 {strides = array<i32>} : memref<24x64xf32, #tpu.memory_space<vmem>>, vector<24x64xf32>,
    %c0_15 = arith.constant 0 : index
    %c0_16 = arith.constant 0 : index
    %18 = vector.load %arg11[%c0_15, %c0_16] : memref<24x64xf32, #tpu.memory_space<vmem>>, vector<4x32xf32>
    %19 = vector.extract_strided_slice %18 {offsets = [0, 0], sizes = [2, 32], strides = [1, 1]} : vector<4x32xf32> to vector<2x32xf32>
    %20 = vector.extract_strided_slice %18 {offsets = [2, 0], sizes = [2, 32], strides = [1, 1]} : vector<4x32xf32> to vector<2x32xf32>
    %21 = arith.maximumf %19, %20 : vector<2x32xf32>
    %22 = vector.extract_strided_slice %21 {offsets = [0, 0], sizes = [1, 32], strides = [1, 1]} : vector<2x32xf32> to vector<1x32xf32>
    %23 = vector.extract_strided_slice %21 {offsets = [1, 0], sizes = [1, 32], strides = [1, 1]} : vector<2x32xf32> to vector<1x32xf32>
    %24 = arith.maximumf %22, %23 : vector<1x32xf32>
    %c4 = arith.constant 4 : index
    %c0_17 = arith.constant 0 : index
    %25 = vector.load %arg12[%c4, %c0_17] : memref<24x64xf32, #tpu.memory_space<vmem>>, vector<1x32xf32>
    tpu.vector_store %arg12[%c4, %c0_17], %24 {strides = array<i32>} : memref<24x64xf32, #tpu.memory_space<vmem>>, vector<1x32xf32>,
    %c4_18 = arith.constant 4 : index
    %c0_19 = arith.constant 0 : index
    %26 = vector.load %arg11[%c4_18, %c0_19] : memref<24x64xf32, #tpu.memory_space<vmem>>, vector<4x32xf32>
    %27 = vector.extract_strided_slice %26 {offsets = [0, 0], sizes = [2, 32], strides = [1, 1]} : vector<4x32xf32> to vector<2x32xf32>
    %28 = vector.extract_strided_slice %26 {offsets = [2, 0], sizes = [2, 32], strides = [1, 1]} : vector<4x32xf32> to vector<2x32xf32>
    %29 = arith.maximumf %27, %28 : vector<2x32xf32>
    %30 = vector.extract_strided_slice %29 {offsets = [0, 0], sizes = [1, 32], strides = [1, 1]} : vector<2x32xf32> to vector<1x32xf32>
    %31 = vector.extract_strided_slice %29 {offsets = [1, 0], sizes = [1, 32], strides = [1, 1]} : vector<2x32xf32> to vector<1x32xf32>
    %32 = arith.maximumf %30, %31 : vector<1x32xf32>
    %c5 = arith.constant 5 : index
    %c0_20 = arith.constant 0 : index
    %33 = vector.load %arg12[%c5, %c0_20] : memref<24x64xf32, #tpu.memory_space<vmem>>, vector<1x32xf32>
    tpu.vector_store %arg12[%c5, %c0_20], %32 {strides = array<i32>} : memref<24x64xf32, #tpu.memory_space<vmem>>, vector<1x32xf32>,
    %c8 = arith.constant 8 : index
    %c0_21 = arith.constant 0 : index
    %34 = vector.load %arg11[%c8, %c0_21] : memref<24x64xf32, #tpu.memory_space<vmem>>, vector<4x32xf32>
    %35 = vector.extract_strided_slice %34 {offsets = [0, 0], sizes = [2, 32], strides = [1, 1]} : vector<4x32xf32> to vector<2x32xf32>
    %36 = vector.extract_strided_slice %34 {offsets = [2, 0], sizes = [2, 32], strides = [1, 1]} : vector<4x32xf32> to vector<2x32xf32>
    %37 = arith.maximumf %35, %36 : vector<2x32xf32>
    %38 = vector.extract_strided_slice %37 {offsets = [0, 0], sizes = [1, 32], strides = [1, 1]} : vector<2x32xf32> to vector<1x32xf32>
    %39 = vector.extract_strided_slice %37 {offsets = [1, 0], sizes = [1, 32], strides = [1, 1]} : vector<2x32xf32> to vector<1x32xf32>
    %40 = arith.maximumf %38, %39 : vector<1x32xf32>
    %c6 = arith.constant 6 : index
    %c0_22 = arith.constant 0 : index
    %41 = vector.load %arg12[%c6, %c0_22] : memref<24x64xf32, #tpu.memory_space<vmem>>, vector<1x32xf32>
    tpu.vector_store %arg12[%c6, %c0_22], %40 {strides = array<i32>} : memref<24x64xf32, #tpu.memory_space<vmem>>, vector<1x32xf32>,
    %c0_23 = arith.constant 0 : index
    %c0_24 = arith.constant 0 : index
    %42 = vector.load %arg12[%c0_23, %c0_24] : memref<24x64xf32, #tpu.memory_space<vmem>>, vector<6x32xf32>
    %c0_25 = arith.constant 0 : index
    %c0_26 = arith.constant 0 : index
    %c0_27 = arith.constant 0 : index
    %43 = vector.load %arg4[%c0_25, %c0_26, %c0_27] : memref<6x32x64xf32, #tpu.memory_space<vmem>>, vector<1x32x64xf32>
    %44 = vector.shape_cast %43 : vector<1x32x64xf32> to vector<32x64xf32>
    %cst_28 = arith.constant dense<0.000000e+00> : vector<6x64xf32>
    %45 = tpu.matmul %42, %44, %cst_28 {dimension_numbers = #tpu.dot_dimension_numbers<[1], [0], [0], [1], [0, 0, 1, 1], [], []>} : vector<6x32xf32>, vector<32x64xf32>, vector<6x64xf32> -> vector<6x64xf32>
    %c1 = arith.constant 1 : index
    %c0_29 = arith.constant 0 : index
    %46 = vector.load %arg12[%c1, %c0_29] : memref<24x64xf32, #tpu.memory_space<vmem>>, vector<6x32xf32>
    %c1_30 = arith.constant 1 : index
    %c0_31 = arith.constant 0 : index
    %c0_32 = arith.constant 0 : index
    %47 = vector.load %arg4[%c1_30, %c0_31, %c0_32] : memref<6x32x64xf32, #tpu.memory_space<vmem>>, vector<1x32x64xf32>
    %48 = vector.shape_cast %47 : vector<1x32x64xf32> to vector<32x64xf32>
    %cst_33 = arith.constant dense<0.000000e+00> : vector<6x64xf32>
    %49 = tpu.matmul %46, %48, %cst_33 {dimension_numbers = #tpu.dot_dimension_numbers<[1], [0], [0], [1], [0, 0, 1, 1], [], []>} : vector<6x32xf32>, vector<32x64xf32>, vector<6x64xf32> -> vector<6x64xf32>
    %50 = arith.addf %45, %49 : vector<6x64xf32>
    %c2_34 = arith.constant 2 : index
    %c0_35 = arith.constant 0 : index
    %51 = vector.load %arg12[%c2_34, %c0_35] : memref<24x64xf32, #tpu.memory_space<vmem>>, vector<6x32xf32>
    %c2_36 = arith.constant 2 : index
    %c0_37 = arith.constant 0 : index
    %c0_38 = arith.constant 0 : index
    %52 = vector.load %arg4[%c2_36, %c0_37, %c0_38] : memref<6x32x64xf32, #tpu.memory_space<vmem>>, vector<1x32x64xf32>
    %53 = vector.shape_cast %52 : vector<1x32x64xf32> to vector<32x64xf32>
    %cst_39 = arith.constant dense<0.000000e+00> : vector<6x64xf32>
    %54 = tpu.matmul %51, %53, %cst_39 {dimension_numbers = #tpu.dot_dimension_numbers<[1], [0], [0], [1], [0, 0, 1, 1], [], []>} : vector<6x32xf32>, vector<32x64xf32>, vector<6x64xf32> -> vector<6x64xf32>
    %55 = arith.addf %50, %54 : vector<6x64xf32>
    %c3 = arith.constant 3 : index
    %c0_40 = arith.constant 0 : index
    %56 = vector.load %arg12[%c3, %c0_40] : memref<24x64xf32, #tpu.memory_space<vmem>>, vector<6x32xf32>
    %c3_41 = arith.constant 3 : index
    %c0_42 = arith.constant 0 : index
    %c0_43 = arith.constant 0 : index
    %57 = vector.load %arg4[%c3_41, %c0_42, %c0_43] : memref<6x32x64xf32, #tpu.memory_space<vmem>>, vector<1x32x64xf32>
    %58 = vector.shape_cast %57 : vector<1x32x64xf32> to vector<32x64xf32>
    %cst_44 = arith.constant dense<0.000000e+00> : vector<6x64xf32>
    %59 = tpu.matmul %56, %58, %cst_44 {dimension_numbers = #tpu.dot_dimension_numbers<[1], [0], [0], [1], [0, 0, 1, 1], [], []>} : vector<6x32xf32>, vector<32x64xf32>, vector<6x64xf32> -> vector<6x64xf32>
    %60 = arith.addf %55, %59 : vector<6x64xf32>
    %c4_45 = arith.constant 4 : index
    %c0_46 = arith.constant 0 : index
    %61 = vector.load %arg12[%c4_45, %c0_46] : memref<24x64xf32, #tpu.memory_space<vmem>>, vector<6x32xf32>
    %c4_47 = arith.constant 4 : index
    %c0_48 = arith.constant 0 : index
    %c0_49 = arith.constant 0 : index
    %62 = vector.load %arg4[%c4_47, %c0_48, %c0_49] : memref<6x32x64xf32, #tpu.memory_space<vmem>>, vector<1x32x64xf32>
    %63 = vector.shape_cast %62 : vector<1x32x64xf32> to vector<32x64xf32>
    %cst_50 = arith.constant dense<0.000000e+00> : vector<6x64xf32>
    %64 = tpu.matmul %61, %63, %cst_50 {dimension_numbers = #tpu.dot_dimension_numbers<[1], [0], [0], [1], [0, 0, 1, 1], [], []>} : vector<6x32xf32>, vector<32x64xf32>, vector<6x64xf32> -> vector<6x64xf32>
    %65 = arith.addf %60, %64 : vector<6x64xf32>
    %c5_51 = arith.constant 5 : index
    %c0_52 = arith.constant 0 : index
    %66 = vector.load %arg12[%c5_51, %c0_52] : memref<24x64xf32, #tpu.memory_space<vmem>>, vector<6x32xf32>
    %c5_53 = arith.constant 5 : index
    %c0_54 = arith.constant 0 : index
    %c0_55 = arith.constant 0 : index
    %67 = vector.load %arg4[%c5_53, %c0_54, %c0_55] : memref<6x32x64xf32, #tpu.memory_space<vmem>>, vector<1x32x64xf32>
    %68 = vector.shape_cast %67 : vector<1x32x64xf32> to vector<32x64xf32>
    %cst_56 = arith.constant dense<0.000000e+00> : vector<6x64xf32>
    %69 = tpu.matmul %66, %68, %cst_56 {dimension_numbers = #tpu.dot_dimension_numbers<[1], [0], [0], [1], [0, 0, 1, 1], [], []>} : vector<6x32xf32>, vector<32x64xf32>, vector<6x64xf32> -> vector<6x64xf32>
    %70 = arith.addf %65, %69 : vector<6x64xf32>
    %c0_57 = arith.constant 0 : index
    %c0_58 = arith.constant 0 : index
    %71 = vector.load %arg5[%c0_57, %c0_58] : memref<1x64xf32, #tpu.memory_space<vmem>>, vector<1x64xf32>
    %72 = vector.broadcast %71 : vector<1x64xf32> to vector<6x64xf32>
    %73 = arith.addf %70, %72 : vector<6x64xf32>
    %cst_59 = arith.constant 0.000000e+00 : f32
    %74 = vector.broadcast %cst_59 : f32 to vector<6x64xf32>
    %75 = arith.cmpf oge, %73, %74 : vector<6x64xf32>
    %cst_60 = arith.constant 0.00999999977 : f32
    %76 = vector.broadcast %cst_60 : f32 to vector<6x64xf32>
    %77 = arith.mulf %76, %73 : vector<6x64xf32>
    %78 = arith.select %75, %73, %77 : vector<6x64xi1>, vector<6x64xf32>
    %cst_61 = arith.constant 0.000000e+00 : f32
    %79 = vector.broadcast %cst_61 : f32 to vector<24x64xf32>
    %c0_62 = arith.constant 0 : index
    %c0_63 = arith.constant 0 : index
    %80 = vector.load %arg11[%c0_62, %c0_63] : memref<24x64xf32, #tpu.memory_space<vmem>>, vector<24x64xf32>
    tpu.vector_store %arg11[%c0_62, %c0_63], %79 {strides = array<i32>} : memref<24x64xf32, #tpu.memory_space<vmem>>, vector<24x64xf32>,
    %c4_64 = arith.constant 4 : index
    %c0_65 = arith.constant 0 : index
    %81 = vector.load %arg11[%c4_64, %c0_65] : memref<24x64xf32, #tpu.memory_space<vmem>>, vector<6x64xf32>
    tpu.vector_store %arg11[%c4_64, %c0_65], %78 {strides = array<i32>} : memref<24x64xf32, #tpu.memory_space<vmem>>, vector<6x64xf32>,
    %c0_66 = arith.constant 0 : index
    %c0_67 = arith.constant 0 : index
    %82 = vector.load %arg11[%c0_66, %c0_67] : memref<24x64xf32, #tpu.memory_space<vmem>>, vector<9x64xf32>
    %c0_68 = arith.constant 0 : index
    %c0_69 = arith.constant 0 : index
    %c0_70 = arith.constant 0 : index
    %83 = vector.load %arg6[%c0_68, %c0_69, %c0_70] : memref<6x64x64xf32, #tpu.memory_space<vmem>>, vector<1x64x64xf32>
    %84 = vector.shape_cast %83 : vector<1x64x64xf32> to vector<64x64xf32>
    %cst_71 = arith.constant dense<0.000000e+00> : vector<9x64xf32>
    %85 = tpu.matmul %82, %84, %cst_71 {dimension_numbers = #tpu.dot_dimension_numbers<[1], [0], [0], [1], [0, 0, 1, 1], [], []>} : vector<9x64xf32>, vector<64x64xf32>, vector<9x64xf32> -> vector<9x64xf32>
    %c1_72 = arith.constant 1 : index
    %c0_73 = arith.constant 0 : index
    %86 = vector.load %arg11[%c1_72, %c0_73] : memref<24x64xf32, #tpu.memory_space<vmem>>, vector<9x64xf32>
    %c1_74 = arith.constant 1 : index
    %c0_75 = arith.constant 0 : index
    %c0_76 = arith.constant 0 : index
    %87 = vector.load %arg6[%c1_74, %c0_75, %c0_76] : memref<6x64x64xf32, #tpu.memory_space<vmem>>, vector<1x64x64xf32>
    %88 = vector.shape_cast %87 : vector<1x64x64xf32> to vector<64x64xf32>
    %cst_77 = arith.constant dense<0.000000e+00> : vector<9x64xf32>
    %89 = tpu.matmul %86, %88, %cst_77 {dimension_numbers = #tpu.dot_dimension_numbers<[1], [0], [0], [1], [0, 0, 1, 1], [], []>} : vector<9x64xf32>, vector<64x64xf32>, vector<9x64xf32> -> vector<9x64xf32>
    %90 = arith.addf %85, %89 : vector<9x64xf32>
    %c2_78 = arith.constant 2 : index
    %c0_79 = arith.constant 0 : index
    %91 = vector.load %arg11[%c2_78, %c0_79] : memref<24x64xf32, #tpu.memory_space<vmem>>, vector<9x64xf32>
    %c2_80 = arith.constant 2 : index
    %c0_81 = arith.constant 0 : index
    %c0_82 = arith.constant 0 : index
    %92 = vector.load %arg6[%c2_80, %c0_81, %c0_82] : memref<6x64x64xf32, #tpu.memory_space<vmem>>, vector<1x64x64xf32>
    %93 = vector.shape_cast %92 : vector<1x64x64xf32> to vector<64x64xf32>
    %cst_83 = arith.constant dense<0.000000e+00> : vector<9x64xf32>
    %94 = tpu.matmul %91, %93, %cst_83 {dimension_numbers = #tpu.dot_dimension_numbers<[1], [0], [0], [1], [0, 0, 1, 1], [], []>} : vector<9x64xf32>, vector<64x64xf32>, vector<9x64xf32> -> vector<9x64xf32>
    %95 = arith.addf %90, %94 : vector<9x64xf32>
    %c3_84 = arith.constant 3 : index
    %c0_85 = arith.constant 0 : index
    %96 = vector.load %arg11[%c3_84, %c0_85] : memref<24x64xf32, #tpu.memory_space<vmem>>, vector<9x64xf32>
    %c3_86 = arith.constant 3 : index
    %c0_87 = arith.constant 0 : index
    %c0_88 = arith.constant 0 : index
    %97 = vector.load %arg6[%c3_86, %c0_87, %c0_88] : memref<6x64x64xf32, #tpu.memory_space<vmem>>, vector<1x64x64xf32>
    %98 = vector.shape_cast %97 : vector<1x64x64xf32> to vector<64x64xf32>
    %cst_89 = arith.constant dense<0.000000e+00> : vector<9x64xf32>
    %99 = tpu.matmul %96, %98, %cst_89 {dimension_numbers = #tpu.dot_dimension_numbers<[1], [0], [0], [1], [0, 0, 1, 1], [], []>} : vector<9x64xf32>, vector<64x64xf32>, vector<9x64xf32> -> vector<9x64xf32>
    %100 = arith.addf %95, %99 : vector<9x64xf32>
    %c4_90 = arith.constant 4 : index
    %c0_91 = arith.constant 0 : index
    %101 = vector.load %arg11[%c4_90, %c0_91] : memref<24x64xf32, #tpu.memory_space<vmem>>, vector<9x64xf32>
    %c4_92 = arith.constant 4 : index
    %c0_93 = arith.constant 0 : index
    %c0_94 = arith.constant 0 : index
    %102 = vector.load %arg6[%c4_92, %c0_93, %c0_94] : memref<6x64x64xf32, #tpu.memory_space<vmem>>, vector<1x64x64xf32>
    %103 = vector.shape_cast %102 : vector<1x64x64xf32> to vector<64x64xf32>
    %cst_95 = arith.constant dense<0.000000e+00> : vector<9x64xf32>
    %104 = tpu.matmul %101, %103, %cst_95 {dimension_numbers = #tpu.dot_dimension_numbers<[1], [0], [0], [1], [0, 0, 1, 1], [], []>} : vector<9x64xf32>, vector<64x64xf32>, vector<9x64xf32> -> vector<9x64xf32>
    %105 = arith.addf %100, %104 : vector<9x64xf32>
    %c5_96 = arith.constant 5 : index
    %c0_97 = arith.constant 0 : index
    %106 = vector.load %arg11[%c5_96, %c0_97] : memref<24x64xf32, #tpu.memory_space<vmem>>, vector<9x64xf32>
    %c5_98 = arith.constant 5 : index
    %c0_99 = arith.constant 0 : index
    %c0_100 = arith.constant 0 : index
    %107 = vector.load %arg6[%c5_98, %c0_99, %c0_100] : memref<6x64x64xf32, #tpu.memory_space<vmem>>, vector<1x64x64xf32>
    %108 = vector.shape_cast %107 : vector<1x64x64xf32> to vector<64x64xf32>
    %cst_101 = arith.constant dense<0.000000e+00> : vector<9x64xf32>
    %109 = tpu.matmul %106, %108, %cst_101 {dimension_numbers = #tpu.dot_dimension_numbers<[1], [0], [0], [1], [0, 0, 1, 1], [], []>} : vector<9x64xf32>, vector<64x64xf32>, vector<9x64xf32> -> vector<9x64xf32>
    %110 = arith.addf %105, %109 : vector<9x64xf32>
    %c0_102 = arith.constant 0 : index
    %c0_103 = arith.constant 0 : index
    %111 = vector.load %arg7[%c0_102, %c0_103] : memref<1x64xf32, #tpu.memory_space<vmem>>, vector<1x64xf32>
    %112 = vector.broadcast %111 : vector<1x64xf32> to vector<9x64xf32>
    %113 = arith.addf %110, %112 : vector<9x64xf32>
    %cst_104 = arith.constant 0.000000e+00 : f32
    %114 = vector.broadcast %cst_104 : f32 to vector<9x64xf32>
    %115 = arith.cmpf oge, %113, %114 : vector<9x64xf32>
    %cst_105 = arith.constant 0.00999999977 : f32
    %116 = vector.broadcast %cst_105 : f32 to vector<9x64xf32>
    %117 = arith.mulf %116, %113 : vector<9x64xf32>
    %118 = arith.select %115, %113, %117 : vector<9x64xi1>, vector<9x64xf32>
    %cst_106 = arith.constant 0.000000e+00 : f32
    %119 = vector.broadcast %cst_106 : f32 to vector<24x64xf32>
    %c0_107 = arith.constant 0 : index
    %c0_108 = arith.constant 0 : index
    %120 = vector.load %arg12[%c0_107, %c0_108] : memref<24x64xf32, #tpu.memory_space<vmem>>, vector<24x64xf32>
    tpu.vector_store %arg12[%c0_107, %c0_108], %119 {strides = array<i32>} : memref<24x64xf32, #tpu.memory_space<vmem>>, vector<24x64xf32>,
    %c4_109 = arith.constant 4 : index
    %c0_110 = arith.constant 0 : index
    %121 = vector.load %arg12[%c4_109, %c0_110] : memref<24x64xf32, #tpu.memory_space<vmem>>, vector<9x64xf32>
    tpu.vector_store %arg12[%c4_109, %c0_110], %118 {strides = array<i32>} : memref<24x64xf32, #tpu.memory_space<vmem>>, vector<9x64xf32>,
    %c0_111 = arith.constant 0 : index
    %c0_112 = arith.constant 0 : index
    %122 = vector.load %arg12[%c0_111, %c0_112] : memref<24x64xf32, #tpu.memory_space<vmem>>, vector<12x64xf32>
    %c0_113 = arith.constant 0 : index
    %c0_114 = arith.constant 0 : index
    %c0_115 = arith.constant 0 : index
    %123 = vector.load %arg8[%c0_113, %c0_114, %c0_115] : memref<6x64x64xf32, #tpu.memory_space<vmem>>, vector<1x64x64xf32>
    %124 = vector.shape_cast %123 : vector<1x64x64xf32> to vector<64x64xf32>
    %cst_116 = arith.constant dense<0.000000e+00> : vector<12x64xf32>
    %125 = tpu.matmul %122, %124, %cst_116 {dimension_numbers = #tpu.dot_dimension_numbers<[1], [0], [0], [1], [0, 0, 1, 1], [], []>} : vector<12x64xf32>, vector<64x64xf32>, vector<12x64xf32> -> vector<12x64xf32>
    %c1_117 = arith.constant 1 : index
    %c0_118 = arith.constant 0 : index
    %126 = vector.load %arg12[%c1_117, %c0_118] : memref<24x64xf32, #tpu.memory_space<vmem>>, vector<12x64xf32>
    %c1_119 = arith.constant 1 : index
    %c0_120 = arith.constant 0 : index
    %c0_121 = arith.constant 0 : index
    %127 = vector.load %arg8[%c1_119, %c0_120, %c0_121] : memref<6x64x64xf32, #tpu.memory_space<vmem>>, vector<1x64x64xf32>
    %128 = vector.shape_cast %127 : vector<1x64x64xf32> to vector<64x64xf32>
    %cst_122 = arith.constant dense<0.000000e+00> : vector<12x64xf32>
    %129 = tpu.matmul %126, %128, %cst_122 {dimension_numbers = #tpu.dot_dimension_numbers<[1], [0], [0], [1], [0, 0, 1, 1], [], []>} : vector<12x64xf32>, vector<64x64xf32>, vector<12x64xf32> -> vector<12x64xf32>
    %130 = arith.addf %125, %129 : vector<12x64xf32>
    %c2_123 = arith.constant 2 : index
    %c0_124 = arith.constant 0 : index
    %131 = vector.load %arg12[%c2_123, %c0_124] : memref<24x64xf32, #tpu.memory_space<vmem>>, vector<12x64xf32>
    %c2_125 = arith.constant 2 : index
    %c0_126 = arith.constant 0 : index
    %c0_127 = arith.constant 0 : index
    %132 = vector.load %arg8[%c2_125, %c0_126, %c0_127] : memref<6x64x64xf32, #tpu.memory_space<vmem>>, vector<1x64x64xf32>
    %133 = vector.shape_cast %132 : vector<1x64x64xf32> to vector<64x64xf32>
    %cst_128 = arith.constant dense<0.000000e+00> : vector<12x64xf32>
    %134 = tpu.matmul %131, %133, %cst_128 {dimension_numbers = #tpu.dot_dimension_numbers<[1], [0], [0], [1], [0, 0, 1, 1], [], []>} : vector<12x64xf32>, vector<64x64xf32>, vector<12x64xf32> -> vector<12x64xf32>
    %135 = arith.addf %130, %134 : vector<12x64xf32>
    %c3_129 = arith.constant 3 : index
    %c0_130 = arith.constant 0 : index
    %136 = vector.load %arg12[%c3_129, %c0_130] : memref<24x64xf32, #tpu.memory_space<vmem>>, vector<12x64xf32>
    %c3_131 = arith.constant 3 : index
    %c0_132 = arith.constant 0 : index
    %c0_133 = arith.constant 0 : index
    %137 = vector.load %arg8[%c3_131, %c0_132, %c0_133] : memref<6x64x64xf32, #tpu.memory_space<vmem>>, vector<1x64x64xf32>
    %138 = vector.shape_cast %137 : vector<1x64x64xf32> to vector<64x64xf32>
    %cst_134 = arith.constant dense<0.000000e+00> : vector<12x64xf32>
    %139 = tpu.matmul %136, %138, %cst_134 {dimension_numbers = #tpu.dot_dimension_numbers<[1], [0], [0], [1], [0, 0, 1, 1], [], []>} : vector<12x64xf32>, vector<64x64xf32>, vector<12x64xf32> -> vector<12x64xf32>
    %140 = arith.addf %135, %139 : vector<12x64xf32>
    %c4_135 = arith.constant 4 : index
    %c0_136 = arith.constant 0 : index
    %141 = vector.load %arg12[%c4_135, %c0_136] : memref<24x64xf32, #tpu.memory_space<vmem>>, vector<12x64xf32>
    %c4_137 = arith.constant 4 : index
    %c0_138 = arith.constant 0 : index
    %c0_139 = arith.constant 0 : index
    %142 = vector.load %arg8[%c4_137, %c0_138, %c0_139] : memref<6x64x64xf32, #tpu.memory_space<vmem>>, vector<1x64x64xf32>
    %143 = vector.shape_cast %142 : vector<1x64x64xf32> to vector<64x64xf32>
    %cst_140 = arith.constant dense<0.000000e+00> : vector<12x64xf32>
    %144 = tpu.matmul %141, %143, %cst_140 {dimension_numbers = #tpu.dot_dimension_numbers<[1], [0], [0], [1], [0, 0, 1, 1], [], []>} : vector<12x64xf32>, vector<64x64xf32>, vector<12x64xf32> -> vector<12x64xf32>
    %145 = arith.addf %140, %144 : vector<12x64xf32>
    %c5_141 = arith.constant 5 : index
    %c0_142 = arith.constant 0 : index
    %146 = vector.load %arg12[%c5_141, %c0_142] : memref<24x64xf32, #tpu.memory_space<vmem>>, vector<12x64xf32>
    %c5_143 = arith.constant 5 : index
    %c0_144 = arith.constant 0 : index
    %c0_145 = arith.constant 0 : index
    %147 = vector.load %arg8[%c5_143, %c0_144, %c0_145] : memref<6x64x64xf32, #tpu.memory_space<vmem>>, vector<1x64x64xf32>
    %148 = vector.shape_cast %147 : vector<1x64x64xf32> to vector<64x64xf32>
    %cst_146 = arith.constant dense<0.000000e+00> : vector<12x64xf32>
    %149 = tpu.matmul %146, %148, %cst_146 {dimension_numbers = #tpu.dot_dimension_numbers<[1], [0], [0], [1], [0, 0, 1, 1], [], []>} : vector<12x64xf32>, vector<64x64xf32>, vector<12x64xf32> -> vector<12x64xf32>
    %150 = arith.addf %145, %149 : vector<12x64xf32>
    %c0_147 = arith.constant 0 : index
    %c0_148 = arith.constant 0 : index
    %151 = vector.load %arg9[%c0_147, %c0_148] : memref<1x64xf32, #tpu.memory_space<vmem>>, vector<1x64xf32>
    %152 = vector.broadcast %151 : vector<1x64xf32> to vector<12x64xf32>
    %153 = arith.addf %150, %152 : vector<12x64xf32>
    %cst_149 = arith.constant 0.000000e+00 : f32
    %154 = vector.broadcast %cst_149 : f32 to vector<12x64xf32>
    %155 = arith.cmpf oge, %153, %154 : vector<12x64xf32>
    %cst_150 = arith.constant 0.00999999977 : f32
    %156 = vector.broadcast %cst_150 : f32 to vector<12x64xf32>
    %157 = arith.mulf %156, %153 : vector<12x64xf32>
    %158 = arith.select %155, %153, %157 : vector<12x64xi1>, vector<12x64xf32>
    %cst_151 = arith.constant 0xFF800000 : f32
    %159 = vector.broadcast %cst_151 : f32 to vector<24x64xf32>
    %c0_152 = arith.constant 0 : index
    %c0_153 = arith.constant 0 : index
    %160 = vector.load %arg11[%c0_152, %c0_153] : memref<24x64xf32, #tpu.memory_space<vmem>>, vector<24x64xf32>
    tpu.vector_store %arg11[%c0_152, %c0_153], %159 {strides = array<i32>} : memref<24x64xf32, #tpu.memory_space<vmem>>, vector<24x64xf32>,
    %c1_154 = arith.constant 1 : index
    %c0_155 = arith.constant 0 : index
    %161 = vector.load %arg11[%c1_154, %c0_155] : memref<24x64xf32, #tpu.memory_space<vmem>>, vector<12x64xf32>
    tpu.vector_store %arg11[%c1_154, %c0_155], %158 {strides = array<i32>} : memref<24x64xf32, #tpu.memory_space<vmem>>, vector<12x64xf32>,
    %c0_156 = arith.constant 0 : index
    %c0_157 = arith.constant 0 : index
    %162 = vector.load %arg11[%c0_156, %c0_157] : memref<24x64xf32, #tpu.memory_space<vmem>>, vector<2x64xf32>
    %163 = vector.extract_strided_slice %162 {offsets = [0, 0], sizes = [1, 64], strides = [1, 1]} : vector<2x64xf32> to vector<1x64xf32>
    %164 = vector.extract_strided_slice %162 {offsets = [1, 0], sizes = [1, 64], strides = [1, 1]} : vector<2x64xf32> to vector<1x64xf32>
    %165 = arith.maximumf %163, %164 : vector<1x64xf32>
    %c0_158 = arith.constant 0 : index
    %c0_159 = arith.constant 0 : index
    %c0_160 = arith.constant 0 : index
    %166 = vector.load %arg10[%c0_158, %c0_159, %c0_160] : memref<1x7x64xf32, #tpu.memory_space<vmem>>, vector<1x1x64xf32>
    %167 = vector.shape_cast %166 : vector<1x1x64xf32> to vector<1x64xf32>
    %168 = vector.shape_cast %165 : vector<1x64xf32> to vector<1x1x64xf32>
    tpu.vector_store %arg10[%c0_158, %c0_159, %c0_160], %168 {strides = array<i32>} : memref<1x7x64xf32, #tpu.memory_space<vmem>>, vector<1x1x64xf32>,
    %c2_161 = arith.constant 2 : index
    %c0_162 = arith.constant 0 : index
    %169 = vector.load %arg11[%c2_161, %c0_162] : memref<24x64xf32, #tpu.memory_space<vmem>>, vector<2x64xf32>
    %170 = vector.extract_strided_slice %169 {offsets = [0, 0], sizes = [1, 64], strides = [1, 1]} : vector<2x64xf32> to vector<1x64xf32>
    %171 = vector.extract_strided_slice %169 {offsets = [1, 0], sizes = [1, 64], strides = [1, 1]} : vector<2x64xf32> to vector<1x64xf32>
    %172 = arith.maximumf %170, %171 : vector<1x64xf32>
    %c0_163 = arith.constant 0 : index
    %c1_164 = arith.constant 1 : index
    %c0_165 = arith.constant 0 : index
    %173 = vector.load %arg10[%c0_163, %c1_164, %c0_165] : memref<1x7x64xf32, #tpu.memory_space<vmem>>, vector<1x1x64xf32>
    %174 = vector.shape_cast %173 : vector<1x1x64xf32> to vector<1x64xf32>
    %175 = vector.shape_cast %172 : vector<1x64xf32> to vector<1x1x64xf32>
    tpu.vector_store %arg10[%c0_163, %c1_164, %c0_165], %175 {strides = array<i32>} : memref<1x7x64xf32, #tpu.memory_space<vmem>>, vector<1x1x64xf32>,
    %c4_166 = arith.constant 4 : index
    %c0_167 = arith.constant 0 : index
    %176 = vector.load %arg11[%c4_166, %c0_167] : memref<24x64xf32, #tpu.memory_space<vmem>>, vector<2x64xf32>
    %177 = vector.extract_strided_slice %176 {offsets = [0, 0], sizes = [1, 64], strides = [1, 1]} : vector<2x64xf32> to vector<1x64xf32>
    %178 = vector.extract_strided_slice %176 {offsets = [1, 0], sizes = [1, 64], strides = [1, 1]} : vector<2x64xf32> to vector<1x64xf32>
    %179 = arith.maximumf %177, %178 : vector<1x64xf32>
    %c0_168 = arith.constant 0 : index
    %c2_169 = arith.constant 2 : index
    %c0_170 = arith.constant 0 : index
    %180 = vector.load %arg10[%c0_168, %c2_169, %c0_170] : memref<1x7x64xf32, #tpu.memory_space<vmem>>, vector<1x1x64xf32>
    %181 = vector.shape_cast %180 : vector<1x1x64xf32> to vector<1x64xf32>
    %182 = vector.shape_cast %179 : vector<1x64xf32> to vector<1x1x64xf32>
    tpu.vector_store %arg10[%c0_168, %c2_169, %c0_170], %182 {strides = array<i32>} : memref<1x7x64xf32, #tpu.memory_space<vmem>>, vector<1x1x64xf32>,
    %c6_171 = arith.constant 6 : index
    %c0_172 = arith.constant 0 : index
    %183 = vector.load %arg11[%c6_171, %c0_172] : memref<24x64xf32, #tpu.memory_space<vmem>>, vector<2x64xf32>
    %184 = vector.extract_strided_slice %183 {offsets = [0, 0], sizes = [1, 64], strides = [1, 1]} : vector<2x64xf32> to vector<1x64xf32>
    %185 = vector.extract_strided_slice %183 {offsets = [1, 0], sizes = [1, 64], strides = [1, 1]} : vector<2x64xf32> to vector<1x64xf32>
    %186 = arith.maximumf %184, %185 : vector<1x64xf32>
    %c0_173 = arith.constant 0 : index
    %c3_174 = arith.constant 3 : index
    %c0_175 = arith.constant 0 : index
    %187 = vector.load %arg10[%c0_173, %c3_174, %c0_175] : memref<1x7x64xf32, #tpu.memory_space<vmem>>, vector<1x1x64xf32>
    %188 = vector.shape_cast %187 : vector<1x1x64xf32> to vector<1x64xf32>
    %189 = vector.shape_cast %186 : vector<1x64xf32> to vector<1x1x64xf32>
    tpu.vector_store %arg10[%c0_173, %c3_174, %c0_175], %189 {strides = array<i32>} : memref<1x7x64xf32, #tpu.memory_space<vmem>>, vector<1x1x64xf32>,
    %c8_176 = arith.constant 8 : index
    %c0_177 = arith.constant 0 : index
    %190 = vector.load %arg11[%c8_176, %c0_177] : memref<24x64xf32, #tpu.memory_space<vmem>>, vector<2x64xf32>
    %191 = vector.extract_strided_slice %190 {offsets = [0, 0], sizes = [1, 64], strides = [1, 1]} : vector<2x64xf32> to vector<1x64xf32>
    %192 = vector.extract_strided_slice %190 {offsets = [1, 0], sizes = [1, 64], strides = [1, 1]} : vector<2x64xf32> to vector<1x64xf32>
    %193 = arith.maximumf %191, %192 : vector<1x64xf32>
    %c0_178 = arith.constant 0 : index
    %c4_179 = arith.constant 4 : index
    %c0_180 = arith.constant 0 : index
    %194 = vector.load %arg10[%c0_178, %c4_179, %c0_180] : memref<1x7x64xf32, #tpu.memory_space<vmem>>, vector<1x1x64xf32>
    %195 = vector.shape_cast %194 : vector<1x1x64xf32> to vector<1x64xf32>
    %196 = vector.shape_cast %193 : vector<1x64xf32> to vector<1x1x64xf32>
    tpu.vector_store %arg10[%c0_178, %c4_179, %c0_180], %196 {strides = array<i32>} : memref<1x7x64xf32, #tpu.memory_space<vmem>>, vector<1x1x64xf32>,
    %c10 = arith.constant 10 : index
    %c0_181 = arith.constant 0 : index
    %197 = vector.load %arg11[%c10, %c0_181] : memref<24x64xf32, #tpu.memory_space<vmem>>, vector<2x64xf32>
    %198 = vector.extract_strided_slice %197 {offsets = [0, 0], sizes = [1, 64], strides = [1, 1]} : vector<2x64xf32> to vector<1x64xf32>
    %199 = vector.extract_strided_slice %197 {offsets = [1, 0], sizes = [1, 64], strides = [1, 1]} : vector<2x64xf32> to vector<1x64xf32>
    %200 = arith.maximumf %198, %199 : vector<1x64xf32>
    %c0_182 = arith.constant 0 : index
    %c5_183 = arith.constant 5 : index
    %c0_184 = arith.constant 0 : index
    %201 = vector.load %arg10[%c0_182, %c5_183, %c0_184] : memref<1x7x64xf32, #tpu.memory_space<vmem>>, vector<1x1x64xf32>
    %202 = vector.shape_cast %201 : vector<1x1x64xf32> to vector<1x64xf32>
    %203 = vector.shape_cast %200 : vector<1x64xf32> to vector<1x1x64xf32>
    tpu.vector_store %arg10[%c0_182, %c5_183, %c0_184], %203 {strides = array<i32>} : memref<1x7x64xf32, #tpu.memory_space<vmem>>, vector<1x1x64xf32>,
    %c12 = arith.constant 12 : index
    %c0_185 = arith.constant 0 : index
    %204 = vector.load %arg11[%c12, %c0_185] : memref<24x64xf32, #tpu.memory_space<vmem>>, vector<2x64xf32>
    %205 = vector.extract_strided_slice %204 {offsets = [0, 0], sizes = [1, 64], strides = [1, 1]} : vector<2x64xf32> to vector<1x64xf32>
    %206 = vector.extract_strided_slice %204 {offsets = [1, 0], sizes = [1, 64], strides = [1, 1]} : vector<2x64xf32> to vector<1x64xf32>
    %207 = arith.maximumf %205, %206 : vector<1x64xf32>
    %c0_186 = arith.constant 0 : index
    %c6_187 = arith.constant 6 : index
    %c0_188 = arith.constant 0 : index
    %208 = vector.load %arg10[%c0_186, %c6_187, %c0_188] : memref<1x7x64xf32, #tpu.memory_space<vmem>>, vector<1x1x64xf32>
    %209 = vector.shape_cast %208 : vector<1x1x64xf32> to vector<1x64xf32>
    %210 = vector.shape_cast %207 : vector<1x64xf32> to vector<1x1x64xf32>
    tpu.vector_store %arg10[%c0_186, %c6_187, %c0_188], %210 {strides = array<i32>} : memref<1x7x64xf32, #tpu.memory_space<vmem>>, vector<1x1x64xf32>,
    return
  }
  func.func @transform_0(%arg0: i32) -> (i32, i32, i32) {
    %c0_i32 = arith.constant 0 : i32
    %c0_i32_0 = arith.constant 0 : i32
    %c0_i32_1 = arith.constant 0 : i32
    return %arg0, %c0_i32, %c0_i32_0 : i32, i32, i32
  }
  func.func @transform_1(%arg0: i32) -> (i32, i32) {
    %c0_i32 = arith.constant 0 : i32
    %c0_i32_0 = arith.constant 0 : i32
    %c0_i32_1 = arith.constant 0 : i32
    return %c0_i32, %c0_i32_0 : i32, i32
  }
  func.func @transform_2(%arg0: i32) -> (i32, i32) {
    %c0_i32 = arith.constant 0 : i32
    %c0_i32_0 = arith.constant 0 : i32
    %c0_i32_1 = arith.constant 0 : i32
    return %c0_i32, %c0_i32_0 : i32, i32
  }
  func.func @transform_3(%arg0: i32) -> (i32, i32, i32) {
    %c0_i32 = arith.constant 0 : i32
    %c0_i32_0 = arith.constant 0 : i32
    %c0_i32_1 = arith.constant 0 : i32
    %c0_i32_2 = arith.constant 0 : i32
    return %c0_i32, %c0_i32_0, %c0_i32_1 : i32, i32, i32
  }
  func.func @transform_4(%arg0: i32) -> (i32, i32) {
    %c0_i32 = arith.constant 0 : i32
    %c0_i32_0 = arith.constant 0 : i32
    %c0_i32_1 = arith.constant 0 : i32
    return %c0_i32, %c0_i32_0 : i32, i32
  }
  func.func @transform_5(%arg0: i32) -> (i32, i32, i32) {
    %c0_i32 = arith.constant 0 : i32
    %c0_i32_0 = arith.constant 0 : i32
    %c0_i32_1 = arith.constant 0 : i32
    %c0_i32_2 = arith.constant 0 : i32
    return %c0_i32, %c0_i32_0, %c0_i32_1 : i32, i32, i32
  }
  func.func @transform_6(%arg0: i32) -> (i32, i32) {
    %c0_i32 = arith.constant 0 : i32
    %c0_i32_0 = arith.constant 0 : i32
    %c0_i32_1 = arith.constant 0 : i32
    return %c0_i32, %c0_i32_0 : i32, i32
  }
  func.func @transform_7(%arg0: i32) -> (i32, i32, i32) {
    %c0_i32 = arith.constant 0 : i32
    %c0_i32_0 = arith.constant 0 : i32
    %c0_i32_1 = arith.constant 0 : i32
    %c0_i32_2 = arith.constant 0 : i32
    return %c0_i32, %c0_i32_0, %c0_i32_1 : i32, i32, i32
  }
  func.func @transform_8(%arg0: i32) -> (i32, i32) {
    %c0_i32 = arith.constant 0 : i32
    %c0_i32_0 = arith.constant 0 : i32
    %c0_i32_1 = arith.constant 0 : i32
    return %c0_i32, %c0_i32_0 : i32, i32
  }
  func.func @transform_9(%arg0: i32) -> (i32, i32, i32) {
    %c0_i32 = arith.constant 0 : i32
    %c0_i32_0 = arith.constant 0 : i32
    %c0_i32_1 = arith.constant 0 : i32
    return %arg0, %c0_i32, %c0_i32_0 : i32, i32, i32
  }
}

module attributes {stable_mosaic.version = 11 : i64} {
  func.func @kernel(%arg0: i32, %arg1: memref<1x128x128xbf16, #tpu.memory_space<vmem>>, %arg2: memref<128x32xbf16, #tpu.memory_space<vmem>>, %arg3: memref<1x32xf32, #tpu.memory_space<vmem>>, %arg4: memref<8x32x64xf32, #tpu.memory_space<vmem>>, %arg5: memref<1x64xf32, #tpu.memory_space<vmem>>, %arg6: memref<8x64x64xf32, #tpu.memory_space<vmem>>, %arg7: memref<1x64xf32, #tpu.memory_space<vmem>>, %arg8: memref<8x64x64xf32, #tpu.memory_space<vmem>>, %arg9: memref<1x64xf32, #tpu.memory_space<vmem>>, %arg10: memref<1x5x64xf32, #tpu.memory_space<vmem>>, %arg11: memref<128x64xf32, #tpu.memory_space<vmem>>, %arg12: memref<128x64xf32, #tpu.memory_space<vmem>>) attributes {dimension_semantics = [#tpu.dimension_semantics<parallel>], iteration_bounds = array<i64: 2>, scalar_prefetch = 0 : i64, scratch_operands = 2 : i64, tpu.core_type = #tpu.core_type<tc>, window_params = [{transform_indices = @transform_0, window_bounds = array<i64: 1, 128, 128>}, {pipeline_mode = #tpu.pipeline_mode<synchronous>, transform_indices = @transform_1, window_bounds = array<i64: 128, 32>}, {pipeline_mode = #tpu.pipeline_mode<synchronous>, transform_indices = @transform_2, window_bounds = array<i64: 1, 32>}, {pipeline_mode = #tpu.pipeline_mode<synchronous>, transform_indices = @transform_3, window_bounds = array<i64: 8, 32, 64>}, {pipeline_mode = #tpu.pipeline_mode<synchronous>, transform_indices = @transform_4, window_bounds = array<i64: 1, 64>}, {pipeline_mode = #tpu.pipeline_mode<synchronous>, transform_indices = @transform_5, window_bounds = array<i64: 8, 64, 64>}, {pipeline_mode = #tpu.pipeline_mode<synchronous>, transform_indices = @transform_6, window_bounds = array<i64: 1, 64>}, {pipeline_mode = #tpu.pipeline_mode<synchronous>, transform_indices = @transform_7, window_bounds = array<i64: 8, 64, 64>}, {pipeline_mode = #tpu.pipeline_mode<synchronous>, transform_indices = @transform_8, window_bounds = array<i64: 1, 64>}, {transform_indices = @transform_9, window_bounds = array<i64: 1, 5, 64>}]} {
    %c0 = arith.constant 0 : index
    %c0_0 = arith.constant 0 : index
    %c0_1 = arith.constant 0 : index
    %0 = vector.load %arg1[%c0, %c0_0, %c0_1] : memref<1x128x128xbf16, #tpu.memory_space<vmem>>, vector<1x128x128xbf16>
    %1 = vector.shape_cast %0 : vector<1x128x128xbf16> to vector<128x128xbf16>
    %c0_2 = arith.constant 0 : index
    %c0_3 = arith.constant 0 : index
    %2 = vector.load %arg2[%c0_2, %c0_3] : memref<128x32xbf16, #tpu.memory_space<vmem>>, vector<128x32xbf16>
    %cst = arith.constant dense<0.000000e+00> : vector<128x32xf32>
    %3 = tpu.matmul %1, %2, %cst {dimension_numbers = #tpu.dot_dimension_numbers<[1], [0], [0], [1], [0, 0, 1, 1], [], []>} : vector<128x128xbf16>, vector<128x32xbf16>, vector<128x32xf32> -> vector<128x32xf32>
    %c0_4 = arith.constant 0 : index
    %c0_5 = arith.constant 0 : index
    %4 = vector.load %arg3[%c0_4, %c0_5] : memref<1x32xf32, #tpu.memory_space<vmem>>, vector<1x32xf32>
    %5 = vector.broadcast %4 : vector<1x32xf32> to vector<128x32xf32>
    %6 = arith.addf %3, %5 : vector<128x32xf32>
    %cst_6 = arith.constant 0.000000e+00 : f32
    %7 = vector.broadcast %cst_6 : f32 to vector<128x32xf32>
    %8 = arith.cmpf oge, %6, %7 : vector<128x32xf32>
    %cst_7 = arith.constant 0.00999999977 : f32
    %9 = vector.broadcast %cst_7 : f32 to vector<128x32xf32>
    %10 = arith.mulf %9, %6 : vector<128x32xf32>
    %11 = arith.select %8, %6, %10 : vector<128x32xi1>, vector<128x32xf32>
    %cst_8 = arith.constant 0xFF800000 : f32
    %12 = vector.broadcast %cst_8 : f32 to vector<128x64xf32>
    %c0_9 = arith.constant 0 : index
    %c0_10 = arith.constant 0 : index
    %13 = vector.load %arg11[%c0_9, %c0_10] : memref<128x64xf32, #tpu.memory_space<vmem>>, vector<128x64xf32>
    tpu.vector_store %arg11[%c0_9, %c0_10], %12 {strides = array<i32>} : memref<128x64xf32, #tpu.memory_space<vmem>>, vector<128x64xf32>,
    %14 = vector.extract_strided_slice %11 {offsets = [0, 0], sizes = [124, 32], strides = [1, 1]} : vector<128x32xf32> to vector<124x32xf32>
    %c4 = arith.constant 4 : index
    %c0_11 = arith.constant 0 : index
    %15 = vector.load %arg11[%c4, %c0_11] : memref<128x64xf32, #tpu.memory_space<vmem>>, vector<124x32xf32>
    tpu.vector_store %arg11[%c4, %c0_11], %14 {strides = array<i32>} : memref<128x64xf32, #tpu.memory_space<vmem>>, vector<124x32xf32>,
    %cst_12 = arith.constant 0.000000e+00 : f32
    %16 = vector.broadcast %cst_12 : f32 to vector<128x64xf32>
    %c0_13 = arith.constant 0 : index
    %c0_14 = arith.constant 0 : index
    %17 = vector.load %arg12[%c0_13, %c0_14] : memref<128x64xf32, #tpu.memory_space<vmem>>, vector<128x64xf32>
    tpu.vector_store %arg12[%c0_13, %c0_14], %16 {strides = array<i32>} : memref<128x64xf32, #tpu.memory_space<vmem>>, vector<128x64xf32>,
    %c0_15 = arith.constant 0 : index
    %c0_16 = arith.constant 0 : index
    %18 = vector.load %arg11[%c0_15, %c0_16] : memref<128x64xf32, #tpu.memory_space<vmem>>, vector<8x32xf32>
    %19 = vector.extract_strided_slice %18 {offsets = [0, 0], sizes = [4, 32], strides = [1, 1]} : vector<8x32xf32> to vector<4x32xf32>
    %20 = vector.extract_strided_slice %18 {offsets = [4, 0], sizes = [4, 32], strides = [1, 1]} : vector<8x32xf32> to vector<4x32xf32>
    %21 = arith.maximumf %19, %20 : vector<4x32xf32>
    %22 = vector.extract_strided_slice %21 {offsets = [0, 0], sizes = [2, 32], strides = [1, 1]} : vector<4x32xf32> to vector<2x32xf32>
    %23 = vector.extract_strided_slice %21 {offsets = [2, 0], sizes = [2, 32], strides = [1, 1]} : vector<4x32xf32> to vector<2x32xf32>
    %24 = arith.maximumf %22, %23 : vector<2x32xf32>
    %25 = vector.extract_strided_slice %24 {offsets = [0, 0], sizes = [1, 32], strides = [1, 1]} : vector<2x32xf32> to vector<1x32xf32>
    %26 = vector.extract_strided_slice %24 {offsets = [1, 0], sizes = [1, 32], strides = [1, 1]} : vector<2x32xf32> to vector<1x32xf32>
    %27 = arith.maximumf %25, %26 : vector<1x32xf32>
    %c4_17 = arith.constant 4 : index
    %c0_18 = arith.constant 0 : index
    %28 = vector.load %arg12[%c4_17, %c0_18] : memref<128x64xf32, #tpu.memory_space<vmem>>, vector<1x32xf32>
    tpu.vector_store %arg12[%c4_17, %c0_18], %27 {strides = array<i32>} : memref<128x64xf32, #tpu.memory_space<vmem>>, vector<1x32xf32>,
    %c8 = arith.constant 8 : index
    %c0_19 = arith.constant 0 : index
    %29 = vector.load %arg11[%c8, %c0_19] : memref<128x64xf32, #tpu.memory_space<vmem>>, vector<8x32xf32>
    %30 = vector.extract_strided_slice %29 {offsets = [0, 0], sizes = [4, 32], strides = [1, 1]} : vector<8x32xf32> to vector<4x32xf32>
    %31 = vector.extract_strided_slice %29 {offsets = [4, 0], sizes = [4, 32], strides = [1, 1]} : vector<8x32xf32> to vector<4x32xf32>
    %32 = arith.maximumf %30, %31 : vector<4x32xf32>
    %33 = vector.extract_strided_slice %32 {offsets = [0, 0], sizes = [2, 32], strides = [1, 1]} : vector<4x32xf32> to vector<2x32xf32>
    %34 = vector.extract_strided_slice %32 {offsets = [2, 0], sizes = [2, 32], strides = [1, 1]} : vector<4x32xf32> to vector<2x32xf32>
    %35 = arith.maximumf %33, %34 : vector<2x32xf32>
    %36 = vector.extract_strided_slice %35 {offsets = [0, 0], sizes = [1, 32], strides = [1, 1]} : vector<2x32xf32> to vector<1x32xf32>
    %37 = vector.extract_strided_slice %35 {offsets = [1, 0], sizes = [1, 32], strides = [1, 1]} : vector<2x32xf32> to vector<1x32xf32>
    %38 = arith.maximumf %36, %37 : vector<1x32xf32>
    %c5 = arith.constant 5 : index
    %c0_20 = arith.constant 0 : index
    %39 = vector.load %arg12[%c5, %c0_20] : memref<128x64xf32, #tpu.memory_space<vmem>>, vector<1x32xf32>
    tpu.vector_store %arg12[%c5, %c0_20], %38 {strides = array<i32>} : memref<128x64xf32, #tpu.memory_space<vmem>>, vector<1x32xf32>,
    %c16 = arith.constant 16 : index
    %c0_21 = arith.constant 0 : index
    %40 = vector.load %arg11[%c16, %c0_21] : memref<128x64xf32, #tpu.memory_space<vmem>>, vector<8x32xf32>
    %41 = vector.extract_strided_slice %40 {offsets = [0, 0], sizes = [4, 32], strides = [1, 1]} : vector<8x32xf32> to vector<4x32xf32>
    %42 = vector.extract_strided_slice %40 {offsets = [4, 0], sizes = [4, 32], strides = [1, 1]} : vector<8x32xf32> to vector<4x32xf32>
    %43 = arith.maximumf %41, %42 : vector<4x32xf32>
    %44 = vector.extract_strided_slice %43 {offsets = [0, 0], sizes = [2, 32], strides = [1, 1]} : vector<4x32xf32> to vector<2x32xf32>
    %45 = vector.extract_strided_slice %43 {offsets = [2, 0], sizes = [2, 32], strides = [1, 1]} : vector<4x32xf32> to vector<2x32xf32>
    %46 = arith.maximumf %44, %45 : vector<2x32xf32>
    %47 = vector.extract_strided_slice %46 {offsets = [0, 0], sizes = [1, 32], strides = [1, 1]} : vector<2x32xf32> to vector<1x32xf32>
    %48 = vector.extract_strided_slice %46 {offsets = [1, 0], sizes = [1, 32], strides = [1, 1]} : vector<2x32xf32> to vector<1x32xf32>
    %49 = arith.maximumf %47, %48 : vector<1x32xf32>
    %c6 = arith.constant 6 : index
    %c0_22 = arith.constant 0 : index
    %50 = vector.load %arg12[%c6, %c0_22] : memref<128x64xf32, #tpu.memory_space<vmem>>, vector<1x32xf32>
    tpu.vector_store %arg12[%c6, %c0_22], %49 {strides = array<i32>} : memref<128x64xf32, #tpu.memory_space<vmem>>, vector<1x32xf32>,
    %c24 = arith.constant 24 : index
    %c0_23 = arith.constant 0 : index
    %51 = vector.load %arg11[%c24, %c0_23] : memref<128x64xf32, #tpu.memory_space<vmem>>, vector<8x32xf32>
    %52 = vector.extract_strided_slice %51 {offsets = [0, 0], sizes = [4, 32], strides = [1, 1]} : vector<8x32xf32> to vector<4x32xf32>
    %53 = vector.extract_strided_slice %51 {offsets = [4, 0], sizes = [4, 32], strides = [1, 1]} : vector<8x32xf32> to vector<4x32xf32>
    %54 = arith.maximumf %52, %53 : vector<4x32xf32>
    %55 = vector.extract_strided_slice %54 {offsets = [0, 0], sizes = [2, 32], strides = [1, 1]} : vector<4x32xf32> to vector<2x32xf32>
    %56 = vector.extract_strided_slice %54 {offsets = [2, 0], sizes = [2, 32], strides = [1, 1]} : vector<4x32xf32> to vector<2x32xf32>
    %57 = arith.maximumf %55, %56 : vector<2x32xf32>
    %58 = vector.extract_strided_slice %57 {offsets = [0, 0], sizes = [1, 32], strides = [1, 1]} : vector<2x32xf32> to vector<1x32xf32>
    %59 = vector.extract_strided_slice %57 {offsets = [1, 0], sizes = [1, 32], strides = [1, 1]} : vector<2x32xf32> to vector<1x32xf32>
    %60 = arith.maximumf %58, %59 : vector<1x32xf32>
    %c7 = arith.constant 7 : index
    %c0_24 = arith.constant 0 : index
    %61 = vector.load %arg12[%c7, %c0_24] : memref<128x64xf32, #tpu.memory_space<vmem>>, vector<1x32xf32>
    tpu.vector_store %arg12[%c7, %c0_24], %60 {strides = array<i32>} : memref<128x64xf32, #tpu.memory_space<vmem>>, vector<1x32xf32>,
    %c32 = arith.constant 32 : index
    %c0_25 = arith.constant 0 : index
    %62 = vector.load %arg11[%c32, %c0_25] : memref<128x64xf32, #tpu.memory_space<vmem>>, vector<8x32xf32>
    %63 = vector.extract_strided_slice %62 {offsets = [0, 0], sizes = [4, 32], strides = [1, 1]} : vector<8x32xf32> to vector<4x32xf32>
    %64 = vector.extract_strided_slice %62 {offsets = [4, 0], sizes = [4, 32], strides = [1, 1]} : vector<8x32xf32> to vector<4x32xf32>
    %65 = arith.maximumf %63, %64 : vector<4x32xf32>
    %66 = vector.extract_strided_slice %65 {offsets = [0, 0], sizes = [2, 32], strides = [1, 1]} : vector<4x32xf32> to vector<2x32xf32>
    %67 = vector.extract_strided_slice %65 {offsets = [2, 0], sizes = [2, 32], strides = [1, 1]} : vector<4x32xf32> to vector<2x32xf32>
    %68 = arith.maximumf %66, %67 : vector<2x32xf32>
    %69 = vector.extract_strided_slice %68 {offsets = [0, 0], sizes = [1, 32], strides = [1, 1]} : vector<2x32xf32> to vector<1x32xf32>
    %70 = vector.extract_strided_slice %68 {offsets = [1, 0], sizes = [1, 32], strides = [1, 1]} : vector<2x32xf32> to vector<1x32xf32>
    %71 = arith.maximumf %69, %70 : vector<1x32xf32>
    %c8_26 = arith.constant 8 : index
    %c0_27 = arith.constant 0 : index
    %72 = vector.load %arg12[%c8_26, %c0_27] : memref<128x64xf32, #tpu.memory_space<vmem>>, vector<1x32xf32>
    tpu.vector_store %arg12[%c8_26, %c0_27], %71 {strides = array<i32>} : memref<128x64xf32, #tpu.memory_space<vmem>>, vector<1x32xf32>,
    %c40 = arith.constant 40 : index
    %c0_28 = arith.constant 0 : index
    %73 = vector.load %arg11[%c40, %c0_28] : memref<128x64xf32, #tpu.memory_space<vmem>>, vector<8x32xf32>
    %74 = vector.extract_strided_slice %73 {offsets = [0, 0], sizes = [4, 32], strides = [1, 1]} : vector<8x32xf32> to vector<4x32xf32>
    %75 = vector.extract_strided_slice %73 {offsets = [4, 0], sizes = [4, 32], strides = [1, 1]} : vector<8x32xf32> to vector<4x32xf32>
    %76 = arith.maximumf %74, %75 : vector<4x32xf32>
    %77 = vector.extract_strided_slice %76 {offsets = [0, 0], sizes = [2, 32], strides = [1, 1]} : vector<4x32xf32> to vector<2x32xf32>
    %78 = vector.extract_strided_slice %76 {offsets = [2, 0], sizes = [2, 32], strides = [1, 1]} : vector<4x32xf32> to vector<2x32xf32>
    %79 = arith.maximumf %77, %78 : vector<2x32xf32>
    %80 = vector.extract_strided_slice %79 {offsets = [0, 0], sizes = [1, 32], strides = [1, 1]} : vector<2x32xf32> to vector<1x32xf32>
    %81 = vector.extract_strided_slice %79 {offsets = [1, 0], sizes = [1, 32], strides = [1, 1]} : vector<2x32xf32> to vector<1x32xf32>
    %82 = arith.maximumf %80, %81 : vector<1x32xf32>
    %c9 = arith.constant 9 : index
    %c0_29 = arith.constant 0 : index
    %83 = vector.load %arg12[%c9, %c0_29] : memref<128x64xf32, #tpu.memory_space<vmem>>, vector<1x32xf32>
    tpu.vector_store %arg12[%c9, %c0_29], %82 {strides = array<i32>} : memref<128x64xf32, #tpu.memory_space<vmem>>, vector<1x32xf32>,
    %c48 = arith.constant 48 : index
    %c0_30 = arith.constant 0 : index
    %84 = vector.load %arg11[%c48, %c0_30] : memref<128x64xf32, #tpu.memory_space<vmem>>, vector<8x32xf32>
    %85 = vector.extract_strided_slice %84 {offsets = [0, 0], sizes = [4, 32], strides = [1, 1]} : vector<8x32xf32> to vector<4x32xf32>
    %86 = vector.extract_strided_slice %84 {offsets = [4, 0], sizes = [4, 32], strides = [1, 1]} : vector<8x32xf32> to vector<4x32xf32>
    %87 = arith.maximumf %85, %86 : vector<4x32xf32>
    %88 = vector.extract_strided_slice %87 {offsets = [0, 0], sizes = [2, 32], strides = [1, 1]} : vector<4x32xf32> to vector<2x32xf32>
    %89 = vector.extract_strided_slice %87 {offsets = [2, 0], sizes = [2, 32], strides = [1, 1]} : vector<4x32xf32> to vector<2x32xf32>
    %90 = arith.maximumf %88, %89 : vector<2x32xf32>
    %91 = vector.extract_strided_slice %90 {offsets = [0, 0], sizes = [1, 32], strides = [1, 1]} : vector<2x32xf32> to vector<1x32xf32>
    %92 = vector.extract_strided_slice %90 {offsets = [1, 0], sizes = [1, 32], strides = [1, 1]} : vector<2x32xf32> to vector<1x32xf32>
    %93 = arith.maximumf %91, %92 : vector<1x32xf32>
    %c10 = arith.constant 10 : index
    %c0_31 = arith.constant 0 : index
    %94 = vector.load %arg12[%c10, %c0_31] : memref<128x64xf32, #tpu.memory_space<vmem>>, vector<1x32xf32>
    tpu.vector_store %arg12[%c10, %c0_31], %93 {strides = array<i32>} : memref<128x64xf32, #tpu.memory_space<vmem>>, vector<1x32xf32>,
    %c56 = arith.constant 56 : index
    %c0_32 = arith.constant 0 : index
    %95 = vector.load %arg11[%c56, %c0_32] : memref<128x64xf32, #tpu.memory_space<vmem>>, vector<8x32xf32>
    %96 = vector.extract_strided_slice %95 {offsets = [0, 0], sizes = [4, 32], strides = [1, 1]} : vector<8x32xf32> to vector<4x32xf32>
    %97 = vector.extract_strided_slice %95 {offsets = [4, 0], sizes = [4, 32], strides = [1, 1]} : vector<8x32xf32> to vector<4x32xf32>
    %98 = arith.maximumf %96, %97 : vector<4x32xf32>
    %99 = vector.extract_strided_slice %98 {offsets = [0, 0], sizes = [2, 32], strides = [1, 1]} : vector<4x32xf32> to vector<2x32xf32>
    %100 = vector.extract_strided_slice %98 {offsets = [2, 0], sizes = [2, 32], strides = [1, 1]} : vector<4x32xf32> to vector<2x32xf32>
    %101 = arith.maximumf %99, %100 : vector<2x32xf32>
    %102 = vector.extract_strided_slice %101 {offsets = [0, 0], sizes = [1, 32], strides = [1, 1]} : vector<2x32xf32> to vector<1x32xf32>
    %103 = vector.extract_strided_slice %101 {offsets = [1, 0], sizes = [1, 32], strides = [1, 1]} : vector<2x32xf32> to vector<1x32xf32>
    %104 = arith.maximumf %102, %103 : vector<1x32xf32>
    %c11 = arith.constant 11 : index
    %c0_33 = arith.constant 0 : index
    %105 = vector.load %arg12[%c11, %c0_33] : memref<128x64xf32, #tpu.memory_space<vmem>>, vector<1x32xf32>
    tpu.vector_store %arg12[%c11, %c0_33], %104 {strides = array<i32>} : memref<128x64xf32, #tpu.memory_space<vmem>>, vector<1x32xf32>,
    %c64 = arith.constant 64 : index
    %c0_34 = arith.constant 0 : index
    %106 = vector.load %arg11[%c64, %c0_34] : memref<128x64xf32, #tpu.memory_space<vmem>>, vector<8x32xf32>
    %107 = vector.extract_strided_slice %106 {offsets = [0, 0], sizes = [4, 32], strides = [1, 1]} : vector<8x32xf32> to vector<4x32xf32>
    %108 = vector.extract_strided_slice %106 {offsets = [4, 0], sizes = [4, 32], strides = [1, 1]} : vector<8x32xf32> to vector<4x32xf32>
    %109 = arith.maximumf %107, %108 : vector<4x32xf32>
    %110 = vector.extract_strided_slice %109 {offsets = [0, 0], sizes = [2, 32], strides = [1, 1]} : vector<4x32xf32> to vector<2x32xf32>
    %111 = vector.extract_strided_slice %109 {offsets = [2, 0], sizes = [2, 32], strides = [1, 1]} : vector<4x32xf32> to vector<2x32xf32>
    %112 = arith.maximumf %110, %111 : vector<2x32xf32>
    %113 = vector.extract_strided_slice %112 {offsets = [0, 0], sizes = [1, 32], strides = [1, 1]} : vector<2x32xf32> to vector<1x32xf32>
    %114 = vector.extract_strided_slice %112 {offsets = [1, 0], sizes = [1, 32], strides = [1, 1]} : vector<2x32xf32> to vector<1x32xf32>
    %115 = arith.maximumf %113, %114 : vector<1x32xf32>
    %c12 = arith.constant 12 : index
    %c0_35 = arith.constant 0 : index
    %116 = vector.load %arg12[%c12, %c0_35] : memref<128x64xf32, #tpu.memory_space<vmem>>, vector<1x32xf32>
    tpu.vector_store %arg12[%c12, %c0_35], %115 {strides = array<i32>} : memref<128x64xf32, #tpu.memory_space<vmem>>, vector<1x32xf32>,
    %c72 = arith.constant 72 : index
    %c0_36 = arith.constant 0 : index
    %117 = vector.load %arg11[%c72, %c0_36] : memref<128x64xf32, #tpu.memory_space<vmem>>, vector<8x32xf32>
    %118 = vector.extract_strided_slice %117 {offsets = [0, 0], sizes = [4, 32], strides = [1, 1]} : vector<8x32xf32> to vector<4x32xf32>
    %119 = vector.extract_strided_slice %117 {offsets = [4, 0], sizes = [4, 32], strides = [1, 1]} : vector<8x32xf32> to vector<4x32xf32>
    %120 = arith.maximumf %118, %119 : vector<4x32xf32>
    %121 = vector.extract_strided_slice %120 {offsets = [0, 0], sizes = [2, 32], strides = [1, 1]} : vector<4x32xf32> to vector<2x32xf32>
    %122 = vector.extract_strided_slice %120 {offsets = [2, 0], sizes = [2, 32], strides = [1, 1]} : vector<4x32xf32> to vector<2x32xf32>
    %123 = arith.maximumf %121, %122 : vector<2x32xf32>
    %124 = vector.extract_strided_slice %123 {offsets = [0, 0], sizes = [1, 32], strides = [1, 1]} : vector<2x32xf32> to vector<1x32xf32>
    %125 = vector.extract_strided_slice %123 {offsets = [1, 0], sizes = [1, 32], strides = [1, 1]} : vector<2x32xf32> to vector<1x32xf32>
    %126 = arith.maximumf %124, %125 : vector<1x32xf32>
    %c13 = arith.constant 13 : index
    %c0_37 = arith.constant 0 : index
    %127 = vector.load %arg12[%c13, %c0_37] : memref<128x64xf32, #tpu.memory_space<vmem>>, vector<1x32xf32>
    tpu.vector_store %arg12[%c13, %c0_37], %126 {strides = array<i32>} : memref<128x64xf32, #tpu.memory_space<vmem>>, vector<1x32xf32>,
    %c80 = arith.constant 80 : index
    %c0_38 = arith.constant 0 : index
    %128 = vector.load %arg11[%c80, %c0_38] : memref<128x64xf32, #tpu.memory_space<vmem>>, vector<8x32xf32>
    %129 = vector.extract_strided_slice %128 {offsets = [0, 0], sizes = [4, 32], strides = [1, 1]} : vector<8x32xf32> to vector<4x32xf32>
    %130 = vector.extract_strided_slice %128 {offsets = [4, 0], sizes = [4, 32], strides = [1, 1]} : vector<8x32xf32> to vector<4x32xf32>
    %131 = arith.maximumf %129, %130 : vector<4x32xf32>
    %132 = vector.extract_strided_slice %131 {offsets = [0, 0], sizes = [2, 32], strides = [1, 1]} : vector<4x32xf32> to vector<2x32xf32>
    %133 = vector.extract_strided_slice %131 {offsets = [2, 0], sizes = [2, 32], strides = [1, 1]} : vector<4x32xf32> to vector<2x32xf32>
    %134 = arith.maximumf %132, %133 : vector<2x32xf32>
    %135 = vector.extract_strided_slice %134 {offsets = [0, 0], sizes = [1, 32], strides = [1, 1]} : vector<2x32xf32> to vector<1x32xf32>
    %136 = vector.extract_strided_slice %134 {offsets = [1, 0], sizes = [1, 32], strides = [1, 1]} : vector<2x32xf32> to vector<1x32xf32>
    %137 = arith.maximumf %135, %136 : vector<1x32xf32>
    %c14 = arith.constant 14 : index
    %c0_39 = arith.constant 0 : index
    %138 = vector.load %arg12[%c14, %c0_39] : memref<128x64xf32, #tpu.memory_space<vmem>>, vector<1x32xf32>
    tpu.vector_store %arg12[%c14, %c0_39], %137 {strides = array<i32>} : memref<128x64xf32, #tpu.memory_space<vmem>>, vector<1x32xf32>,
    %c88 = arith.constant 88 : index
    %c0_40 = arith.constant 0 : index
    %139 = vector.load %arg11[%c88, %c0_40] : memref<128x64xf32, #tpu.memory_space<vmem>>, vector<8x32xf32>
    %140 = vector.extract_strided_slice %139 {offsets = [0, 0], sizes = [4, 32], strides = [1, 1]} : vector<8x32xf32> to vector<4x32xf32>
    %141 = vector.extract_strided_slice %139 {offsets = [4, 0], sizes = [4, 32], strides = [1, 1]} : vector<8x32xf32> to vector<4x32xf32>
    %142 = arith.maximumf %140, %141 : vector<4x32xf32>
    %143 = vector.extract_strided_slice %142 {offsets = [0, 0], sizes = [2, 32], strides = [1, 1]} : vector<4x32xf32> to vector<2x32xf32>
    %144 = vector.extract_strided_slice %142 {offsets = [2, 0], sizes = [2, 32], strides = [1, 1]} : vector<4x32xf32> to vector<2x32xf32>
    %145 = arith.maximumf %143, %144 : vector<2x32xf32>
    %146 = vector.extract_strided_slice %145 {offsets = [0, 0], sizes = [1, 32], strides = [1, 1]} : vector<2x32xf32> to vector<1x32xf32>
    %147 = vector.extract_strided_slice %145 {offsets = [1, 0], sizes = [1, 32], strides = [1, 1]} : vector<2x32xf32> to vector<1x32xf32>
    %148 = arith.maximumf %146, %147 : vector<1x32xf32>
    %c15 = arith.constant 15 : index
    %c0_41 = arith.constant 0 : index
    %149 = vector.load %arg12[%c15, %c0_41] : memref<128x64xf32, #tpu.memory_space<vmem>>, vector<1x32xf32>
    tpu.vector_store %arg12[%c15, %c0_41], %148 {strides = array<i32>} : memref<128x64xf32, #tpu.memory_space<vmem>>, vector<1x32xf32>,
    %c96 = arith.constant 96 : index
    %c0_42 = arith.constant 0 : index
    %150 = vector.load %arg11[%c96, %c0_42] : memref<128x64xf32, #tpu.memory_space<vmem>>, vector<8x32xf32>
    %151 = vector.extract_strided_slice %150 {offsets = [0, 0], sizes = [4, 32], strides = [1, 1]} : vector<8x32xf32> to vector<4x32xf32>
    %152 = vector.extract_strided_slice %150 {offsets = [4, 0], sizes = [4, 32], strides = [1, 1]} : vector<8x32xf32> to vector<4x32xf32>
    %153 = arith.maximumf %151, %152 : vector<4x32xf32>
    %154 = vector.extract_strided_slice %153 {offsets = [0, 0], sizes = [2, 32], strides = [1, 1]} : vector<4x32xf32> to vector<2x32xf32>
    %155 = vector.extract_strided_slice %153 {offsets = [2, 0], sizes = [2, 32], strides = [1, 1]} : vector<4x32xf32> to vector<2x32xf32>
    %156 = arith.maximumf %154, %155 : vector<2x32xf32>
    %157 = vector.extract_strided_slice %156 {offsets = [0, 0], sizes = [1, 32], strides = [1, 1]} : vector<2x32xf32> to vector<1x32xf32>
    %158 = vector.extract_strided_slice %156 {offsets = [1, 0], sizes = [1, 32], strides = [1, 1]} : vector<2x32xf32> to vector<1x32xf32>
    %159 = arith.maximumf %157, %158 : vector<1x32xf32>
    %c16_43 = arith.constant 16 : index
    %c0_44 = arith.constant 0 : index
    %160 = vector.load %arg12[%c16_43, %c0_44] : memref<128x64xf32, #tpu.memory_space<vmem>>, vector<1x32xf32>
    tpu.vector_store %arg12[%c16_43, %c0_44], %159 {strides = array<i32>} : memref<128x64xf32, #tpu.memory_space<vmem>>, vector<1x32xf32>,
    %c104 = arith.constant 104 : index
    %c0_45 = arith.constant 0 : index
    %161 = vector.load %arg11[%c104, %c0_45] : memref<128x64xf32, #tpu.memory_space<vmem>>, vector<8x32xf32>
    %162 = vector.extract_strided_slice %161 {offsets = [0, 0], sizes = [4, 32], strides = [1, 1]} : vector<8x32xf32> to vector<4x32xf32>
    %163 = vector.extract_strided_slice %161 {offsets = [4, 0], sizes = [4, 32], strides = [1, 1]} : vector<8x32xf32> to vector<4x32xf32>
    %164 = arith.maximumf %162, %163 : vector<4x32xf32>
    %165 = vector.extract_strided_slice %164 {offsets = [0, 0], sizes = [2, 32], strides = [1, 1]} : vector<4x32xf32> to vector<2x32xf32>
    %166 = vector.extract_strided_slice %164 {offsets = [2, 0], sizes = [2, 32], strides = [1, 1]} : vector<4x32xf32> to vector<2x32xf32>
    %167 = arith.maximumf %165, %166 : vector<2x32xf32>
    %168 = vector.extract_strided_slice %167 {offsets = [0, 0], sizes = [1, 32], strides = [1, 1]} : vector<2x32xf32> to vector<1x32xf32>
    %169 = vector.extract_strided_slice %167 {offsets = [1, 0], sizes = [1, 32], strides = [1, 1]} : vector<2x32xf32> to vector<1x32xf32>
    %170 = arith.maximumf %168, %169 : vector<1x32xf32>
    %c17 = arith.constant 17 : index
    %c0_46 = arith.constant 0 : index
    %171 = vector.load %arg12[%c17, %c0_46] : memref<128x64xf32, #tpu.memory_space<vmem>>, vector<1x32xf32>
    tpu.vector_store %arg12[%c17, %c0_46], %170 {strides = array<i32>} : memref<128x64xf32, #tpu.memory_space<vmem>>, vector<1x32xf32>,
    %c112 = arith.constant 112 : index
    %c0_47 = arith.constant 0 : index
    %172 = vector.load %arg11[%c112, %c0_47] : memref<128x64xf32, #tpu.memory_space<vmem>>, vector<8x32xf32>
    %173 = vector.extract_strided_slice %172 {offsets = [0, 0], sizes = [4, 32], strides = [1, 1]} : vector<8x32xf32> to vector<4x32xf32>
    %174 = vector.extract_strided_slice %172 {offsets = [4, 0], sizes = [4, 32], strides = [1, 1]} : vector<8x32xf32> to vector<4x32xf32>
    %175 = arith.maximumf %173, %174 : vector<4x32xf32>
    %176 = vector.extract_strided_slice %175 {offsets = [0, 0], sizes = [2, 32], strides = [1, 1]} : vector<4x32xf32> to vector<2x32xf32>
    %177 = vector.extract_strided_slice %175 {offsets = [2, 0], sizes = [2, 32], strides = [1, 1]} : vector<4x32xf32> to vector<2x32xf32>
    %178 = arith.maximumf %176, %177 : vector<2x32xf32>
    %179 = vector.extract_strided_slice %178 {offsets = [0, 0], sizes = [1, 32], strides = [1, 1]} : vector<2x32xf32> to vector<1x32xf32>
    %180 = vector.extract_strided_slice %178 {offsets = [1, 0], sizes = [1, 32], strides = [1, 1]} : vector<2x32xf32> to vector<1x32xf32>
    %181 = arith.maximumf %179, %180 : vector<1x32xf32>
    %c18 = arith.constant 18 : index
    %c0_48 = arith.constant 0 : index
    %182 = vector.load %arg12[%c18, %c0_48] : memref<128x64xf32, #tpu.memory_space<vmem>>, vector<1x32xf32>
    tpu.vector_store %arg12[%c18, %c0_48], %181 {strides = array<i32>} : memref<128x64xf32, #tpu.memory_space<vmem>>, vector<1x32xf32>,
    %c120 = arith.constant 120 : index
    %c0_49 = arith.constant 0 : index
    %183 = vector.load %arg11[%c120, %c0_49] : memref<128x64xf32, #tpu.memory_space<vmem>>, vector<8x32xf32>
    %184 = vector.extract_strided_slice %183 {offsets = [0, 0], sizes = [4, 32], strides = [1, 1]} : vector<8x32xf32> to vector<4x32xf32>
    %185 = vector.extract_strided_slice %183 {offsets = [4, 0], sizes = [4, 32], strides = [1, 1]} : vector<8x32xf32> to vector<4x32xf32>
    %186 = arith.maximumf %184, %185 : vector<4x32xf32>
    %187 = vector.extract_strided_slice %186 {offsets = [0, 0], sizes = [2, 32], strides = [1, 1]} : vector<4x32xf32> to vector<2x32xf32>
    %188 = vector.extract_strided_slice %186 {offsets = [2, 0], sizes = [2, 32], strides = [1, 1]} : vector<4x32xf32> to vector<2x32xf32>
    %189 = arith.maximumf %187, %188 : vector<2x32xf32>
    %190 = vector.extract_strided_slice %189 {offsets = [0, 0], sizes = [1, 32], strides = [1, 1]} : vector<2x32xf32> to vector<1x32xf32>
    %191 = vector.extract_strided_slice %189 {offsets = [1, 0], sizes = [1, 32], strides = [1, 1]} : vector<2x32xf32> to vector<1x32xf32>
    %192 = arith.maximumf %190, %191 : vector<1x32xf32>
    %c19 = arith.constant 19 : index
    %c0_50 = arith.constant 0 : index
    %193 = vector.load %arg12[%c19, %c0_50] : memref<128x64xf32, #tpu.memory_space<vmem>>, vector<1x32xf32>
    tpu.vector_store %arg12[%c19, %c0_50], %192 {strides = array<i32>} : memref<128x64xf32, #tpu.memory_space<vmem>>, vector<1x32xf32>,
    %c0_51 = arith.constant 0 : index
    %c0_52 = arith.constant 0 : index
    %194 = vector.load %arg12[%c0_51, %c0_52] : memref<128x64xf32, #tpu.memory_space<vmem>>, vector<17x32xf32>
    %c0_53 = arith.constant 0 : index
    %c0_54 = arith.constant 0 : index
    %c0_55 = arith.constant 0 : index
    %195 = vector.load %arg4[%c0_53, %c0_54, %c0_55] : memref<8x32x64xf32, #tpu.memory_space<vmem>>, vector<1x32x64xf32>
    %196 = vector.shape_cast %195 : vector<1x32x64xf32> to vector<32x64xf32>
    %cst_56 = arith.constant dense<0.000000e+00> : vector<17x64xf32>
    %197 = tpu.matmul %194, %196, %cst_56 {dimension_numbers = #tpu.dot_dimension_numbers<[1], [0], [0], [1], [0, 0, 1, 1], [], []>} : vector<17x32xf32>, vector<32x64xf32>, vector<17x64xf32> -> vector<17x64xf32>
    %c1 = arith.constant 1 : index
    %c0_57 = arith.constant 0 : index
    %198 = vector.load %arg12[%c1, %c0_57] : memref<128x64xf32, #tpu.memory_space<vmem>>, vector<17x32xf32>
    %c1_58 = arith.constant 1 : index
    %c0_59 = arith.constant 0 : index
    %c0_60 = arith.constant 0 : index
    %199 = vector.load %arg4[%c1_58, %c0_59, %c0_60] : memref<8x32x64xf32, #tpu.memory_space<vmem>>, vector<1x32x64xf32>
    %200 = vector.shape_cast %199 : vector<1x32x64xf32> to vector<32x64xf32>
    %cst_61 = arith.constant dense<0.000000e+00> : vector<17x64xf32>
    %201 = tpu.matmul %198, %200, %cst_61 {dimension_numbers = #tpu.dot_dimension_numbers<[1], [0], [0], [1], [0, 0, 1, 1], [], []>} : vector<17x32xf32>, vector<32x64xf32>, vector<17x64xf32> -> vector<17x64xf32>
    %202 = arith.addf %197, %201 : vector<17x64xf32>
    %c2 = arith.constant 2 : index
    %c0_62 = arith.constant 0 : index
    %203 = vector.load %arg12[%c2, %c0_62] : memref<128x64xf32, #tpu.memory_space<vmem>>, vector<17x32xf32>
    %c2_63 = arith.constant 2 : index
    %c0_64 = arith.constant 0 : index
    %c0_65 = arith.constant 0 : index
    %204 = vector.load %arg4[%c2_63, %c0_64, %c0_65] : memref<8x32x64xf32, #tpu.memory_space<vmem>>, vector<1x32x64xf32>
    %205 = vector.shape_cast %204 : vector<1x32x64xf32> to vector<32x64xf32>
    %cst_66 = arith.constant dense<0.000000e+00> : vector<17x64xf32>
    %206 = tpu.matmul %203, %205, %cst_66 {dimension_numbers = #tpu.dot_dimension_numbers<[1], [0], [0], [1], [0, 0, 1, 1], [], []>} : vector<17x32xf32>, vector<32x64xf32>, vector<17x64xf32> -> vector<17x64xf32>
    %207 = arith.addf %202, %206 : vector<17x64xf32>
    %c3 = arith.constant 3 : index
    %c0_67 = arith.constant 0 : index
    %208 = vector.load %arg12[%c3, %c0_67] : memref<128x64xf32, #tpu.memory_space<vmem>>, vector<17x32xf32>
    %c3_68 = arith.constant 3 : index
    %c0_69 = arith.constant 0 : index
    %c0_70 = arith.constant 0 : index
    %209 = vector.load %arg4[%c3_68, %c0_69, %c0_70] : memref<8x32x64xf32, #tpu.memory_space<vmem>>, vector<1x32x64xf32>
    %210 = vector.shape_cast %209 : vector<1x32x64xf32> to vector<32x64xf32>
    %cst_71 = arith.constant dense<0.000000e+00> : vector<17x64xf32>
    %211 = tpu.matmul %208, %210, %cst_71 {dimension_numbers = #tpu.dot_dimension_numbers<[1], [0], [0], [1], [0, 0, 1, 1], [], []>} : vector<17x32xf32>, vector<32x64xf32>, vector<17x64xf32> -> vector<17x64xf32>
    %212 = arith.addf %207, %211 : vector<17x64xf32>
    %c4_72 = arith.constant 4 : index
    %c0_73 = arith.constant 0 : index
    %213 = vector.load %arg12[%c4_72, %c0_73] : memref<128x64xf32, #tpu.memory_space<vmem>>, vector<17x32xf32>
    %c4_74 = arith.constant 4 : index
    %c0_75 = arith.constant 0 : index
    %c0_76 = arith.constant 0 : index
    %214 = vector.load %arg4[%c4_74, %c0_75, %c0_76] : memref<8x32x64xf32, #tpu.memory_space<vmem>>, vector<1x32x64xf32>
    %215 = vector.shape_cast %214 : vector<1x32x64xf32> to vector<32x64xf32>
    %cst_77 = arith.constant dense<0.000000e+00> : vector<17x64xf32>
    %216 = tpu.matmul %213, %215, %cst_77 {dimension_numbers = #tpu.dot_dimension_numbers<[1], [0], [0], [1], [0, 0, 1, 1], [], []>} : vector<17x32xf32>, vector<32x64xf32>, vector<17x64xf32> -> vector<17x64xf32>
    %217 = arith.addf %212, %216 : vector<17x64xf32>
    %c5_78 = arith.constant 5 : index
    %c0_79 = arith.constant 0 : index
    %218 = vector.load %arg12[%c5_78, %c0_79] : memref<128x64xf32, #tpu.memory_space<vmem>>, vector<17x32xf32>
    %c5_80 = arith.constant 5 : index
    %c0_81 = arith.constant 0 : index
    %c0_82 = arith.constant 0 : index
    %219 = vector.load %arg4[%c5_80, %c0_81, %c0_82] : memref<8x32x64xf32, #tpu.memory_space<vmem>>, vector<1x32x64xf32>
    %220 = vector.shape_cast %219 : vector<1x32x64xf32> to vector<32x64xf32>
    %cst_83 = arith.constant dense<0.000000e+00> : vector<17x64xf32>
    %221 = tpu.matmul %218, %220, %cst_83 {dimension_numbers = #tpu.dot_dimension_numbers<[1], [0], [0], [1], [0, 0, 1, 1], [], []>} : vector<17x32xf32>, vector<32x64xf32>, vector<17x64xf32> -> vector<17x64xf32>
    %222 = arith.addf %217, %221 : vector<17x64xf32>
    %c6_84 = arith.constant 6 : index
    %c0_85 = arith.constant 0 : index
    %223 = vector.load %arg12[%c6_84, %c0_85] : memref<128x64xf32, #tpu.memory_space<vmem>>, vector<17x32xf32>
    %c6_86 = arith.constant 6 : index
    %c0_87 = arith.constant 0 : index
    %c0_88 = arith.constant 0 : index
    %224 = vector.load %arg4[%c6_86, %c0_87, %c0_88] : memref<8x32x64xf32, #tpu.memory_space<vmem>>, vector<1x32x64xf32>
    %225 = vector.shape_cast %224 : vector<1x32x64xf32> to vector<32x64xf32>
    %cst_89 = arith.constant dense<0.000000e+00> : vector<17x64xf32>
    %226 = tpu.matmul %223, %225, %cst_89 {dimension_numbers = #tpu.dot_dimension_numbers<[1], [0], [0], [1], [0, 0, 1, 1], [], []>} : vector<17x32xf32>, vector<32x64xf32>, vector<17x64xf32> -> vector<17x64xf32>
    %227 = arith.addf %222, %226 : vector<17x64xf32>
    %c7_90 = arith.constant 7 : index
    %c0_91 = arith.constant 0 : index
    %228 = vector.load %arg12[%c7_90, %c0_91] : memref<128x64xf32, #tpu.memory_space<vmem>>, vector<17x32xf32>
    %c7_92 = arith.constant 7 : index
    %c0_93 = arith.constant 0 : index
    %c0_94 = arith.constant 0 : index
    %229 = vector.load %arg4[%c7_92, %c0_93, %c0_94] : memref<8x32x64xf32, #tpu.memory_space<vmem>>, vector<1x32x64xf32>
    %230 = vector.shape_cast %229 : vector<1x32x64xf32> to vector<32x64xf32>
    %cst_95 = arith.constant dense<0.000000e+00> : vector<17x64xf32>
    %231 = tpu.matmul %228, %230, %cst_95 {dimension_numbers = #tpu.dot_dimension_numbers<[1], [0], [0], [1], [0, 0, 1, 1], [], []>} : vector<17x32xf32>, vector<32x64xf32>, vector<17x64xf32> -> vector<17x64xf32>
    %232 = arith.addf %227, %231 : vector<17x64xf32>
    %c0_96 = arith.constant 0 : index
    %c0_97 = arith.constant 0 : index
    %233 = vector.load %arg5[%c0_96, %c0_97] : memref<1x64xf32, #tpu.memory_space<vmem>>, vector<1x64xf32>
    %234 = vector.broadcast %233 : vector<1x64xf32> to vector<17x64xf32>
    %235 = arith.addf %232, %234 : vector<17x64xf32>
    %cst_98 = arith.constant 0.000000e+00 : f32
    %236 = vector.broadcast %cst_98 : f32 to vector<17x64xf32>
    %237 = arith.cmpf oge, %235, %236 : vector<17x64xf32>
    %cst_99 = arith.constant 0.00999999977 : f32
    %238 = vector.broadcast %cst_99 : f32 to vector<17x64xf32>
    %239 = arith.mulf %238, %235 : vector<17x64xf32>
    %240 = arith.select %237, %235, %239 : vector<17x64xi1>, vector<17x64xf32>
    %cst_100 = arith.constant 0.000000e+00 : f32
    %241 = vector.broadcast %cst_100 : f32 to vector<128x64xf32>
    %c0_101 = arith.constant 0 : index
    %c0_102 = arith.constant 0 : index
    %242 = vector.load %arg11[%c0_101, %c0_102] : memref<128x64xf32, #tpu.memory_space<vmem>>, vector<128x64xf32>
    tpu.vector_store %arg11[%c0_101, %c0_102], %241 {strides = array<i32>} : memref<128x64xf32, #tpu.memory_space<vmem>>, vector<128x64xf32>,
    %c4_103 = arith.constant 4 : index
    %c0_104 = arith.constant 0 : index
    %243 = vector.load %arg11[%c4_103, %c0_104] : memref<128x64xf32, #tpu.memory_space<vmem>>, vector<17x64xf32>
    tpu.vector_store %arg11[%c4_103, %c0_104], %240 {strides = array<i32>} : memref<128x64xf32, #tpu.memory_space<vmem>>, vector<17x64xf32>,
    %c0_105 = arith.constant 0 : index
    %c0_106 = arith.constant 0 : index
    %244 = vector.load %arg11[%c0_105, %c0_106] : memref<128x64xf32, #tpu.memory_space<vmem>>, vector<18x64xf32>
    %c0_107 = arith.constant 0 : index
    %c0_108 = arith.constant 0 : index
    %c0_109 = arith.constant 0 : index
    %245 = vector.load %arg6[%c0_107, %c0_108, %c0_109] : memref<8x64x64xf32, #tpu.memory_space<vmem>>, vector<1x64x64xf32>
    %246 = vector.shape_cast %245 : vector<1x64x64xf32> to vector<64x64xf32>
    %cst_110 = arith.constant dense<0.000000e+00> : vector<18x64xf32>
    %247 = tpu.matmul %244, %246, %cst_110 {dimension_numbers = #tpu.dot_dimension_numbers<[1], [0], [0], [1], [0, 0, 1, 1], [], []>} : vector<18x64xf32>, vector<64x64xf32>, vector<18x64xf32> -> vector<18x64xf32>
    %c1_111 = arith.constant 1 : index
    %c0_112 = arith.constant 0 : index
    %248 = vector.load %arg11[%c1_111, %c0_112] : memref<128x64xf32, #tpu.memory_space<vmem>>, vector<18x64xf32>
    %c1_113 = arith.constant 1 : index
    %c0_114 = arith.constant 0 : index
    %c0_115 = arith.constant 0 : index
    %249 = vector.load %arg6[%c1_113, %c0_114, %c0_115] : memref<8x64x64xf32, #tpu.memory_space<vmem>>, vector<1x64x64xf32>
    %250 = vector.shape_cast %249 : vector<1x64x64xf32> to vector<64x64xf32>
    %cst_116 = arith.constant dense<0.000000e+00> : vector<18x64xf32>
    %251 = tpu.matmul %248, %250, %cst_116 {dimension_numbers = #tpu.dot_dimension_numbers<[1], [0], [0], [1], [0, 0, 1, 1], [], []>} : vector<18x64xf32>, vector<64x64xf32>, vector<18x64xf32> -> vector<18x64xf32>
    %252 = arith.addf %247, %251 : vector<18x64xf32>
    %c2_117 = arith.constant 2 : index
    %c0_118 = arith.constant 0 : index
    %253 = vector.load %arg11[%c2_117, %c0_118] : memref<128x64xf32, #tpu.memory_space<vmem>>, vector<18x64xf32>
    %c2_119 = arith.constant 2 : index
    %c0_120 = arith.constant 0 : index
    %c0_121 = arith.constant 0 : index
    %254 = vector.load %arg6[%c2_119, %c0_120, %c0_121] : memref<8x64x64xf32, #tpu.memory_space<vmem>>, vector<1x64x64xf32>
    %255 = vector.shape_cast %254 : vector<1x64x64xf32> to vector<64x64xf32>
    %cst_122 = arith.constant dense<0.000000e+00> : vector<18x64xf32>
    %256 = tpu.matmul %253, %255, %cst_122 {dimension_numbers = #tpu.dot_dimension_numbers<[1], [0], [0], [1], [0, 0, 1, 1], [], []>} : vector<18x64xf32>, vector<64x64xf32>, vector<18x64xf32> -> vector<18x64xf32>
    %257 = arith.addf %252, %256 : vector<18x64xf32>
    %c3_123 = arith.constant 3 : index
    %c0_124 = arith.constant 0 : index
    %258 = vector.load %arg11[%c3_123, %c0_124] : memref<128x64xf32, #tpu.memory_space<vmem>>, vector<18x64xf32>
    %c3_125 = arith.constant 3 : index
    %c0_126 = arith.constant 0 : index
    %c0_127 = arith.constant 0 : index
    %259 = vector.load %arg6[%c3_125, %c0_126, %c0_127] : memref<8x64x64xf32, #tpu.memory_space<vmem>>, vector<1x64x64xf32>
    %260 = vector.shape_cast %259 : vector<1x64x64xf32> to vector<64x64xf32>
    %cst_128 = arith.constant dense<0.000000e+00> : vector<18x64xf32>
    %261 = tpu.matmul %258, %260, %cst_128 {dimension_numbers = #tpu.dot_dimension_numbers<[1], [0], [0], [1], [0, 0, 1, 1], [], []>} : vector<18x64xf32>, vector<64x64xf32>, vector<18x64xf32> -> vector<18x64xf32>
    %262 = arith.addf %257, %261 : vector<18x64xf32>
    %c4_129 = arith.constant 4 : index
    %c0_130 = arith.constant 0 : index
    %263 = vector.load %arg11[%c4_129, %c0_130] : memref<128x64xf32, #tpu.memory_space<vmem>>, vector<18x64xf32>
    %c4_131 = arith.constant 4 : index
    %c0_132 = arith.constant 0 : index
    %c0_133 = arith.constant 0 : index
    %264 = vector.load %arg6[%c4_131, %c0_132, %c0_133] : memref<8x64x64xf32, #tpu.memory_space<vmem>>, vector<1x64x64xf32>
    %265 = vector.shape_cast %264 : vector<1x64x64xf32> to vector<64x64xf32>
    %cst_134 = arith.constant dense<0.000000e+00> : vector<18x64xf32>
    %266 = tpu.matmul %263, %265, %cst_134 {dimension_numbers = #tpu.dot_dimension_numbers<[1], [0], [0], [1], [0, 0, 1, 1], [], []>} : vector<18x64xf32>, vector<64x64xf32>, vector<18x64xf32> -> vector<18x64xf32>
    %267 = arith.addf %262, %266 : vector<18x64xf32>
    %c5_135 = arith.constant 5 : index
    %c0_136 = arith.constant 0 : index
    %268 = vector.load %arg11[%c5_135, %c0_136] : memref<128x64xf32, #tpu.memory_space<vmem>>, vector<18x64xf32>
    %c5_137 = arith.constant 5 : index
    %c0_138 = arith.constant 0 : index
    %c0_139 = arith.constant 0 : index
    %269 = vector.load %arg6[%c5_137, %c0_138, %c0_139] : memref<8x64x64xf32, #tpu.memory_space<vmem>>, vector<1x64x64xf32>
    %270 = vector.shape_cast %269 : vector<1x64x64xf32> to vector<64x64xf32>
    %cst_140 = arith.constant dense<0.000000e+00> : vector<18x64xf32>
    %271 = tpu.matmul %268, %270, %cst_140 {dimension_numbers = #tpu.dot_dimension_numbers<[1], [0], [0], [1], [0, 0, 1, 1], [], []>} : vector<18x64xf32>, vector<64x64xf32>, vector<18x64xf32> -> vector<18x64xf32>
    %272 = arith.addf %267, %271 : vector<18x64xf32>
    %c6_141 = arith.constant 6 : index
    %c0_142 = arith.constant 0 : index
    %273 = vector.load %arg11[%c6_141, %c0_142] : memref<128x64xf32, #tpu.memory_space<vmem>>, vector<18x64xf32>
    %c6_143 = arith.constant 6 : index
    %c0_144 = arith.constant 0 : index
    %c0_145 = arith.constant 0 : index
    %274 = vector.load %arg6[%c6_143, %c0_144, %c0_145] : memref<8x64x64xf32, #tpu.memory_space<vmem>>, vector<1x64x64xf32>
    %275 = vector.shape_cast %274 : vector<1x64x64xf32> to vector<64x64xf32>
    %cst_146 = arith.constant dense<0.000000e+00> : vector<18x64xf32>
    %276 = tpu.matmul %273, %275, %cst_146 {dimension_numbers = #tpu.dot_dimension_numbers<[1], [0], [0], [1], [0, 0, 1, 1], [], []>} : vector<18x64xf32>, vector<64x64xf32>, vector<18x64xf32> -> vector<18x64xf32>
    %277 = arith.addf %272, %276 : vector<18x64xf32>
    %c7_147 = arith.constant 7 : index
    %c0_148 = arith.constant 0 : index
    %278 = vector.load %arg11[%c7_147, %c0_148] : memref<128x64xf32, #tpu.memory_space<vmem>>, vector<18x64xf32>
    %c7_149 = arith.constant 7 : index
    %c0_150 = arith.constant 0 : index
    %c0_151 = arith.constant 0 : index
    %279 = vector.load %arg6[%c7_149, %c0_150, %c0_151] : memref<8x64x64xf32, #tpu.memory_space<vmem>>, vector<1x64x64xf32>
    %280 = vector.shape_cast %279 : vector<1x64x64xf32> to vector<64x64xf32>
    %cst_152 = arith.constant dense<0.000000e+00> : vector<18x64xf32>
    %281 = tpu.matmul %278, %280, %cst_152 {dimension_numbers = #tpu.dot_dimension_numbers<[1], [0], [0], [1], [0, 0, 1, 1], [], []>} : vector<18x64xf32>, vector<64x64xf32>, vector<18x64xf32> -> vector<18x64xf32>
    %282 = arith.addf %277, %281 : vector<18x64xf32>
    %c0_153 = arith.constant 0 : index
    %c0_154 = arith.constant 0 : index
    %283 = vector.load %arg7[%c0_153, %c0_154] : memref<1x64xf32, #tpu.memory_space<vmem>>, vector<1x64xf32>
    %284 = vector.broadcast %283 : vector<1x64xf32> to vector<18x64xf32>
    %285 = arith.addf %282, %284 : vector<18x64xf32>
    %cst_155 = arith.constant 0.000000e+00 : f32
    %286 = vector.broadcast %cst_155 : f32 to vector<18x64xf32>
    %287 = arith.cmpf oge, %285, %286 : vector<18x64xf32>
    %cst_156 = arith.constant 0.00999999977 : f32
    %288 = vector.broadcast %cst_156 : f32 to vector<18x64xf32>
    %289 = arith.mulf %288, %285 : vector<18x64xf32>
    %290 = arith.select %287, %285, %289 : vector<18x64xi1>, vector<18x64xf32>
    %cst_157 = arith.constant 0.000000e+00 : f32
    %291 = vector.broadcast %cst_157 : f32 to vector<128x64xf32>
    %c0_158 = arith.constant 0 : index
    %c0_159 = arith.constant 0 : index
    %292 = vector.load %arg12[%c0_158, %c0_159] : memref<128x64xf32, #tpu.memory_space<vmem>>, vector<128x64xf32>
    tpu.vector_store %arg12[%c0_158, %c0_159], %291 {strides = array<i32>} : memref<128x64xf32, #tpu.memory_space<vmem>>, vector<128x64xf32>,
    %c4_160 = arith.constant 4 : index
    %c0_161 = arith.constant 0 : index
    %293 = vector.load %arg12[%c4_160, %c0_161] : memref<128x64xf32, #tpu.memory_space<vmem>>, vector<18x64xf32>
    tpu.vector_store %arg12[%c4_160, %c0_161], %290 {strides = array<i32>} : memref<128x64xf32, #tpu.memory_space<vmem>>, vector<18x64xf32>,
    %c0_162 = arith.constant 0 : index
    %c0_163 = arith.constant 0 : index
    %294 = vector.load %arg12[%c0_162, %c0_163] : memref<128x64xf32, #tpu.memory_space<vmem>>, vector<19x64xf32>
    %c0_164 = arith.constant 0 : index
    %c0_165 = arith.constant 0 : index
    %c0_166 = arith.constant 0 : index
    %295 = vector.load %arg8[%c0_164, %c0_165, %c0_166] : memref<8x64x64xf32, #tpu.memory_space<vmem>>, vector<1x64x64xf32>
    %296 = vector.shape_cast %295 : vector<1x64x64xf32> to vector<64x64xf32>
    %cst_167 = arith.constant dense<0.000000e+00> : vector<19x64xf32>
    %297 = tpu.matmul %294, %296, %cst_167 {dimension_numbers = #tpu.dot_dimension_numbers<[1], [0], [0], [1], [0, 0, 1, 1], [], []>} : vector<19x64xf32>, vector<64x64xf32>, vector<19x64xf32> -> vector<19x64xf32>
    %c1_168 = arith.constant 1 : index
    %c0_169 = arith.constant 0 : index
    %298 = vector.load %arg12[%c1_168, %c0_169] : memref<128x64xf32, #tpu.memory_space<vmem>>, vector<19x64xf32>
    %c1_170 = arith.constant 1 : index
    %c0_171 = arith.constant 0 : index
    %c0_172 = arith.constant 0 : index
    %299 = vector.load %arg8[%c1_170, %c0_171, %c0_172] : memref<8x64x64xf32, #tpu.memory_space<vmem>>, vector<1x64x64xf32>
    %300 = vector.shape_cast %299 : vector<1x64x64xf32> to vector<64x64xf32>
    %cst_173 = arith.constant dense<0.000000e+00> : vector<19x64xf32>
    %301 = tpu.matmul %298, %300, %cst_173 {dimension_numbers = #tpu.dot_dimension_numbers<[1], [0], [0], [1], [0, 0, 1, 1], [], []>} : vector<19x64xf32>, vector<64x64xf32>, vector<19x64xf32> -> vector<19x64xf32>
    %302 = arith.addf %297, %301 : vector<19x64xf32>
    %c2_174 = arith.constant 2 : index
    %c0_175 = arith.constant 0 : index
    %303 = vector.load %arg12[%c2_174, %c0_175] : memref<128x64xf32, #tpu.memory_space<vmem>>, vector<19x64xf32>
    %c2_176 = arith.constant 2 : index
    %c0_177 = arith.constant 0 : index
    %c0_178 = arith.constant 0 : index
    %304 = vector.load %arg8[%c2_176, %c0_177, %c0_178] : memref<8x64x64xf32, #tpu.memory_space<vmem>>, vector<1x64x64xf32>
    %305 = vector.shape_cast %304 : vector<1x64x64xf32> to vector<64x64xf32>
    %cst_179 = arith.constant dense<0.000000e+00> : vector<19x64xf32>
    %306 = tpu.matmul %303, %305, %cst_179 {dimension_numbers = #tpu.dot_dimension_numbers<[1], [0], [0], [1], [0, 0, 1, 1], [], []>} : vector<19x64xf32>, vector<64x64xf32>, vector<19x64xf32> -> vector<19x64xf32>
    %307 = arith.addf %302, %306 : vector<19x64xf32>
    %c3_180 = arith.constant 3 : index
    %c0_181 = arith.constant 0 : index
    %308 = vector.load %arg12[%c3_180, %c0_181] : memref<128x64xf32, #tpu.memory_space<vmem>>, vector<19x64xf32>
    %c3_182 = arith.constant 3 : index
    %c0_183 = arith.constant 0 : index
    %c0_184 = arith.constant 0 : index
    %309 = vector.load %arg8[%c3_182, %c0_183, %c0_184] : memref<8x64x64xf32, #tpu.memory_space<vmem>>, vector<1x64x64xf32>
    %310 = vector.shape_cast %309 : vector<1x64x64xf32> to vector<64x64xf32>
    %cst_185 = arith.constant dense<0.000000e+00> : vector<19x64xf32>
    %311 = tpu.matmul %308, %310, %cst_185 {dimension_numbers = #tpu.dot_dimension_numbers<[1], [0], [0], [1], [0, 0, 1, 1], [], []>} : vector<19x64xf32>, vector<64x64xf32>, vector<19x64xf32> -> vector<19x64xf32>
    %312 = arith.addf %307, %311 : vector<19x64xf32>
    %c4_186 = arith.constant 4 : index
    %c0_187 = arith.constant 0 : index
    %313 = vector.load %arg12[%c4_186, %c0_187] : memref<128x64xf32, #tpu.memory_space<vmem>>, vector<19x64xf32>
    %c4_188 = arith.constant 4 : index
    %c0_189 = arith.constant 0 : index
    %c0_190 = arith.constant 0 : index
    %314 = vector.load %arg8[%c4_188, %c0_189, %c0_190] : memref<8x64x64xf32, #tpu.memory_space<vmem>>, vector<1x64x64xf32>
    %315 = vector.shape_cast %314 : vector<1x64x64xf32> to vector<64x64xf32>
    %cst_191 = arith.constant dense<0.000000e+00> : vector<19x64xf32>
    %316 = tpu.matmul %313, %315, %cst_191 {dimension_numbers = #tpu.dot_dimension_numbers<[1], [0], [0], [1], [0, 0, 1, 1], [], []>} : vector<19x64xf32>, vector<64x64xf32>, vector<19x64xf32> -> vector<19x64xf32>
    %317 = arith.addf %312, %316 : vector<19x64xf32>
    %c5_192 = arith.constant 5 : index
    %c0_193 = arith.constant 0 : index
    %318 = vector.load %arg12[%c5_192, %c0_193] : memref<128x64xf32, #tpu.memory_space<vmem>>, vector<19x64xf32>
    %c5_194 = arith.constant 5 : index
    %c0_195 = arith.constant 0 : index
    %c0_196 = arith.constant 0 : index
    %319 = vector.load %arg8[%c5_194, %c0_195, %c0_196] : memref<8x64x64xf32, #tpu.memory_space<vmem>>, vector<1x64x64xf32>
    %320 = vector.shape_cast %319 : vector<1x64x64xf32> to vector<64x64xf32>
    %cst_197 = arith.constant dense<0.000000e+00> : vector<19x64xf32>
    %321 = tpu.matmul %318, %320, %cst_197 {dimension_numbers = #tpu.dot_dimension_numbers<[1], [0], [0], [1], [0, 0, 1, 1], [], []>} : vector<19x64xf32>, vector<64x64xf32>, vector<19x64xf32> -> vector<19x64xf32>
    %322 = arith.addf %317, %321 : vector<19x64xf32>
    %c6_198 = arith.constant 6 : index
    %c0_199 = arith.constant 0 : index
    %323 = vector.load %arg12[%c6_198, %c0_199] : memref<128x64xf32, #tpu.memory_space<vmem>>, vector<19x64xf32>
    %c6_200 = arith.constant 6 : index
    %c0_201 = arith.constant 0 : index
    %c0_202 = arith.constant 0 : index
    %324 = vector.load %arg8[%c6_200, %c0_201, %c0_202] : memref<8x64x64xf32, #tpu.memory_space<vmem>>, vector<1x64x64xf32>
    %325 = vector.shape_cast %324 : vector<1x64x64xf32> to vector<64x64xf32>
    %cst_203 = arith.constant dense<0.000000e+00> : vector<19x64xf32>
    %326 = tpu.matmul %323, %325, %cst_203 {dimension_numbers = #tpu.dot_dimension_numbers<[1], [0], [0], [1], [0, 0, 1, 1], [], []>} : vector<19x64xf32>, vector<64x64xf32>, vector<19x64xf32> -> vector<19x64xf32>
    %327 = arith.addf %322, %326 : vector<19x64xf32>
    %c7_204 = arith.constant 7 : index
    %c0_205 = arith.constant 0 : index
    %328 = vector.load %arg12[%c7_204, %c0_205] : memref<128x64xf32, #tpu.memory_space<vmem>>, vector<19x64xf32>
    %c7_206 = arith.constant 7 : index
    %c0_207 = arith.constant 0 : index
    %c0_208 = arith.constant 0 : index
    %329 = vector.load %arg8[%c7_206, %c0_207, %c0_208] : memref<8x64x64xf32, #tpu.memory_space<vmem>>, vector<1x64x64xf32>
    %330 = vector.shape_cast %329 : vector<1x64x64xf32> to vector<64x64xf32>
    %cst_209 = arith.constant dense<0.000000e+00> : vector<19x64xf32>
    %331 = tpu.matmul %328, %330, %cst_209 {dimension_numbers = #tpu.dot_dimension_numbers<[1], [0], [0], [1], [0, 0, 1, 1], [], []>} : vector<19x64xf32>, vector<64x64xf32>, vector<19x64xf32> -> vector<19x64xf32>
    %332 = arith.addf %327, %331 : vector<19x64xf32>
    %c0_210 = arith.constant 0 : index
    %c0_211 = arith.constant 0 : index
    %333 = vector.load %arg9[%c0_210, %c0_211] : memref<1x64xf32, #tpu.memory_space<vmem>>, vector<1x64xf32>
    %334 = vector.broadcast %333 : vector<1x64xf32> to vector<19x64xf32>
    %335 = arith.addf %332, %334 : vector<19x64xf32>
    %cst_212 = arith.constant 0.000000e+00 : f32
    %336 = vector.broadcast %cst_212 : f32 to vector<19x64xf32>
    %337 = arith.cmpf oge, %335, %336 : vector<19x64xf32>
    %cst_213 = arith.constant 0.00999999977 : f32
    %338 = vector.broadcast %cst_213 : f32 to vector<19x64xf32>
    %339 = arith.mulf %338, %335 : vector<19x64xf32>
    %340 = arith.select %337, %335, %339 : vector<19x64xi1>, vector<19x64xf32>
    %cst_214 = arith.constant 0xFF800000 : f32
    %341 = vector.broadcast %cst_214 : f32 to vector<128x64xf32>
    %c0_215 = arith.constant 0 : index
    %c0_216 = arith.constant 0 : index
    %342 = vector.load %arg11[%c0_215, %c0_216] : memref<128x64xf32, #tpu.memory_space<vmem>>, vector<128x64xf32>
    tpu.vector_store %arg11[%c0_215, %c0_216], %341 {strides = array<i32>} : memref<128x64xf32, #tpu.memory_space<vmem>>, vector<128x64xf32>,
    %343 = vector.extract_strided_slice %340 {offsets = [0, 0], sizes = [18, 64], strides = [1, 1]} : vector<19x64xf32> to vector<18x64xf32>
    %c2_217 = arith.constant 2 : index
    %c0_218 = arith.constant 0 : index
    %344 = vector.load %arg11[%c2_217, %c0_218] : memref<128x64xf32, #tpu.memory_space<vmem>>, vector<18x64xf32>
    tpu.vector_store %arg11[%c2_217, %c0_218], %343 {strides = array<i32>} : memref<128x64xf32, #tpu.memory_space<vmem>>, vector<18x64xf32>,
    %c0_219 = arith.constant 0 : index
    %c0_220 = arith.constant 0 : index
    %345 = vector.load %arg11[%c0_219, %c0_220] : memref<128x64xf32, #tpu.memory_space<vmem>>, vector<4x64xf32>
    %346 = vector.extract_strided_slice %345 {offsets = [0, 0], sizes = [2, 64], strides = [1, 1]} : vector<4x64xf32> to vector<2x64xf32>
    %347 = vector.extract_strided_slice %345 {offsets = [2, 0], sizes = [2, 64], strides = [1, 1]} : vector<4x64xf32> to vector<2x64xf32>
    %348 = arith.maximumf %346, %347 : vector<2x64xf32>
    %349 = vector.extract_strided_slice %348 {offsets = [0, 0], sizes = [1, 64], strides = [1, 1]} : vector<2x64xf32> to vector<1x64xf32>
    %350 = vector.extract_strided_slice %348 {offsets = [1, 0], sizes = [1, 64], strides = [1, 1]} : vector<2x64xf32> to vector<1x64xf32>
    %351 = arith.maximumf %349, %350 : vector<1x64xf32>
    %c0_221 = arith.constant 0 : index
    %c0_222 = arith.constant 0 : index
    %c0_223 = arith.constant 0 : index
    %352 = vector.load %arg10[%c0_221, %c0_222, %c0_223] : memref<1x5x64xf32, #tpu.memory_space<vmem>>, vector<1x1x64xf32>
    %353 = vector.shape_cast %352 : vector<1x1x64xf32> to vector<1x64xf32>
    %354 = vector.shape_cast %351 : vector<1x64xf32> to vector<1x1x64xf32>
    tpu.vector_store %arg10[%c0_221, %c0_222, %c0_223], %354 {strides = array<i32>} : memref<1x5x64xf32, #tpu.memory_space<vmem>>, vector<1x1x64xf32>,
    %c4_224 = arith.constant 4 : index
    %c0_225 = arith.constant 0 : index
    %355 = vector.load %arg11[%c4_224, %c0_225] : memref<128x64xf32, #tpu.memory_space<vmem>>, vector<4x64xf32>
    %356 = vector.extract_strided_slice %355 {offsets = [0, 0], sizes = [2, 64], strides = [1, 1]} : vector<4x64xf32> to vector<2x64xf32>
    %357 = vector.extract_strided_slice %355 {offsets = [2, 0], sizes = [2, 64], strides = [1, 1]} : vector<4x64xf32> to vector<2x64xf32>
    %358 = arith.maximumf %356, %357 : vector<2x64xf32>
    %359 = vector.extract_strided_slice %358 {offsets = [0, 0], sizes = [1, 64], strides = [1, 1]} : vector<2x64xf32> to vector<1x64xf32>
    %360 = vector.extract_strided_slice %358 {offsets = [1, 0], sizes = [1, 64], strides = [1, 1]} : vector<2x64xf32> to vector<1x64xf32>
    %361 = arith.maximumf %359, %360 : vector<1x64xf32>
    %c0_226 = arith.constant 0 : index
    %c1_227 = arith.constant 1 : index
    %c0_228 = arith.constant 0 : index
    %362 = vector.load %arg10[%c0_226, %c1_227, %c0_228] : memref<1x5x64xf32, #tpu.memory_space<vmem>>, vector<1x1x64xf32>
    %363 = vector.shape_cast %362 : vector<1x1x64xf32> to vector<1x64xf32>
    %364 = vector.shape_cast %361 : vector<1x64xf32> to vector<1x1x64xf32>
    tpu.vector_store %arg10[%c0_226, %c1_227, %c0_228], %364 {strides = array<i32>} : memref<1x5x64xf32, #tpu.memory_space<vmem>>, vector<1x1x64xf32>,
    %c8_229 = arith.constant 8 : index
    %c0_230 = arith.constant 0 : index
    %365 = vector.load %arg11[%c8_229, %c0_230] : memref<128x64xf32, #tpu.memory_space<vmem>>, vector<4x64xf32>
    %366 = vector.extract_strided_slice %365 {offsets = [0, 0], sizes = [2, 64], strides = [1, 1]} : vector<4x64xf32> to vector<2x64xf32>
    %367 = vector.extract_strided_slice %365 {offsets = [2, 0], sizes = [2, 64], strides = [1, 1]} : vector<4x64xf32> to vector<2x64xf32>
    %368 = arith.maximumf %366, %367 : vector<2x64xf32>
    %369 = vector.extract_strided_slice %368 {offsets = [0, 0], sizes = [1, 64], strides = [1, 1]} : vector<2x64xf32> to vector<1x64xf32>
    %370 = vector.extract_strided_slice %368 {offsets = [1, 0], sizes = [1, 64], strides = [1, 1]} : vector<2x64xf32> to vector<1x64xf32>
    %371 = arith.maximumf %369, %370 : vector<1x64xf32>
    %c0_231 = arith.constant 0 : index
    %c2_232 = arith.constant 2 : index
    %c0_233 = arith.constant 0 : index
    %372 = vector.load %arg10[%c0_231, %c2_232, %c0_233] : memref<1x5x64xf32, #tpu.memory_space<vmem>>, vector<1x1x64xf32>
    %373 = vector.shape_cast %372 : vector<1x1x64xf32> to vector<1x64xf32>
    %374 = vector.shape_cast %371 : vector<1x64xf32> to vector<1x1x64xf32>
    tpu.vector_store %arg10[%c0_231, %c2_232, %c0_233], %374 {strides = array<i32>} : memref<1x5x64xf32, #tpu.memory_space<vmem>>, vector<1x1x64xf32>,
    %c12_234 = arith.constant 12 : index
    %c0_235 = arith.constant 0 : index
    %375 = vector.load %arg11[%c12_234, %c0_235] : memref<128x64xf32, #tpu.memory_space<vmem>>, vector<4x64xf32>
    %376 = vector.extract_strided_slice %375 {offsets = [0, 0], sizes = [2, 64], strides = [1, 1]} : vector<4x64xf32> to vector<2x64xf32>
    %377 = vector.extract_strided_slice %375 {offsets = [2, 0], sizes = [2, 64], strides = [1, 1]} : vector<4x64xf32> to vector<2x64xf32>
    %378 = arith.maximumf %376, %377 : vector<2x64xf32>
    %379 = vector.extract_strided_slice %378 {offsets = [0, 0], sizes = [1, 64], strides = [1, 1]} : vector<2x64xf32> to vector<1x64xf32>
    %380 = vector.extract_strided_slice %378 {offsets = [1, 0], sizes = [1, 64], strides = [1, 1]} : vector<2x64xf32> to vector<1x64xf32>
    %381 = arith.maximumf %379, %380 : vector<1x64xf32>
    %c0_236 = arith.constant 0 : index
    %c3_237 = arith.constant 3 : index
    %c0_238 = arith.constant 0 : index
    %382 = vector.load %arg10[%c0_236, %c3_237, %c0_238] : memref<1x5x64xf32, #tpu.memory_space<vmem>>, vector<1x1x64xf32>
    %383 = vector.shape_cast %382 : vector<1x1x64xf32> to vector<1x64xf32>
    %384 = vector.shape_cast %381 : vector<1x64xf32> to vector<1x1x64xf32>
    tpu.vector_store %arg10[%c0_236, %c3_237, %c0_238], %384 {strides = array<i32>} : memref<1x5x64xf32, #tpu.memory_space<vmem>>, vector<1x1x64xf32>,
    %c16_239 = arith.constant 16 : index
    %c0_240 = arith.constant 0 : index
    %385 = vector.load %arg11[%c16_239, %c0_240] : memref<128x64xf32, #tpu.memory_space<vmem>>, vector<4x64xf32>
    %386 = vector.extract_strided_slice %385 {offsets = [0, 0], sizes = [2, 64], strides = [1, 1]} : vector<4x64xf32> to vector<2x64xf32>
    %387 = vector.extract_strided_slice %385 {offsets = [2, 0], sizes = [2, 64], strides = [1, 1]} : vector<4x64xf32> to vector<2x64xf32>
    %388 = arith.maximumf %386, %387 : vector<2x64xf32>
    %389 = vector.extract_strided_slice %388 {offsets = [0, 0], sizes = [1, 64], strides = [1, 1]} : vector<2x64xf32> to vector<1x64xf32>
    %390 = vector.extract_strided_slice %388 {offsets = [1, 0], sizes = [1, 64], strides = [1, 1]} : vector<2x64xf32> to vector<1x64xf32>
    %391 = arith.maximumf %389, %390 : vector<1x64xf32>
    %c0_241 = arith.constant 0 : index
    %c4_242 = arith.constant 4 : index
    %c0_243 = arith.constant 0 : index
    %392 = vector.load %arg10[%c0_241, %c4_242, %c0_243] : memref<1x5x64xf32, #tpu.memory_space<vmem>>, vector<1x1x64xf32>
    %393 = vector.shape_cast %392 : vector<1x1x64xf32> to vector<1x64xf32>
    %394 = vector.shape_cast %391 : vector<1x64xf32> to vector<1x1x64xf32>
    tpu.vector_store %arg10[%c0_241, %c4_242, %c0_243], %394 {strides = array<i32>} : memref<1x5x64xf32, #tpu.memory_space<vmem>>, vector<1x1x64xf32>,
    return
  }
  func.func @transform_0(%arg0: i32) -> (i32, i32, i32) {
    %c0_i32 = arith.constant 0 : i32
    %c0_i32_0 = arith.constant 0 : i32
    %c0_i32_1 = arith.constant 0 : i32
    return %arg0, %c0_i32, %c0_i32_0 : i32, i32, i32
  }
  func.func @transform_1(%arg0: i32) -> (i32, i32) {
    %c0_i32 = arith.constant 0 : i32
    %c0_i32_0 = arith.constant 0 : i32
    %c0_i32_1 = arith.constant 0 : i32
    return %c0_i32, %c0_i32_0 : i32, i32
  }
  func.func @transform_2(%arg0: i32) -> (i32, i32) {
    %c0_i32 = arith.constant 0 : i32
    %c0_i32_0 = arith.constant 0 : i32
    %c0_i32_1 = arith.constant 0 : i32
    return %c0_i32, %c0_i32_0 : i32, i32
  }
  func.func @transform_3(%arg0: i32) -> (i32, i32, i32) {
    %c0_i32 = arith.constant 0 : i32
    %c0_i32_0 = arith.constant 0 : i32
    %c0_i32_1 = arith.constant 0 : i32
    %c0_i32_2 = arith.constant 0 : i32
    return %c0_i32, %c0_i32_0, %c0_i32_1 : i32, i32, i32
  }
  func.func @transform_4(%arg0: i32) -> (i32, i32) {
    %c0_i32 = arith.constant 0 : i32
    %c0_i32_0 = arith.constant 0 : i32
    %c0_i32_1 = arith.constant 0 : i32
    return %c0_i32, %c0_i32_0 : i32, i32
  }
  func.func @transform_5(%arg0: i32) -> (i32, i32, i32) {
    %c0_i32 = arith.constant 0 : i32
    %c0_i32_0 = arith.constant 0 : i32
    %c0_i32_1 = arith.constant 0 : i32
    %c0_i32_2 = arith.constant 0 : i32
    return %c0_i32, %c0_i32_0, %c0_i32_1 : i32, i32, i32
  }
  func.func @transform_6(%arg0: i32) -> (i32, i32) {
    %c0_i32 = arith.constant 0 : i32
    %c0_i32_0 = arith.constant 0 : i32
    %c0_i32_1 = arith.constant 0 : i32
    return %c0_i32, %c0_i32_0 : i32, i32
  }
  func.func @transform_7(%arg0: i32) -> (i32, i32, i32) {
    %c0_i32 = arith.constant 0 : i32
    %c0_i32_0 = arith.constant 0 : i32
    %c0_i32_1 = arith.constant 0 : i32
    %c0_i32_2 = arith.constant 0 : i32
    return %c0_i32, %c0_i32_0, %c0_i32_1 : i32, i32, i32
  }
  func.func @transform_8(%arg0: i32) -> (i32, i32) {
    %c0_i32 = arith.constant 0 : i32
    %c0_i32_0 = arith.constant 0 : i32
    %c0_i32_1 = arith.constant 0 : i32
    return %c0_i32, %c0_i32_0 : i32, i32
  }
  func.func @transform_9(%arg0: i32) -> (i32, i32, i32) {
    %c0_i32 = arith.constant 0 : i32
    %c0_i32_0 = arith.constant 0 : i32
    %c0_i32_1 = arith.constant 0 : i32
    return %arg0, %c0_i32, %c0_i32_0 : i32, i32, i32
  }
}

</mosaic_0001>

<bundles_post_ra>
// kernel: _forward.3
= control target key start
LH: loop header
LB: loop body
LE: loop exit
PB: predicated region body
PF: predicated region fallthrough
CT: control target
= control target key end

     0   :  { %s2444_s30 = smov 0   ;;  %s3120_s0 = inlined_call_operand.vmem [shape: bf16[2,16,1024], index: 0, kind: input, shape index: {}]   ;;  %s3121_s1 = inlined_call_operand.vmem [shape: bf16[1024,32], index: 1, kind: input, shape index: {}]   ;;  %s3122_s2 = inlined_call_operand.vmem [shape: f32[1,32], index: 2, kind: input, shape index: {}]   ;;  %s3123_s3 = inlined_call_operand.vmem [shape: f32[6,32,64], index: 3, kind: input, shape index: {}]   ;;  %s3124_s4 = inlined_call_operand.vmem [shape: f32[1,64], index: 4, kind: input, shape index: {}]   ;;  %s3125_s5 = inlined_call_operand.vmem [shape: f32[6,64,64], index: 5, kind: input, shape index: {}]   ;;  %s3126_s6 = inlined_call_operand.vmem [shape: f32[1,64], index: 6, kind: input, shape index: {}]   ;;  %s3127_s7 = inlined_call_operand.vmem [shape: f32[6,64,64], index: 7, kind: input, shape index: {}]   ;;  %s3128_s8 = inlined_call_operand.vmem [shape: f32[1,64], index: 8, kind: input, shape index: {}]   ;;  %s3129_s9 = inlined_call_operand.vmem [shape: f32[2,7,64], index: 9, kind: output, shape index: {}]  }
   0x1 LB: > { %s1869_s10 = sadd.s32 4294967295, %s2390_s30   ;;  %p1873_p0 = scmp.ge.s32.totalorder %s2390_s30, 1  ;;  %s2390_s30 = sphi %s2444_s30, %s19_s30  }
   0x2   : > { %p287_p1 = scmp.lt.s32.totalorder %s2390_s30, 3 }
   0x4   : > { %p288_p2 = pnand %p1873_p0, %p287_p1 }
   0x5   : > { %p322_p3 = scmp.lt.s32.totalorder (!%p288_p2), %s1869_s10, 1 }
   0x6   : > { %291 = sbr.rel (%p288_p2) target bundleno = 743 (0x2e7), region = 56 }
   0xb   : > { %v2313_v0 = vld [vmem:[%s3121_s1 + $0x38] sm:$0xff]  ;;  %v2312_v4 = vld [vmem:[%s3121_s1 + $0x30] sm:$0xff]  ;;  %v2311_v8 = vld [vmem:[%s3121_s1 + $0x28] sm:$0xff]  ;;  %s3131_s10 = smov (!%p322_p3, %s1869_s10), 1  ;;  %vm1013_vm0 = vcmask 523264   ;;  %vm1017_vm2 = vcmask 261120  }
   0xc   : > { %v2321_v1 = vld [vmem:[%s3121_s1 + $0x78] sm:$0xff]  ;;  %895 = vmatpush.bf16.msra.mxu0 %v2313_v0  ;;  %v2320_v5 = vld [vmem:[%s3121_s1 + $0x70] sm:$0xff]  ;;  %v2319_v9 = vld [vmem:[%s3121_s1 + $0x68] sm:$0xff]  ;;  %s2297_s21 = sshll.u32 %s3131_s10, 6  ;;  %vm1019_vm4 = vcmask 253952   ;;  %vm1242_vm6 = vcmask 521216  }
   0xd   : > { %v2329_v2 = vld [vmem:[%s3121_s1 + $0xb8] sm:$0xff]  ;;  %909 = vmatpush.bf16.msra.mxu1 %v2321_v1  ;;  %v2328_v6 = vld [vmem:[%s3121_s1 + $0xb0] sm:$0xff]  ;;  %v2327_v10 = vld [vmem:[%s3121_s1 + $0xa8] sm:$0xff]  ;;  %s2546_s13 = scalar_lea.vmem %s3120_s0, %s2297_s21  ;;  %vm1507_vm9 = vcmask 516096   ;;  %s1876_s14 = sshll.u32 %s3131_s10, 3  ;;  %vm1772_vm12 = vcmask 519168  }
   0xe   : > { %v2337_v3 = vld [vmem:[%s3121_s1 + $0xf8] sm:$0xff]  ;;  %923 = vmatpush.bf16.msra.mxu2 %v2329_v2  ;;  %v2336_v7 = vld [vmem:[%s3121_s1 + $0xf0] sm:$0xff]  ;;  %v2335_v11 = vld [vmem:[%s3121_s1 + $0xe8] sm:$0xff]  ;;  %s330_s17 = scalar_lea.vmem %s3129_s9, %s1876_s14 }
   0xf   : > { %937 = vmatpush.bf16.msra.mxu3 %v2337_v3  ;;  %v2310_v12 = vld [vmem:[%s3121_s1 + $0x20] sm:$0xff]  ;;  %v2309_v16 = vld [vmem:[%s3121_s1 + $0x18] sm:$0xff]  ;;  %v2308_v20 = vld [vmem:[%s3121_s1 + $0x10] sm:$0xff] }
  0x10   : > { %896 = vmatpush.bf16.msra.mxu0 %v2312_v4  ;;  %v2318_v13 = vld [vmem:[%s3121_s1 + $0x60] sm:$0xff]  ;;  %v2317_v17 = vld [vmem:[%s3121_s1 + $0x58] sm:$0xff]  ;;  %v2316_v21 = vld [vmem:[%s3121_s1 + $0x50] sm:$0xff] }
  0x11   : > { %910 = vmatpush.bf16.msra.mxu1 %v2320_v5  ;;  %v2326_v14 = vld [vmem:[%s3121_s1 + $0xa0] sm:$0xff]  ;;  %v2325_v18 = vld [vmem:[%s3121_s1 + $0x98] sm:$0xff]  ;;  %v2324_v22 = vld [vmem:[%s3121_s1 + $0x90] sm:$0xff] }
  0x12   : > { %924 = vmatpush.bf16.msra.mxu2 %v2328_v6  ;;  %v2334_v15 = vld [vmem:[%s3121_s1 + $0xe0] sm:$0xff]  ;;  %v2333_v19 = vld [vmem:[%s3121_s1 + $0xd8] sm:$0xff]  ;;  %v2332_v23 = vld [vmem:[%s3121_s1 + $0xd0] sm:$0xff] }
  0x13   : > { %938 = vmatpush.bf16.msra.mxu3 %v2336_v7  ;;  %v2307_v24 = vld [vmem:[%s3121_s1 + $0x8] sm:$0xff]  ;;  %v2306_v28 = vld [vmem:[%s3121_s1] sm:$0xff]  ;;  %v2345_v32 = vld [vmem:[%s3121_s1 + $0x138] sm:$0xff] }
  0x14   : > { %897 = vmatpush.bf16.msra.mxu0 %v2311_v8  ;;  %v2315_v25 = vld [vmem:[%s3121_s1 + $0x48] sm:$0xff]  ;;  %v2314_v29 = vld [vmem:[%s3121_s1 + $0x40] sm:$0xff]  ;;  %v2353_v33 = vld [vmem:[%s3121_s1 + $0x178] sm:$0xff] }
  0x15   : > { %911 = vmatpush.bf16.msra.mxu1 %v2319_v9  ;;  %v2323_v26 = vld [vmem:[%s3121_s1 + $0x88] sm:$0xff]  ;;  %v2322_v30 = vld [vmem:[%s3121_s1 + $0x80] sm:$0xff]  ;;  %v2361_v42 = vld [vmem:[%s3121_s1 + $0x1b8] sm:$0xff] }
  0x16   : > { %925 = vmatpush.bf16.msra.mxu2 %v2327_v10  ;;  %v2331_v27 = vld [vmem:[%s3121_s1 + $0xc8] sm:$0xff]  ;;  %v2330_v31 = vld [vmem:[%s3121_s1 + $0xc0] sm:$0xff]  ;;  %v2369_v43 = vld [vmem:[%s3121_s1 + $0x1f8] sm:$0xff] }
  0x17   : > { %939 = vmatpush.bf16.msra.mxu3 %v2335_v11  ;;  %v1887_v34 = vld [vmem:[%s2546_s13 + $0x8] sm:$0xf]  ;;  %v1879_v36 = vld [vmem:[%s2546_s13] sm:$0xf]  ;;  %v2299_v38 = vld [vmem:[%s2546_s13 + $0xc] sm:$0xf] }
  0x18   : > { %898 = vmatpush.bf16.msra.mxu0 %v2310_v12  ;;  %v2303_v35 = vld [vmem:[%s2546_s13 + $0x24] sm:$0xf0]  ;;  %v2302_v37 = vld [vmem:[%s2546_s13 + $0x1c] sm:$0xf0]  ;;  %v1889_v39 = vld [vmem:[%s2546_s13 + $0x28] sm:$0xf0] }
  0x19   : > { %912 = vmatpush.bf16.msra.mxu1 %v2318_v13  ;;  %v2298_v40 = vld [vmem:[%s2546_s13 + $0x4] sm:$0xf]  ;;  %v1888_v44 = vor.u32 %v2303_v35, %v1887_v34  ;;  %v1880_v45 = vor.u32 %v2302_v37, %v1879_v36  ;;  %v1892_v46 = vor.u32 %v2299_v38, %v1889_v39  ;;  %v2344_v48 = vld [vmem:[%s3121_s1 + $0x130] sm:$0xff]  ;;  %v2343_v52 = vld [vmem:[%s3121_s1 + $0x128] sm:$0xff] }
  0x1a   : > { %926 = vmatpush.bf16.msra.mxu2 %v2326_v14  ;;  %v1881_v41 = vld [vmem:[%s2546_s13 + $0x20] sm:$0xf0]  ;;  %v2352_v49 = vld [vmem:[%s3121_s1 + $0x170] sm:$0xff]  ;;  %v2351_v53 = vld [vmem:[%s3121_s1 + $0x168] sm:$0xff] }
  0x1b   : > { %940 = vmatpush.bf16.msra.mxu3 %v2334_v15  ;;  %v1884_v47 = vor.u32 %v2298_v40, %v1881_v41  ;;  %v2360_v50 = vld [vmem:[%s3121_s1 + $0x1b0] sm:$0xff]  ;;  %v2359_v54 = vld [vmem:[%s3121_s1 + $0x1a8] sm:$0xff]  ;;  %v2342_v56 = vld [vmem:[%s3121_s1 + $0x120] sm:$0xff] }
  0x1c   : > { %899 = vmatpush.bf16.msra.mxu0 %v2309_v16  ;;  %v2368_v51 = vld [vmem:[%s3121_s1 + $0x1f0] sm:$0xff]  ;;  %v2367_v55 = vld [vmem:[%s3121_s1 + $0x1e8] sm:$0xff]  ;;  %v2350_v57 = vld [vmem:[%s3121_s1 + $0x160] sm:$0xff] }
  0x1d   : > { %913 = vmatpush.bf16.msra.mxu1 %v2317_v17  ;;  %v2358_v58 = vld [vmem:[%s3121_s1 + $0x1a0] sm:$0xff]  ;;  %v2341_v60 = vld [vmem:[%s3121_s1 + $0x118] sm:$0xff]  ;;  %v2340_v0 = vld [vmem:[%s3121_s1 + $0x110] sm:$0xff] }
  0x1e   : > { %927 = vmatpush.bf16.msra.mxu2 %v2325_v18  ;;  %v2366_v59 = vld [vmem:[%s3121_s1 + $0x1e0] sm:$0xff]  ;;  %v2349_v61 = vld [vmem:[%s3121_s1 + $0x158] sm:$0xff]  ;;  %v2348_v1 = vld [vmem:[%s3121_s1 + $0x150] sm:$0xff] }
  0x1f   : > { %941 = vmatpush.bf16.msra.mxu3 %v2333_v19  ;;  %v2357_v62 = vld [vmem:[%s3121_s1 + $0x198] sm:$0xff]  ;;  %v2356_v2 = vld [vmem:[%s3121_s1 + $0x190] sm:$0xff]  ;;  %v2339_v4 = vld [vmem:[%s3121_s1 + $0x108] sm:$0xff] }
  0x20   : > { %900 = vmatpush.bf16.msra.mxu0 %v2308_v20  ;;  %v2365_v63 = vld [vmem:[%s3121_s1 + $0x1d8] sm:$0xff]  ;;  %v2364_v3 = vld [vmem:[%s3121_s1 + $0x1d0] sm:$0xff]  ;;  %v2347_v5 = vld [vmem:[%s3121_s1 + $0x148] sm:$0xff] }
  0x21   : > { %914 = vmatpush.bf16.msra.mxu1 %v2316_v21  ;;  %v2355_v6 = vld [vmem:[%s3121_s1 + $0x188] sm:$0xff]  ;;  %v2338_v8 = vld [vmem:[%s3121_s1 + $0x100] sm:$0xff]  ;;  %v1895_v12 = vld [vmem:[%s2546_s13 + $0x10] sm:$0xf] }
  0x22   : > { %928 = vmatpush.bf16.msra.mxu2 %v2324_v22  ;;  %v2363_v7 = vld [vmem:[%s3121_s1 + $0x1c8] sm:$0xff]  ;;  %v2346_v9 = vld [vmem:[%s3121_s1 + $0x140] sm:$0xff]  ;;  %v2304_v13 = vld [vmem:[%s2546_s13 + $0x2c] sm:$0xf0] }
  0x23   : > { %942 = vmatpush.bf16.msra.mxu3 %v2332_v23  ;;  %v2354_v10 = vld [vmem:[%s3121_s1 + $0x180] sm:$0xff]  ;;  %v2300_v14 = vld [vmem:[%s2546_s13 + $0x14] sm:$0xf]  ;;  %v1903_v16 = vld [vmem:[%s2546_s13 + $0x18] sm:$0xf]  ;;  %v1896_v20 = vor.u32 %v2304_v13, %v1895_v12 }
  0x24   : > { %901 = vmatpush.bf16.msra.mxu0 %v2307_v24  ;;  %v2362_v11 = vld [vmem:[%s3121_s1 + $0x1c0] sm:$0xff]  ;;  %v1897_v15 = vld [vmem:[%s2546_s13 + $0x30] sm:$0xf0]  ;;  %v2305_v17 = vld [vmem:[%s2546_s13 + $0x34] sm:$0xf0] }
  0x25   : > { %915 = vmatpush.bf16.msra.mxu1 %v2315_v25  ;;  %v2301_v18 = vld [vmem:[%s2546_s13 + $0x1c] sm:$0xf]  ;;  %v1900_v21 = vor.u32 %v2300_v14, %v1897_v15  ;;  %v1904_v22 = vor.u32 %v2305_v17, %v1903_v16  ;;  %v2392_v25 = vmov -inf   ;;  %v2186_v13 = vld [vmem:[%s3123_s3 + $0xa0] sm:$0xff]  ;;  %v2183_v17 = vld [vmem:[%s3123_s3 + $0x90] sm:$0xff] }
  0x26   : > { %929 = vmatpush.bf16.msra.mxu2 %v2323_v26  ;;  %v1905_v19 = vld [vmem:[%s2546_s13 + $0x38] sm:$0xf0]  ;;  %1014 = vst.msk [vmem:[#allocation2] sm:$0xff] %vm1013_vm0, %v2392_v25  ;;  %v2380_v26 = vld [vmem:[%s3122_s2] ss:$0 sm:$0xff] }
  0x27   : > { %943 = vmatpush.bf16.msra.mxu3 %v2331_v27  ;;  %v1908_v23 = vor.u32 %v2301_v18, %v1905_v19  ;;  %1015 = vst.msk [vmem:[#allocation2 + $0x8] sm:$0xff] %vm1013_vm0, %v2392_v25  ;;  %v2184_v16 = vld [vmem:[%s3123_s3 + $0x98] sm:$0xff]  ;;  %v2182_v19 = vld [vmem:[%s3123_s3 + $0x88] sm:$0xff] }
  0x28   : > { %902 = vmatpush.bf16.msra.mxu0 %v2306_v28  ;;  %v2393_v28 = vmov 0.0  }
  0x29   : > { %916 = vmatpush.bf16.msra.mxu1 %v2314_v29  ;;  %1021 = vst.msk [vmem:[#allocation3] sm:$0xff] %vm1013_vm0, %v2393_v28 }
  0x2a   : > { %930 = vmatpush.bf16.msra.mxu2 %v2322_v30  ;;  %1022 = vst.msk [vmem:[#allocation3 + $0x8] sm:$0xff] %vm1013_vm0, %v2393_v28 }
  0x2b   : > { %944 = vmatpush.bf16.msra.mxu3 %v2330_v31  ;;  %903 = vmatmul.bf16.vlgmr.msra.gmra.mxu0 %v1880_v45  ;;  %1023 = vst.msk [vmem:[#allocation3 + $0x10] sm:$0xff] %vm1013_vm0, %v2393_v28 }
  0x2c   : > { %951 = vmatpush.bf16.msrb.mxu0 %v2345_v32  ;;  %917 = vmatmul.bf16.vlgmr.msra.gmra.mxu1 %v1884_v47  ;;  %1505 = vst.msk [vmem:[#allocation3 + $0x10] sm:$0xff] %vm1013_vm0, %v2393_v28  ;;  %v1056_v47 = vld [vmem:[%s3123_s3 + $0x8] sm:$0xff] }
  0x2d   : > { %965 = vmatpush.bf16.msrb.mxu1 %v2353_v33  ;;  %931 = vmatmul.bf16.vlgmr.msra.gmra.mxu2 %v1888_v44  ;;  %v1057_v44 = vld [vmem:[%s3123_s3 + $0x10] sm:$0xff] }
  0x2e   : > { %979 = vmatpush.bf16.msrb.mxu2 %v2361_v42  ;;  %945 = vmatmul.bf16.vlgmr.msra.gmra.mxu3 %v1892_v46  ;;  %v1058_v42 = vld [vmem:[%s3123_s3 + $0x18] sm:$0xff] }
  0x2f   : > { %993 = vmatpush.bf16.msrb.mxu3 %v2369_v43 }
  0x30   : > { %952 = vmatpush.bf16.msrb.mxu0 %v2344_v48 }
  0x31   : > { %966 = vmatpush.bf16.msrb.mxu1 %v2352_v49  ;;  %v1055_v49 = vld [vmem:[%s3123_s3] sm:$0xff] }
  0x32   : > { %980 = vmatpush.bf16.msrb.mxu2 %v2360_v50 }
  0x33   : > { %994 = vmatpush.bf16.msrb.mxu3 %v2368_v51 }
  0x34   : > { %953 = vmatpush.bf16.msrb.mxu0 %v2343_v52 }
  0x35   : > { %967 = vmatpush.bf16.msrb.mxu1 %v2351_v53 }
  0x36   : > { %981 = vmatpush.bf16.msrb.mxu2 %v2359_v54 }
  0x37   : > { %995 = vmatpush.bf16.msrb.mxu3 %v2367_v55  ;;  %v2174_v55 = vld [vmem:[%s3123_s3 + $0x58] sm:$0xff] }
  0x38   : > { %954 = vmatpush.bf16.msrb.mxu0 %v2342_v56  ;;  %v2168_v56 = vld [vmem:[%s3123_s3 + $0x38] sm:$0xff] }
  0x39   : > { %968 = vmatpush.bf16.msrb.mxu1 %v2350_v57  ;;  %v2179_v57 = vld [vmem:[%s3123_s3 + $0x78] sm:$0xff] }
  0x3a   : > { %982 = vmatpush.bf16.msrb.mxu2 %v2358_v58  ;;  %v2173_v58 = vld [vmem:[%s3123_s3 + $0x50] sm:$0xff] }
  0x3b   : > { %996 = vmatpush.bf16.msrb.mxu3 %v2366_v59  ;;  %v2167_v59 = vld [vmem:[%s3123_s3 + $0x30] sm:$0xff] }
  0x3c   : > { %955 = vmatpush.bf16.msrb.mxu0 %v2341_v60  ;;  %v2178_v60 = vld [vmem:[%s3123_s3 + $0x70] sm:$0xff] }
  0x3d   : > { %969 = vmatpush.bf16.msrb.mxu1 %v2349_v61 }
  0x3e   : > { %983 = vmatpush.bf16.msrb.mxu2 %v2357_v62 }
  0x3f   : > { %997 = vmatpush.bf16.msrb.mxu3 %v2365_v63  ;;  %v2172_v63 = vld [vmem:[%s3123_s3 + $0x48] sm:$0xff] }
  0x40   : > { %956 = vmatpush.bf16.msrb.mxu0 %v2340_v0  ;;  %v2189_v0 = vld [vmem:[%s3123_s3 + $0xb8] sm:$0xff] }
  0x41   : > { %970 = vmatpush.bf16.msrb.mxu1 %v2348_v1  ;;  %v2166_v1 = vld [vmem:[%s3123_s3 + $0x28] sm:$0xff] }
  0x42   : > { %984 = vmatpush.bf16.msrb.mxu2 %v2356_v2  ;;  %v2177_v2 = vld [vmem:[%s3123_s3 + $0x68] sm:$0xff] }
  0x43   : > { %998 = vmatpush.bf16.msrb.mxu3 %v2364_v3  ;;  %v2188_v3 = vld [vmem:[%s3123_s3 + $0xb0] sm:$0xff] }
  0x44   : > { %957 = vmatpush.bf16.msrb.mxu0 %v2339_v4 }
  0x45   : > { %971 = vmatpush.bf16.msrb.mxu1 %v2347_v5  ;;  %v2171_v5 = vld [vmem:[%s3123_s3 + $0x40] sm:$0xff] }
  0x46   : > { %985 = vmatpush.bf16.msrb.mxu2 %v2355_v6  ;;  %v2165_v6 = vld [vmem:[%s3123_s3 + $0x20] sm:$0xff] }
  0x47   : > { %999 = vmatpush.bf16.msrb.mxu3 %v2363_v7 }
  0x48   : > { %958 = vmatpush.bf16.msrb.mxu0 %v2338_v8  ;;  %v2187_v8 = vld [vmem:[%s3123_s3 + $0xa8] sm:$0xff] }
  0x49   : > { %972 = vmatpush.bf16.msrb.mxu1 %v2346_v9  ;;  %v2176_v9 = vld [vmem:[%s3123_s3 + $0x60] sm:$0xff] }
  0x4a   : > { %986 = vmatpush.bf16.msrb.mxu2 %v2354_v10 }
  0x4b   : > { %1000 = vmatpush.bf16.msrb.mxu3 %v2362_v11  ;;  %959 = vmatmul.bf16.vlgmr.msrb.gmra.mxu0 %v1896_v20 }
  0x4c   : > { %973 = vmatmul.bf16.vlgmr.msrb.gmra.mxu1 %v1900_v21  ;;  %1080 = vmatpush.msra.mxu0 %v2168_v56  ;;  %v2181_v21 = vld [vmem:[%s3123_s3 + $0x80] sm:$0xff]  ;;  %v2218_v56 = vld [vmem:[%s3125_s5 + $0xe8] sm:$0xff] }
  0x4d   : > { %987 = vmatmul.bf16.vlgmr.msrb.gmra.mxu2 %v1904_v22  ;;  %1103 = vmatpush.msra.mxu1 %v1058_v42 }
  0x4e   : > { %1001 = vmatmul.bf16.vlgmr.msrb.gmra.mxu3 %v1908_v23  ;;  %1132 = vmatpush.msra.mxu2 %v2174_v55  ;;  %v2208_v55 = vld [vmem:[%s3125_s5 + $0xa8] sm:$0xff] }
  0x4f   : > { %1104 = vmatpush.msra.mxu1 %v1057_v44  ;;  %1162 = vmatpush.msra.mxu3 %v2179_v57  ;;  %v2195_v57 = vld [vmem:[%s3125_s5 + $0x60] sm:$0xff] }
  0x50   : > { %1133 = vmatpush.msra.mxu2 %v2173_v58  ;;  %1081 = vmatpush.msra.mxu0 %v2167_v59  ;;  %v1250_v58 = vld [vmem:[%s3125_s5 + $0x20] sm:$0xff] }
  0x51   : > { %1105 = vmatpush.msra.mxu1 %v1056_v47  ;;  %1163 = vmatpush.msra.mxu3 %v2178_v60  ;;  %v1253_v47 = vld [vmem:[%s3125_s5 + $0x38] sm:$0xff]  ;;  %v2207_v59 = vld [vmem:[%s3125_s5 + $0xa0] sm:$0xff] }
  0x52   : > { %1134 = vmatpush.msra.mxu2 %v2172_v63  ;;  %1082 = vmatpush.msra.mxu0 %v2166_v1  ;;  %v2217_v60 = vld [vmem:[%s3125_s5 + $0xe0] sm:$0xff]  ;;  %v2206_v63 = vld [vmem:[%s3125_s5 + $0x98] sm:$0xff]  ;;  %v2193_v1 = vld [vmem:[%s3125_s5 + $0x50] sm:$0xff] }
  0x53   : > { %1106 = vmatpush.msra.mxu1 %v1055_v49  ;;  %1164 = vmatpush.msra.mxu3 %v2177_v2  ;;  %v2197_v49 = vld [vmem:[%s3125_s5 + $0x70] sm:$0xff] }
  0x54   : > { %1135 = vmatpush.msra.mxu2 %v2171_v5  ;;  %1083 = vmatpush.msra.mxu0 %v2165_v6  ;;  %v1248_v2 = vld [vmem:[%s3125_s5 + $0x10] sm:$0xff]  ;;  %v2192_v5 = vld [vmem:[%s3125_s5 + $0x48] sm:$0xff] }
  0x55   : > { %1222 = vmatpush.msrb.mxu1 %v2189_v0  ;;  %1165 = vmatpush.msra.mxu3 %v2176_v9  ;;  %v2216_v0 = vld [vmem:[%s3125_s5 + $0xd8] sm:$0xff]  ;;  %v1247_v6 = vld [vmem:[%s3125_s5 + $0x8] sm:$0xff]  ;;  %v2191_v9 = vld [vmem:[%s3125_s5 + $0x40] sm:$0xff] }
  0x56   : > { %1192 = vmatpush.msrb.mxu0 %v2184_v16  ;;  %v2239_v16 = vld [vmem:[%s3125_s5 + $0x170] sm:$0xff] }
  0x57   : > { %1223 = vmatpush.msrb.mxu1 %v2188_v3  ;;  %1308 = vmatpush.msrb.mxu3 %v1253_v47  ;;  %v2205_v3 = vld [vmem:[%s3125_s5 + $0x90] sm:$0xff] }
  0x58   : > { %1193 = vmatpush.msrb.mxu0 %v2183_v17  ;;  %v2228_v17 = vld [vmem:[%s3125_s5 + $0x128] sm:$0xff] }
  0x59   : > { %1224 = vmatpush.msrb.mxu1 %v2187_v8  ;;  %v2214_v8 = vld [vmem:[%s3125_s5 + $0xc8] sm:$0xff] }
  0x5a   : > { %1194 = vmatpush.msrb.mxu0 %v2182_v19 }
  0x5b   : > { %1225 = vmatpush.msrb.mxu1 %v2186_v13  ;;  %v2230_v13 = vld [vmem:[%s3125_s5 + $0x138] sm:$0xff] }
  0x5c   : > { %1195 = vmatpush.msrb.mxu0 %v2181_v21  ;;  %v2237_v21 = vld [vmem:[%s3125_s5 + $0x160] sm:$0xff] }
  0xa8   : > { %v904_v24 = vpop.f32.mrf.mxu0 }
  0xa9   : > { %v918_v27 = vpop.f32.mrf.mxu1  ;;  %v905_v29 = vadd.f32 %v2380_v26, %v904_v24 }
  0xab   : > { %v919_v32 = vadd.f32 %v918_v27, %v905_v29 }
  0xb0   : > { %v932_v30 = vpop.f32.mrf.mxu2  ;;  %v906_v33 = vpop.f32.mrf.mxu0 }
  0xb1   : > { %v946_v31 = vpop.f32.mrf.mxu3  ;;  %v920_v34 = vpop.f32.mrf.mxu1  ;;  %v933_v35 = vadd.f32 %v932_v30, %v919_v32  ;;  %v907_v36 = vadd.f32 %v2380_v26, %v906_v33 }
  0xb3   : > { %v947_v39 = vadd.f32 %v946_v31, %v933_v35  ;;  %v921_v40 = vadd.f32 %v920_v34, %v907_v36 }
  0xb8   : > { %v934_v37 = vpop.f32.mrf.mxu2 }
  0xb9   : > { %v948_v38 = vpop.f32.mrf.mxu3  ;;  %v935_v46 = vadd.f32 %v934_v37, %v921_v40 }
  0xbb   : > { %v949_v52 = vadd.f32 %v948_v38, %v935_v46  ;;  %v2198_v46 = vld [vmem:[%s3125_s5 + $0x78] sm:$0xff] }
  0xbc   : > { %1279 = vmatpush.msrb.mxu2 %v2198_v46 }
  0xbe   : > { %1280 = vmatpush.msrb.mxu2 %v2197_v49 }
  0xc8   : > { %v960_v41 = vpop.f32.mrf.mxu0 }
  0xc9   : > { %v961_v43 = vadd.f32 %v960_v41, %v947_v39  ;;  %v974_v45 = vpop.f32.mrf.mxu1 }
  0xcb   : > { %v975_v48 = vadd.f32 %v974_v45, %v961_v43 }
  0xd0   : > { %v988_v50 = vpop.f32.mrf.mxu2  ;;  %v962_v54 = vpop.f32.mrf.mxu0 }
  0xd1   : > { %v1002_v51 = vpop.f32.mrf.mxu3  ;;  %v989_v53 = vadd.f32 %v988_v50, %v975_v48  ;;  %v963_v62 = vadd.f32 %v962_v54, %v949_v52  ;;  %v976_v7 = vpop.f32.mrf.mxu1  ;;  %v2210_v48 = vld [vmem:[%s3125_s5 + $0xb8] sm:$0xff]  ;;  %v1252_v50 = vld [vmem:[%s3125_s5 + $0x30] sm:$0xff]  ;;  %v1251_v54 = vld [vmem:[%s3125_s5 + $0x28] sm:$0xff] }
  0xd2   : > { %1309 = vmatpush.msrb.mxu3 %v1252_v50  ;;  %v2219_v52 = vld [vmem:[%s3125_s5 + $0xf0] sm:$0xff] }
  0xd3   : > { %v1003_v61 = vadd.f32 %v1002_v51, %v989_v53  ;;  %v977_v11 = vadd.f32 %v976_v7, %v963_v62  ;;  %v2209_v51 = vld [vmem:[%s3125_s5 + $0xb0] sm:$0xff]  ;;  %v2196_v53 = vld [vmem:[%s3125_s5 + $0x68] sm:$0xff]  ;;  %v1249_v62 = vld [vmem:[%s3125_s5 + $0x18] sm:$0xff] }
  0xd4   : > { %1281 = vmatpush.msrb.mxu2 %v2196_v53  ;;  %1310 = vmatpush.msrb.mxu3 %v1251_v54  ;;  %v2204_v7 = vld [vmem:[%s3125_s5 + $0x88] sm:$0xff] }
  0xd5   : > { %vm1007_vm1 = vcmp.ge.f32.partialorder %v1003_v61, 0.0  ;;  %v1009_v4 = vmul.f32 0.01, %v1003_v61 }
  0xd6   : > { %1282 = vmatpush.msrb.mxu2 %v2195_v57  ;;  %1311 = vmatpush.msrb.mxu3 %v1250_v58  ;;  %v1518_v57 = vld [vmem:[%s3127_s7 + $0x38] sm:$0xff] }
  0xd7   : > { %v1011_v10 = vsel %vm1007_vm1, %v1003_v61, %v1009_v4  ;;  %v2194_v61 = vld [vmem:[%s3125_s5 + $0x58] sm:$0xff]  ;;  %v2215_v4 = vld [vmem:[%s3125_s5 + $0xd0] sm:$0xff] }
  0xd8   : > { %1018 = vst.msk [vmem:[#allocation2 + $0x2] sm:$0xff] %vm1017_vm2, %v1011_v10  ;;  %v990_v12 = vpop.f32.mrf.mxu2  ;;  %1283 = vmatpush.msrb.mxu2 %v2194_v61  ;;  %1312 = vmatpush.msrb.mxu3 %v1249_v62  ;;  %v1246_v10 = vld [vmem:[%s3125_s5] sm:$0xff]  ;;  %v2262_v58 = vld [vmem:[%s3127_s7 + $0xb8] sm:$0xff]  ;;  %v1517_v61 = vld [vmem:[%s3127_s7 + $0x30] sm:$0xff] }
  0xd9   : > { %v991_v14 = vadd.f32 %v990_v12, %v977_v11  ;;  %v1004_v15 = vpop.f32.mrf.mxu3  ;;  %v2203_v11 = vld [vmem:[%s3125_s5 + $0x80] sm:$0xff]  ;;  %v2261_v62 = vld [vmem:[%s3127_s7 + $0xb0] sm:$0xff] }
  0xda   : > { %1284 = vmatpush.msrb.mxu2 %v2193_v1  ;;  %1313 = vmatpush.msrb.mxu3 %v1248_v2  ;;  %v2213_v12 = vld [vmem:[%s3125_s5 + $0xc0] sm:$0xff]  ;;  %v1516_v1 = vld [vmem:[%s3127_s7 + $0x28] sm:$0xff] }
  0xdb   : > { %v1005_v18 = vadd.f32 %v1004_v15, %v991_v14  ;;  %v2240_v14 = vld [vmem:[%s3125_s5 + $0x178] sm:$0xff]  ;;  %v2229_v15 = vld [vmem:[%s3125_s5 + $0x130] sm:$0xff]  ;;  %v2260_v2 = vld [vmem:[%s3127_s7 + $0xa8] sm:$0xff] }
  0xdc   : > { %1285 = vmatpush.msrb.mxu2 %v2192_v5  ;;  %1314 = vmatpush.msrb.mxu3 %v1247_v6  ;;  %v1515_v5 = vld [vmem:[%s3127_s7 + $0x20] sm:$0xff] }
  0xdd   : > { %vm1008_vm3 = vcmp.ge.f32.partialorder %v1005_v18, 0.0  ;;  %v1010_v20 = vmul.f32 0.01, %v1005_v18  ;;  %v2259_v6 = vld [vmem:[%s3127_s7 + $0xa0] sm:$0xff] }
  0xde   : > { %1286 = vmatpush.msrb.mxu2 %v2191_v9  ;;  %1315 = vmatpush.msrb.mxu3 %v1246_v10  ;;  %v1514_v9 = vld [vmem:[%s3127_s7 + $0x18] sm:$0xff] }
  0xdf   : > { %v1024_v22 = vld [vmem:[#allocation2] sm:$0xf]  ;;  %v1034_v23 = vld [vmem:[#allocation2 + $0x4] sm:$0xf]  ;;  %v1012_v24 = vsel %vm1008_vm3, %v1005_v18, %v1010_v20  ;;  %v2238_v18 = vld [vmem:[%s3125_s5 + $0x168] sm:$0xff] }
  0xe0   : > { %1239 = vst.msk [vmem:[#allocation2] sm:$0xff] %vm1013_vm0, %v2393_v28  ;;  %v1026_v26 = vrot.slane %v1024_v22, 2  ;;  %v1036_v27 = vrot.slane %v1034_v23, 2  ;;  %v2227_v20 = vld [vmem:[%s3125_s5 + $0x120] sm:$0xff]  ;;  %v2258_v10 = vld [vmem:[%s3127_s7 + $0x98] sm:$0xff] }
  0xe1   : > { %1020 = vst.msk [vmem:[#allocation2 + $0xa] sm:$0x1] %vm1019_vm4, %v1012_v24  ;;  %v2236_v24 = vld [vmem:[%s3125_s5 + $0x158] sm:$0xff] }
  0xe2   : > { %v1028_v29 = vmax.f32 %v1024_v22, %v1026_v26  ;;  %v1038_v30 = vmax.f32 %v1034_v23, %v1036_v27  ;;  %v2226_v23 = vld [vmem:[%s3125_s5 + $0x118] sm:$0xff]  ;;  %v2225_v27 = vld [vmem:[%s3125_s5 + $0x110] sm:$0xff] }
  0xe4   : > { %v1030_v31 = vrot.slane %v1028_v29, 1  ;;  %v1040_v32 = vrot.slane %v1038_v30, 1 }
  0xe6   : > { %v1032_v33 = vmax.f32 %v1028_v29, %v1030_v31  ;;  %v1042_v34 = vmax.f32 %v1038_v30, %v1040_v32  ;;  %v2235_v29 = vld [vmem:[%s3125_s5 + $0x150] sm:$0xff]  ;;  %v2224_v32 = vld [vmem:[%s3125_s5 + $0x108] sm:$0xff] }
  0xe8   : > { %1033 = vst.msk [vmem:[#allocation3 + $0x4] sm:$0x1] %vm1019_vm4, %v1032_v33  ;;  %v1044_v35 = vld [vmem:[#allocation2 + $0x8] sm:$0xf] }
  0xe9   : > { %1043 = vst.msk [vmem:[#allocation3 + $0x5] sm:$0x1] %vm1019_vm4, %v1042_v34  ;;  %v1046_v36 = vrot.slane %v1044_v35, 2  ;;  %v2234_v33 = vld [vmem:[%s3125_s5 + $0x148] sm:$0xff] }
  0xea   : > { %1240 = vst.msk [vmem:[#allocation2 + $0x8] sm:$0xff] %vm1013_vm0, %v2393_v28 }
  0xeb   : > { %v1048_v37 = vmax.f32 %v1044_v35, %v1046_v36  ;;  %v2223_v36 = vld [vmem:[%s3125_s5 + $0x100] sm:$0xff] }
  0xed   : > { %v1050_v38 = vrot.slane %v1048_v37, 1 }
  0xef   : > { %v1052_v39 = vmax.f32 %v1048_v37, %v1050_v38  ;;  %v2233_v37 = vld [vmem:[%s3125_s5 + $0x140] sm:$0xff] }
  0xf0   : > { %v1054_v40 = vld [vmem:[#allocation3] sm:$0x3f] }
  0xf1   : > { %1053 = vst.msk [vmem:[#allocation3 + $0x6] sm:$0x1] %vm1019_vm4, %v1052_v39  ;;  %2170 = vmatmul.msk.f32.vlgmr.msra.gmra.mxu1 %vm1017_vm2, %v1054_v40  ;;  %v2381_v40 = vld [vmem:[%s3124_s4] ss:$0 sm:$0xff]  ;;  %v1324_v49 = vld [vmem:[#allocation2 + $0xa] sm:$0x1] }
  0xf2   : > { %v1366_v50 = vld [vmem:[#allocation2 + $0xb] sm:$0x1]  ;;  %v1450_v54 = vld [vmem:[#allocation2 + $0xd] sm:$0x1] }
  0xf8   : > { %v1059_v41 = vld [vmem:[#allocation3 + $0x1] sm:$0x3f] }
  0xf9   : > { %v1111_v42 = vld [vmem:[#allocation3 + $0x2] sm:$0x3f]  ;;  %2169 = vmatmul.msk.f32.vlgmr.msra.gmra.mxu0 %vm1017_vm2, %v1059_v41 }
  0xfa   : > { %v1141_v43 = vld [vmem:[#allocation3 + $0x3] sm:$0x3f]  ;;  %2175 = vmatmul.msk.f32.vlgmr.msra.gmra.mxu2 %vm1017_vm2, %v1111_v42  ;;  %1348 = vmatpush.msra.mxu0 %v2210_v48 }
  0xfb   : > { %v1201_v44 = vld [vmem:[#allocation3 + $0x5] sm:$0x3f]  ;;  %2180 = vmatmul.msk.f32.vlgmr.msra.gmra.mxu3 %vm1017_vm2, %v1141_v43  ;;  %1432 = vmatpush.msra.mxu2 %v2230_v13  ;;  %v1513_v13 = vld [vmem:[%s3127_s7 + $0x10] sm:$0xff] }
  0xfc   : > { %v1171_v45 = vld [vmem:[#allocation3 + $0x4] sm:$0x3f]  ;;  %2190 = vmatmul.msk.f32.vlgmr.msrb.gmra.mxu1 %vm1017_vm2, %v1201_v44  ;;  %1349 = vmatpush.msra.mxu0 %v2209_v51  ;;  %v1408_v51 = vld [vmem:[#allocation2 + $0xc] sm:$0x1] }
  0xfd   : > { %1503 = vst.msk [vmem:[#allocation3] sm:$0xff] %vm1013_vm0, %v2393_v28  ;;  %1474 = vmatpush.msra.mxu3 %v2240_v14  ;;  %1433 = vmatpush.msra.mxu2 %v2229_v15  ;;  %v2257_v14 = vld [vmem:[%s3127_s7 + $0x90] sm:$0xff] }
  0xfe   : > { %1504 = vst.msk [vmem:[#allocation3 + $0x8] sm:$0xff] %vm1013_vm0, %v2393_v28  ;;  %v2220_v28 = vld [vmem:[%s3125_s5 + $0xf8] sm:$0xff]  ;;  %1350 = vmatpush.msra.mxu0 %v2208_v55  ;;  %v2267_v15 = vld [vmem:[%s3127_s7 + $0xd0] sm:$0xff] }
  0xff   : > { %1390 = vmatpush.msra.mxu1 %v2220_v28  ;;  %1475 = vmatpush.msra.mxu3 %v2239_v16 }
 0x100   : > { %1351 = vmatpush.msra.mxu0 %v2207_v59  ;;  %1434 = vmatpush.msra.mxu2 %v2228_v17  ;;  %v2272_v59 = vld [vmem:[%s3127_s7 + $0xf8] sm:$0xff] }
 0x101   : > { %2185 = vmatmul.msk.f32.vlgmr.msrb.gmra.mxu0 %vm1017_vm2, %v1171_v45  ;;  %1391 = vmatpush.msra.mxu1 %v2219_v52 }
 0x102   : > { %1352 = vmatpush.msra.mxu0 %v2206_v63  ;;  %1476 = vmatpush.msra.mxu3 %v2238_v18  ;;  %v2271_v63 = vld [vmem:[%s3127_s7 + $0xf0] sm:$0xff]  ;;  %v2244_v18 = vld [vmem:[%s3127_s7 + $0x48] sm:$0xff] }
 0x103   : > { %1392 = vmatpush.msra.mxu1 %v2218_v56  ;;  %1435 = vmatpush.msra.mxu2 %v2227_v20  ;;  %v2256_v20 = vld [vmem:[%s3127_s7 + $0x88] sm:$0xff] }
 0x104   : > { %1353 = vmatpush.msra.mxu0 %v2205_v3  ;;  %1477 = vmatpush.msra.mxu3 %v2237_v21  ;;  %v2270_v3 = vld [vmem:[%s3127_s7 + $0xe8] sm:$0xff] }
 0x105   : > { %1393 = vmatpush.msra.mxu1 %v2217_v60  ;;  %1436 = vmatpush.msra.mxu2 %v2226_v23  ;;  %v2249_v60 = vld [vmem:[%s3127_s7 + $0x70] sm:$0xff]  ;;  %v2266_v21 = vld [vmem:[%s3127_s7 + $0xc8] sm:$0xff]  ;;  %v1511_v23 = vld [vmem:[%s3127_s7] sm:$0xff] }
 0x106   : > { %1354 = vmatpush.msra.mxu0 %v2204_v7  ;;  %1478 = vmatpush.msra.mxu3 %v2236_v24  ;;  %v2269_v7 = vld [vmem:[%s3127_s7 + $0xe0] sm:$0xff] }
 0x107   : > { %1394 = vmatpush.msra.mxu1 %v2216_v0  ;;  %1437 = vmatpush.msra.mxu2 %v2225_v27  ;;  %v2248_v0 = vld [vmem:[%s3127_s7 + $0x68] sm:$0xff]  ;;  %v2255_v24 = vld [vmem:[%s3127_s7 + $0x80] sm:$0xff]  ;;  %v2282_v27 = vld [vmem:[%s3127_s7 + $0x138] sm:$0xff] }
 0x108   : > { %1355 = vmatpush.msra.mxu0 %v2203_v11  ;;  %1479 = vmatpush.msra.mxu3 %v2235_v29  ;;  %v2268_v11 = vld [vmem:[%s3127_s7 + $0xd8] sm:$0xff] }
 0x109   : > { %1395 = vmatpush.msra.mxu1 %v2215_v4  ;;  %1438 = vmatpush.msra.mxu2 %v2224_v32  ;;  %v2247_v4 = vld [vmem:[%s3127_s7 + $0x60] sm:$0xff]  ;;  %v2292_v29 = vld [vmem:[%s3127_s7 + $0x178] sm:$0xff]  ;;  %v2280_v32 = vld [vmem:[%s3127_s7 + $0x128] sm:$0xff] }
 0x10a   : > { %1480 = vmatpush.msra.mxu3 %v2234_v33  ;;  %v2290_v33 = vld [vmem:[%s3127_s7 + $0x168] sm:$0xff] }
 0x10b   : > { %1396 = vmatpush.msra.mxu1 %v2214_v8  ;;  %1439 = vmatpush.msra.mxu2 %v2223_v36  ;;  %v2246_v8 = vld [vmem:[%s3127_s7 + $0x58] sm:$0xff] }
 0x10c   : > { %1481 = vmatpush.msra.mxu3 %v2233_v37 }
 0x10d   : > { %1397 = vmatpush.msra.mxu1 %v2213_v12  ;;  %v2245_v12 = vld [vmem:[%s3127_s7 + $0x50] sm:$0xff] }
 0x10f   : > { %1573 = vmatpush.msrb.mxu1 %v1518_v57 }
 0x111   : > { %1574 = vmatpush.msrb.mxu1 %v1517_v61 }
 0x113   : > { %1575 = vmatpush.msrb.mxu1 %v1516_v1 }
 0x115   : > { %1576 = vmatpush.msrb.mxu1 %v1515_v5 }
 0x117   : > { %1577 = vmatpush.msrb.mxu1 %v1514_v9 }
 0x119   : > { %1578 = vmatpush.msrb.mxu1 %v1513_v13 }
 0x16e   : > { %v1108_v22 = vpop.f32.mrf.mxu1 }
 0x176   : > { %v1085_v19 = vpop.f32.mrf.mxu0 }
 0x177   : > { %v1109_v26 = vadd.f32 %v1108_v22, %v1085_v19  ;;  %v1512_v19 = vld [vmem:[%s3127_s7 + $0x8] sm:$0xff]  ;;  %v2243_v22 = vld [vmem:[%s3127_s7 + $0x40] sm:$0xff] }
 0x178   : > { %1579 = vmatpush.msrb.mxu1 %v1512_v19 }
 0x179   : > { %v1227_v41 = vpop.f32.mrf.mxu1 }
 0x17a   : > { %1580 = vmatpush.msrb.mxu1 %v1511_v23 }
 0x17d   : > { %v1137_v30 = vpop.f32.mrf.mxu2 }
 0x17e   : > { %v1140_v31 = vadd.f32 %v1137_v30, %v1109_v26  ;;  %v1167_v34 = vpop.f32.mrf.mxu3  ;;  %v1197_v38 = vpop.f32.mrf.mxu0  ;;  %v2265_v26 = vld [vmem:[%s3127_s7 + $0xc0] sm:$0xff]  ;;  %v2281_v30 = vld [vmem:[%s3127_s7 + $0x130] sm:$0xff] }
 0x180   : > { %v1170_v35 = vadd.f32 %v1167_v34, %v1140_v31  ;;  %v2291_v31 = vld [vmem:[%s3127_s7 + $0x170] sm:$0xff] }
 0x182   : > { %v1200_v39 = vadd.f32 %v1197_v38, %v1170_v35  ;;  %v2279_v38 = vld [vmem:[%s3127_s7 + $0x120] sm:$0xff] }
 0x184   : > { %v1230_v42 = vadd.f32 %v1227_v41, %v1200_v39  ;;  %v2289_v39 = vld [vmem:[%s3127_s7 + $0x160] sm:$0xff]  ;;  %v2278_v41 = vld [vmem:[%s3127_s7 + $0x118] sm:$0xff] }
 0x186   : > { %v1235_v43 = vadd.f32 %v2381_v40, %v1230_v42  ;;  %v2288_v42 = vld [vmem:[%s3127_s7 + $0x158] sm:$0xff] }
 0x188   : > { %vm1236_vm5 = vcmp.ge.f32.partialorder %v1235_v43, 0.0  ;;  %v1237_v44 = vmul.f32 0.01, %v1235_v43 }
 0x18a   : > { %v1238_v45 = vsel %vm1236_vm5, %v1235_v43, %v1237_v44  ;;  %v2277_v44 = vld [vmem:[%s3127_s7 + $0x110] sm:$0xff] }
 0x18b   : > { %1243 = vst.msk [vmem:[#allocation2 + $0x4] sm:$0x3f] %vm1242_vm6, %v1238_v45  ;;  %v2287_v45 = vld [vmem:[%s3127_s7 + $0x150] sm:$0xff] }
 0x192   : > { %v1254_v46 = vld [vmem:[#allocation2 + $0x1] sm:$0xff]  ;;  %v1255_v55 = vld [vmem:[#allocation2 + $0x9] sm:$0x1] }
 0x193   : > { %v1244_v47 = vld [vmem:[#allocation2] sm:$0xff]  ;;  %2199 = vmatmul.msk.f32.vlgmr.msrb.gmra.mxu2 %vm1013_vm0, %v1254_v46  ;;  %v1245_v56 = vld [vmem:[#allocation2 + $0x8] sm:$0x1] }
 0x194   : > { %v1323_v48 = vld [vmem:[#allocation2 + $0x2] sm:$0xff]  ;;  %2201 = vmatmul.msk.f32.vlgmr.msrb.gmra.mxu3 %vm1013_vm0, %v1244_v47  ;;  %1613 = vmatpush.msrb.mxu2 %v2262_v58 }
 0x195   : > { %v1365_v28 = vld [vmem:[#allocation2 + $0x3] sm:$0xff]  ;;  %2211 = vmatmul.msk.f32.vlgmr.msra.gmra.mxu0 %vm1013_vm0, %v1323_v48  ;;  %1655 = vmatpush.msrb.mxu3 %v2272_v59 }
 0x196   : > { %2221 = vmatmul.msk.f32.vlgmr.msra.gmra.mxu1 %vm1013_vm0, %v1365_v28  ;;  %v1407_v52 = vld [vmem:[#allocation2 + $0x4] sm:$0xff]  ;;  %1614 = vmatpush.msrb.mxu2 %v2261_v62 }
 0x197   : > { %v1449_v53 = vld [vmem:[#allocation2 + $0x5] sm:$0xff]  ;;  %1656 = vmatpush.msrb.mxu3 %v2271_v63  ;;  %1739 = vmatpush.msra.mxu1 %v2292_v29 }
 0x198   : > { %1768 = vst.msk [vmem:[#allocation2] sm:$0xff] %vm1013_vm0, %v2392_v25  ;;  %1615 = vmatpush.msrb.mxu2 %v2260_v2  ;;  %v2276_v46 = vld [vmem:[%s3127_s7 + $0x108] sm:$0xff] }
 0x199   : > { %1769 = vst.msk [vmem:[#allocation2 + $0x8] sm:$0xff] %vm1013_vm0, %v2392_v25  ;;  %v2250_v25 = vld [vmem:[%s3127_s7 + $0x78] sm:$0xff]  ;;  %1657 = vmatpush.msrb.mxu3 %v2270_v3  ;;  %1740 = vmatpush.msra.mxu1 %v2291_v31  ;;  %v2286_v47 = vld [vmem:[%s3127_s7 + $0x148] sm:$0xff] }
 0x19a   : > { %1544 = vmatpush.msrb.mxu0 %v2250_v25  ;;  %1616 = vmatpush.msrb.mxu2 %v2259_v6 }
 0x19b   : > { %2200 = vmatmul.msk.f32.gmra.mxu2 %vm1013_vm0, %v1255_v55  ;;  %1658 = vmatpush.msrb.mxu3 %v2269_v7  ;;  %v2382_v55 = vld [vmem:[%s3126_s6] ss:$0 sm:$0xff] }
 0x19c   : > { %2202 = vmatmul.msk.f32.gmra.mxu3 %vm1013_vm0, %v1245_v56  ;;  %1545 = vmatpush.msrb.mxu0 %v2249_v60 }
 0x19d   : > { %2212 = vmatmul.msk.f32.gmra.mxu0 %vm1013_vm0, %v1324_v49  ;;  %1617 = vmatpush.msrb.mxu2 %v2258_v10 }
 0x19e   : > { %2222 = vmatmul.msk.f32.gmra.mxu1 %vm1013_vm0, %v1366_v50  ;;  %1546 = vmatpush.msrb.mxu0 %v2248_v0 }
 0x19f   : > { %1659 = vmatpush.msrb.mxu3 %v2268_v11  ;;  %1618 = vmatpush.msrb.mxu2 %v2257_v14 }
 0x1a0   : > { %1547 = vmatpush.msrb.mxu0 %v2247_v4  ;;  %1741 = vmatpush.msra.mxu1 %v2290_v33  ;;  %v2383_v33 = vld [vmem:[%s3128_s8] ss:$0 sm:$0xff] }
 0x1a1   : > { %1660 = vmatpush.msrb.mxu3 %v2267_v15  ;;  %1619 = vmatpush.msrb.mxu2 %v2256_v20  ;;  %v1715_v15 = vld [vmem:[#allocation3 + $0xd] sm:$0xf] }
 0x1a2   : > { %1548 = vmatpush.msrb.mxu0 %v2246_v8  ;;  %1742 = vmatpush.msra.mxu1 %v2289_v39 }
 0x1a3   : > { %2231 = vmatmul.msk.f32.vlgmr.msra.gmra.mxu2 %vm1013_vm0, %v1407_v52  ;;  %1661 = vmatpush.msrb.mxu3 %v2266_v21  ;;  %v2275_v52 = vld [vmem:[%s3127_s7 + $0x100] sm:$0xff] }
 0x1a4   : > { %2241 = vmatmul.msk.f32.vlgmr.msra.gmra.mxu3 %vm1013_vm0, %v1449_v53  ;;  %1549 = vmatpush.msrb.mxu0 %v2245_v12  ;;  %v2285_v53 = vld [vmem:[%s3127_s7 + $0x140] sm:$0xff] }
 0x1a5   : > { %1620 = vmatpush.msrb.mxu2 %v2255_v24  ;;  %1662 = vmatpush.msrb.mxu3 %v2265_v26 }
 0x1a6   : > { %1550 = vmatpush.msrb.mxu0 %v2244_v18  ;;  %1743 = vmatpush.msra.mxu1 %v2288_v42 }
 0x1a8   : > { %1551 = vmatpush.msrb.mxu0 %v2243_v22  ;;  %1744 = vmatpush.msra.mxu1 %v2287_v45 }
 0x1aa   : > { %1697 = vmatpush.msra.mxu0 %v2282_v27  ;;  %1745 = vmatpush.msra.mxu1 %v2286_v47 }
 0x1ab   : > { %2232 = vmatmul.msk.f32.gmra.mxu2 %vm1013_vm0, %v1408_v51 }
 0x1ac   : > { %2242 = vmatmul.msk.f32.gmra.mxu3 %vm1013_vm0, %v1450_v54  ;;  %1698 = vmatpush.msra.mxu0 %v2281_v30 }
 0x1ad   : > { %1746 = vmatpush.msra.mxu1 %v2285_v53 }
 0x1ae   : > { %1699 = vmatpush.msra.mxu0 %v2280_v32 }
 0x1b0   : > { %1700 = vmatpush.msra.mxu0 %v2279_v38 }
 0x1b2   : > { %1701 = vmatpush.msra.mxu0 %v2278_v41 }
 0x1b4   : > { %1702 = vmatpush.msra.mxu0 %v2277_v44 }
 0x1b6   : > { %1703 = vmatpush.msra.mxu0 %v2276_v46 }
 0x1b8   : > { %1704 = vmatpush.msra.mxu0 %v2275_v52 }
 0x212   : > { %v1357_v34 = vpop.f32.mrf.mxu0 }
 0x213   : > { %v1399_v43 = vpop.f32.mrf.mxu1 }
 0x216   : > { %v1288_v16 = vpop.f32.mrf.mxu2 }
 0x217   : > { %v1317_v17 = vpop.f32.mrf.mxu3 }
 0x218   : > { %v1318_v35 = vadd.f32 %v1317_v17, %v1288_v16 }
 0x21a   : > { %v1363_v40 = vadd.f32 %v1357_v34, %v1318_v35  ;;  %v1360_v28 = vpop.f32.mrf.mxu0 }
 0x21b   : > { %v1402_v57 = vpop.f32.mrf.mxu1 }
 0x21c   : > { %v1405_v49 = vadd.f32 %v1399_v43, %v1363_v40 }
 0x21e   : > { %v1291_v36 = vpop.f32.mrf.mxu2 }
 0x21f   : > { %v1320_v37 = vpop.f32.mrf.mxu3 }
 0x220   : > { %v1321_v48 = vadd.f32 %v1320_v37, %v1291_v36 }
 0x222   : > { %v1364_v56 = vadd.f32 %v1360_v28, %v1321_v48 }
 0x224   : > { %v1406_v59 = vadd.f32 %v1402_v57, %v1364_v56 }
 0x226   : > { %v1441_v50 = vpop.f32.mrf.mxu2 }
 0x227   : > { %v1483_v51 = vpop.f32.mrf.mxu3  ;;  %v1447_v54 = vadd.f32 %v1441_v50, %v1405_v49 }
 0x229   : > { %v1489_v25 = vadd.f32 %v1483_v51, %v1447_v54 }
 0x22b   : > { %v1495_v58 = vadd.f32 %v2382_v55, %v1489_v25 }
 0x22d   : > { %vm1497_vm7 = vcmp.ge.f32.partialorder %v1495_v58, 0.0  ;;  %v1499_v60 = vmul.f32 0.01, %v1495_v58 }
 0x22e   : > { %v1444_v61 = vpop.f32.mrf.mxu2 }
 0x22f   : > { %v1486_v62 = vpop.f32.mrf.mxu3  ;;  %v1501_v63 = vsel %vm1497_vm7, %v1495_v58, %v1499_v60  ;;  %v1448_v0 = vadd.f32 %v1444_v61, %v1406_v59 }
 0x230   : > { %1506 = vst.msk [vmem:[#allocation3 + $0x4] sm:$0xff] %vm1013_vm0, %v1501_v63 }
 0x231   : > { %v1490_v1 = vadd.f32 %v1486_v62, %v1448_v0 }
 0x233   : > { %v1496_v2 = vadd.f32 %v2382_v55, %v1490_v1 }
 0x235   : > { %vm1498_vm8 = vcmp.ge.f32.partialorder %v1496_v2, 0.0  ;;  %v1500_v3 = vmul.f32 0.01, %v1496_v2 }
 0x237   : > { %v1502_v4 = vsel %vm1498_vm8, %v1496_v2, %v1500_v3  ;;  %v1519_v5 = vld [vmem:[#allocation3 + $0x1] sm:$0xff] }
 0x238   : > { %v1509_v6 = vld [vmem:[#allocation3] sm:$0xff]  ;;  %1508 = vst.msk [vmem:[#allocation3 + $0xc] sm:$0x1] %vm1507_vm9, %v1502_v4  ;;  %2251 = vmatmul.msk.f32.vlgmr.msrb.gmra.mxu0 %vm1013_vm0, %v1519_v5  ;;  %v1510_v9 = vld [vmem:[#allocation3 + $0x8] sm:$0xf] }
 0x239   : > { %v1588_v7 = vld [vmem:[#allocation3 + $0x2] sm:$0xff]  ;;  %2253 = vmatmul.msk.f32.vlgmr.msrb.gmra.mxu1 %vm1013_vm0, %v1509_v6 }
 0x23a   : > { %v1630_v8 = vld [vmem:[#allocation3 + $0x3] sm:$0xff]  ;;  %2263 = vmatmul.msk.f32.vlgmr.msrb.gmra.mxu2 %vm1013_vm0, %v1588_v7 }
 0x23b   : > { %2273 = vmatmul.msk.f32.vlgmr.msrb.gmra.mxu3 %vm1013_vm0, %v1630_v8  ;;  %v1672_v13 = vld [vmem:[#allocation3 + $0x4] sm:$0xff] }
 0x23f   : > { %v1520_v10 = vld [vmem:[#allocation3 + $0x9] sm:$0xf] }
 0x240   : > { %v1589_v11 = vld [vmem:[#allocation3 + $0xa] sm:$0xf]  ;;  %2252 = vmatmul.msk.f32.gmra.mxu0 %vm1013_vm0, %v1520_v10 }
 0x241   : > { %v1631_v12 = vld [vmem:[#allocation3 + $0xb] sm:$0xf]  ;;  %2254 = vmatmul.msk.f32.gmra.mxu1 %vm1013_vm0, %v1510_v9 }
 0x242   : > { %2264 = vmatmul.msk.f32.gmra.mxu2 %vm1013_vm0, %v1589_v11  ;;  %v1714_v14 = vld [vmem:[#allocation3 + $0x5] sm:$0xff] }
 0x243   : > { %2274 = vmatmul.msk.f32.gmra.mxu3 %vm1013_vm0, %v1631_v12  ;;  %v1673_v16 = vld [vmem:[#allocation3 + $0xc] sm:$0xf] }
 0x248   : > { %2283 = vmatmul.msk.f32.vlgmr.msra.gmra.mxu0 %vm1013_vm0, %v1672_v13 }
 0x249   : > { %2293 = vmatmul.msk.f32.vlgmr.msra.gmra.mxu1 %vm1013_vm0, %v1714_v14 }
 0x250   : > { %2284 = vmatmul.msk.f32.gmra.mxu0 %vm1013_vm0, %v1673_v16 }
 0x251   : > { %2294 = vmatmul.msk.f32.gmra.mxu1 %vm1013_vm0, %v1715_v15 }
 0x2b5   : > { %v1553_v17 = vpop.f32.mrf.mxu0 }
 0x2b6   : > { %v1582_v18 = vpop.f32.mrf.mxu1 }
 0x2b7   : > { %v1583_v22 = vadd.f32 %v1582_v18, %v1553_v17 }
 0x2bd   : > { %v1622_v19 = vpop.f32.mrf.mxu2  ;;  %v1556_v20 = vpop.f32.mrf.mxu0 }
 0x2be   : > { %v1585_v21 = vpop.f32.mrf.mxu1  ;;  %v1628_v23 = vadd.f32 %v1622_v19, %v1583_v22  ;;  %v1664_v24 = vpop.f32.mrf.mxu3 }
 0x2bf   : > { %v1586_v31 = vadd.f32 %v1585_v21, %v1556_v20 }
 0x2c0   : > { %v1670_v26 = vadd.f32 %v1664_v24, %v1628_v23 }
 0x2c5   : > { %v1625_v27 = vpop.f32.mrf.mxu2  ;;  %v1706_v29 = vpop.f32.mrf.mxu0 }
 0x2c6   : > { %v1748_v30 = vpop.f32.mrf.mxu1  ;;  %v1712_v32 = vadd.f32 %v1706_v29, %v1670_v26  ;;  %v1629_v34 = vadd.f32 %v1625_v27, %v1586_v31  ;;  %v1667_v37 = vpop.f32.mrf.mxu3 }
 0x2c8   : > { %v1754_v35 = vadd.f32 %v1748_v30, %v1712_v32  ;;  %v1671_v38 = vadd.f32 %v1667_v37, %v1629_v34 }
 0x2ca   : > { %v1760_v36 = vadd.f32 %v2383_v33, %v1754_v35 }
 0x2cc   : > { %vm1762_vm10 = vcmp.ge.f32.partialorder %v1760_v36, 0.0  ;;  %v1764_v39 = vmul.f32 0.01, %v1760_v36 }
 0x2cd   : > { %v1709_v40 = vpop.f32.mrf.mxu0 }
 0x2ce   : > { %v1751_v41 = vpop.f32.mrf.mxu1  ;;  %v1766_v42 = vsel %vm1762_vm10, %v1760_v36, %v1764_v39  ;;  %v1713_v43 = vadd.f32 %v1709_v40, %v1671_v38 }
 0x2cf   : > { %1771 = vst.msk [vmem:[#allocation2 + $0x1] sm:$0xff] %vm1013_vm0, %v1766_v42 }
 0x2d0   : > { %v1755_v44 = vadd.f32 %v1751_v41, %v1713_v43 }
 0x2d2   : > { %v1761_v45 = vadd.f32 %v2383_v33, %v1755_v44 }
 0x2d4   : > { %vm1763_vm11 = vcmp.ge.f32.partialorder %v1761_v45, 0.0  ;;  %v1765_v46 = vmul.f32 0.01, %v1761_v45 }
 0x2d6   : > { %v1774_v47 = vld [vmem:[#allocation2] sm:$0x3]  ;;  %v1780_v48 = vld [vmem:[#allocation2 + $0x2] sm:$0x3]  ;;  %v1786_v28 = vld [vmem:[#allocation2 + $0x4] sm:$0x3]  ;;  %v1767_v49 = vsel %vm1763_vm11, %v1761_v45, %v1765_v46 }
 0x2d7   : > { %v1776_v50 = vrot.slane %v1774_v47, 1  ;;  %v1782_v51 = vrot.slane %v1780_v48, 1  ;;  %v1788_v52 = vrot.slane %v1786_v28, 1  ;;  %v1792_v53 = vld [vmem:[#allocation2 + $0x6] sm:$0x3] }
 0x2d8   : > { %v1794_v54 = vrot.slane %v1792_v53, 1  ;;  %1773 = vst.msk [vmem:[#allocation2 + $0x9] sm:$0xf] %vm1772_vm12, %v1767_v49 }
 0x2d9   : > { %v1778_v55 = vmax.f32 %v1774_v47, %v1776_v50  ;;  %v1784_v56 = vmax.f32 %v1780_v48, %v1782_v51  ;;  %v1790_v25 = vmax.f32 %v1786_v28, %v1788_v52 }
 0x2da   : > { %v1796_v57 = vmax.f32 %v1792_v53, %v1794_v54 }
 0x2db   : > { %1779 = vst.msk [vmem:[%s330_s17] sm:$0x1] %vm1507_vm9, %v1778_v55 }
 0x2dc   : > { %1785 = vst.msk [vmem:[%s330_s17 + $0x1] sm:$0x1] %vm1507_vm9, %v1784_v56 }
 0x2dd   : > { %1791 = vst.msk [vmem:[%s330_s17 + $0x2] sm:$0x1] %vm1507_vm9, %v1790_v25 }
 0x2de   : > { %1797 = vst.msk [vmem:[%s330_s17 + $0x3] sm:$0x1] %vm1507_vm9, %v1796_v57 }
 0x2df   : > { %v1798_v58 = vld [vmem:[#allocation2 + $0x8] sm:$0x3]  ;;  %v1804_v59 = vld [vmem:[#allocation2 + $0xa] sm:$0x3]  ;;  %v1810_v60 = vld [vmem:[#allocation2 + $0xc] sm:$0x3] }
 0x2e0   : > { %v1800_v61 = vrot.slane %v1798_v58, 1  ;;  %v1806_v62 = vrot.slane %v1804_v59, 1  ;;  %v1812_v63 = vrot.slane %v1810_v60, 1 }
 0x2e2   : > { %v1802_v0 = vmax.f32 %v1798_v58, %v1800_v61  ;;  %v1808_v1 = vmax.f32 %v1804_v59, %v1806_v62  ;;  %v1814_v2 = vmax.f32 %v1810_v60, %v1812_v63 }
 0x2e4   : > { %1803 = vst.msk [vmem:[%s330_s17 + $0x4] sm:$0x1] %vm1507_vm9, %v1802_v0 }
 0x2e5   : > { %1809 = vst.msk [vmem:[%s330_s17 + $0x5] sm:$0x1] %vm1507_vm9, %v1808_v1 }
 0x2e6   : > { %1815 = vst.msk [vmem:[%s330_s17 + $0x6] sm:$0x1] %vm1507_vm9, %v1814_v2 }
 0x2e7 PF: > { %s19_s30 = sadd.s32 1, %s2390_s30  }
 0x2e8   : > { %p16_p4 = scmp.ge.s32.totalorder %s19_s30, 4  }
 0x2ea   :  { %18 = sbr.rel (!%p16_p4) target bundleno = 1 (0x1), region = 101 }

// kernel: _forward.2
= control target key start
LH: loop header
LB: loop body
LE: loop exit
PB: predicated region body
PF: predicated region fallthrough
CT: control target
= control target key end

     0   :  { %s2582_s30 = smov 0   ;;  %s3453_s0 = inlined_call_operand.vmem [shape: bf16[2,128,128], index: 0, kind: input, shape index: {}]   ;;  %s3454_s1 = inlined_call_operand.vmem [shape: bf16[128,32], index: 1, kind: input, shape index: {}]   ;;  %s3455_s2 = inlined_call_operand.vmem [shape: f32[1,32], index: 2, kind: input, shape index: {}]   ;;  %s3456_s3 = inlined_call_operand.vmem [shape: f32[8,32,64], index: 3, kind: input, shape index: {}]   ;;  %s3457_s4 = inlined_call_operand.vmem [shape: f32[1,64], index: 4, kind: input, shape index: {}]   ;;  %s3458_s5 = inlined_call_operand.vmem [shape: f32[8,64,64], index: 5, kind: input, shape index: {}]   ;;  %s3459_s6 = inlined_call_operand.vmem [shape: f32[1,64], index: 6, kind: input, shape index: {}]   ;;  %s3460_s7 = inlined_call_operand.vmem [shape: f32[8,64,64], index: 7, kind: input, shape index: {}]   ;;  %s3461_s8 = inlined_call_operand.vmem [shape: f32[1,64], index: 8, kind: input, shape index: {}]   ;;  %s3462_s9 = inlined_call_operand.vmem [shape: f32[2,5,64], index: 9, kind: output, shape index: {}]  }
   0x1 LB: > { %s2193_s10 = sadd.s32 4294967295, %s2528_s30   ;;  %p2197_p0 = scmp.ge.s32.totalorder %s2528_s30, 1  ;;  %s2528_s30 = sphi %s2582_s30, %s19_s30  }
   0x2   : > { %p287_p1 = scmp.lt.s32.totalorder %s2528_s30, 3 }
   0x4   : > { %p288_p2 = pnand %p2197_p0, %p287_p1 }
   0x5   : > { %p322_p3 = scmp.lt.s32.totalorder (!%p288_p2), %s2193_s10, 1 }
   0x6   : > { %291 = sbr.rel (%p288_p2) target bundleno = 900 (0x384), region = 56 }
   0xb   : > { %v2495_v0 = vld [vmem:[%s3454_s1 + $0x38] sm:$0xff]  ;;  %v2494_v1 = vld [vmem:[%s3454_s1 + $0x30] sm:$0xff]  ;;  %v2493_v2 = vld [vmem:[%s3454_s1 + $0x28] sm:$0xff]  ;;  %s3464_s10 = smov (!%p322_p3, %s2193_s10), 1  ;;  %vm560_vm0 = vcmask 523264   ;;  %v2530_v15 = vmov -inf  }
   0xc   : > { %463 = vmatpush.bf16.msra.mxu0 %v2495_v0  ;;  %v2492_v3 = vld [vmem:[%s3454_s1 + $0x20] sm:$0xff]  ;;  %v2491_v4 = vld [vmem:[%s3454_s1 + $0x18] sm:$0xff]  ;;  %v2490_v5 = vld [vmem:[%s3454_s1 + $0x10] sm:$0xff]  ;;  %s2479_s25 = sshll.u32 %s3464_s10, 6  ;;  %561 = vst.msk [vmem:[#allocation2] sm:$0xff] %vm560_vm0, %v2530_v15  ;;  %v2531_v16 = vmov 0.0  }
   0xd   : > { %v2489_v6 = vld [vmem:[%s3454_s1 + $0x8] sm:$0xff]  ;;  %v2488_v7 = vld [vmem:[%s3454_s1] sm:$0xff]  ;;  %s326_s11 = scalar_lea.vmem %s3453_s0, %s2479_s25  ;;  %562 = vst.msk [vmem:[#allocation2 + $0x8] sm:$0xff] %vm560_vm0, %v2530_v15  ;;  %vm577_vm2 = vcmask 261120   ;;  %v842_v35 = vld [vmem:[%s3456_s3 + $0x18] sm:$0xff]  ;;  %vm624_vm5 = vcmask 253952  }
   0xe   : > { %v2480_v8 = vld [vmem:[%s326_s11] sm:$0xff]  ;;  %v2481_v9 = vld [vmem:[%s326_s11 + $0x8] sm:$0xff]  ;;  %v2482_v10 = vld [vmem:[%s326_s11 + $0x10] sm:$0xff]  ;;  %595 = vst.msk [vmem:[#allocation3] sm:$0xff] %vm560_vm0, %v2531_v16  ;;  %907 = vmatpush.msra.mxu2 %v842_v35  ;;  %s2200_s17 = sshll.u32 %s3464_s10, 3 }
   0xf   : > { %v2483_v11 = vld [vmem:[%s326_s11 + $0x18] sm:$0xff]  ;;  %v2484_v12 = vld [vmem:[%s326_s11 + $0x20] sm:$0xff]  ;;  %v2485_v13 = vld [vmem:[%s326_s11 + $0x28] sm:$0xff]  ;;  %563 = vst.msk [vmem:[#allocation2 + $0x10] sm:$0xff] %vm560_vm0, %v2530_v15  ;;  %s3436_s20 = scalar_lea.vmem %s3462_s9, %s2200_s17 }
  0x10   : > { %464 = vmatpush.bf16.msra.mxu0 %v2494_v1  ;;  %v2486_v14 = vld [vmem:[%s326_s11 + $0x30] sm:$0xff]  ;;  %564 = vst.msk [vmem:[#allocation2 + $0x18] sm:$0xff] %vm560_vm0, %v2530_v15  ;;  %v2487_v17 = vld [vmem:[%s326_s11 + $0x38] sm:$0xff]  ;;  %v2663_v18 = vld [vmem:[%s3455_s2] ss:$0 sm:$0xff] }
  0x11   : > { %565 = vst.msk [vmem:[#allocation2 + $0x20] sm:$0xff] %vm560_vm0, %v2530_v15  ;;  %v841_v39 = vld [vmem:[%s3456_s3 + $0x10] sm:$0xff]  ;;  %v840_v43 = vld [vmem:[%s3456_s3 + $0x8] sm:$0xff]  ;;  %v839_v46 = vld [vmem:[%s3456_s3] sm:$0xff] }
  0x12   : > { %566 = vst.msk [vmem:[#allocation2 + $0x28] sm:$0xff] %vm560_vm0, %v2530_v15  ;;  %908 = vmatpush.msra.mxu2 %v841_v39  ;;  %v2268_v49 = vld [vmem:[%s3456_s3 + $0x38] sm:$0xff]  ;;  %v2267_v54 = vld [vmem:[%s3456_s3 + $0x30] sm:$0xff]  ;;  %v2266_v58 = vld [vmem:[%s3456_s3 + $0x28] sm:$0xff] }
  0x13   : > { %567 = vst.msk [vmem:[#allocation2 + $0x30] sm:$0xff] %vm560_vm0, %v2530_v15  ;;  %872 = vmatpush.msra.mxu1 %v2268_v49  ;;  %2496 = vmatpush.msra.mxu3 %v2268_v49  ;;  %v2265_v62 = vld [vmem:[%s3456_s3 + $0x20] sm:$0xff] }
  0x14   : > { %465 = vmatpush.bf16.msra.mxu0 %v2493_v2  ;;  %568 = vst.msk [vmem:[#allocation2 + $0x38] sm:$0xff] %vm560_vm0, %v2530_v15  ;;  %909 = vmatpush.msra.mxu2 %v840_v43 }
  0x15   : > { %569 = vst.msk [vmem:[#allocation2 + $0x40] sm:$0xff] %vm560_vm0, %v2530_v15  ;;  %873 = vmatpush.msra.mxu1 %v2267_v54  ;;  %2497 = vmatpush.msra.mxu3 %v2267_v54 }
  0x16   : > { %570 = vst.msk [vmem:[#allocation2 + $0x48] sm:$0xff] %vm560_vm0, %v2530_v15  ;;  %910 = vmatpush.msra.mxu2 %v839_v46 }
  0x17   : > { %571 = vst.msk [vmem:[#allocation2 + $0x50] sm:$0xff] %vm560_vm0, %v2530_v15  ;;  %874 = vmatpush.msra.mxu1 %v2266_v58  ;;  %2498 = vmatpush.msra.mxu3 %v2266_v58 }
  0x18   : > { %466 = vmatpush.bf16.msra.mxu0 %v2492_v3  ;;  %572 = vst.msk [vmem:[#allocation2 + $0x58] sm:$0xff] %vm560_vm0, %v2530_v15 }
  0x19   : > { %573 = vst.msk [vmem:[#allocation2 + $0x60] sm:$0xff] %vm560_vm0, %v2530_v15  ;;  %875 = vmatpush.msra.mxu1 %v2265_v62  ;;  %2499 = vmatpush.msra.mxu3 %v2265_v62 }
  0x1a   : > { %574 = vst.msk [vmem:[#allocation2 + $0x68] sm:$0xff] %vm560_vm0, %v2530_v15 }
  0x1b   : > { %575 = vst.msk [vmem:[#allocation2 + $0x70] sm:$0xff] %vm560_vm0, %v2530_v15 }
  0x1c   : > { %467 = vmatpush.bf16.msra.mxu0 %v2491_v4  ;;  %576 = vst.msk [vmem:[#allocation2 + $0x78] sm:$0xff] %vm560_vm0, %v2530_v15 }
  0x1d   : > { %596 = vst.msk [vmem:[#allocation3 + $0x8] sm:$0xff] %vm560_vm0, %v2531_v16 }
  0x1e   : > { %597 = vst.msk [vmem:[#allocation3 + $0x10] sm:$0xff] %vm560_vm0, %v2531_v16 }
  0x1f   : > { %598 = vst.msk [vmem:[#allocation3 + $0x18] sm:$0xff] %vm560_vm0, %v2531_v16 }
  0x20   : > { %468 = vmatpush.bf16.msra.mxu0 %v2490_v5  ;;  %1645 = vst.msk [vmem:[#allocation3 + $0x18] sm:$0xff] %vm560_vm0, %v2531_v16 }
  0x24   : > { %469 = vmatpush.bf16.msra.mxu0 %v2489_v6 }
  0x28   : > { %470 = vmatpush.bf16.msra.mxu0 %v2488_v7 }
  0x2b   : > { %471 = vmatmul.bf16.vlgmr.msra.gmra.mxu0 %v2480_v8 }
  0x3b   : > { %476 = vmatmul.bf16.gmra.mxu0 %v2481_v9 }
  0x4b   : > { %481 = vmatmul.bf16.gmra.mxu0 %v2482_v10 }
  0x5b   : > { %486 = vmatmul.bf16.gmra.mxu0 %v2483_v11  ;;  %v2285_v11 = vld [vmem:[%s3456_s3 + $0x78] sm:$0xff] }
  0x5c   : > { %996 = vmatpush.msrb.mxu1 %v2285_v11 }
  0x6b   : > { %491 = vmatmul.bf16.gmra.mxu0 %v2484_v12 }
  0x7b   : > { %496 = vmatmul.bf16.gmra.mxu0 %v2485_v13 }
  0x8b   : > { %501 = vmatmul.bf16.gmra.mxu0 %v2486_v14 }
  0x9b   : > { %506 = vmatmul.bf16.gmra.mxu0 %v2487_v17 }
  0xa8   : > { %v472_v19 = vpop.f32.mrf.mxu0 }
  0xa9   : > { %v473_v20 = vadd.f32 %v2663_v18, %v472_v19  ;;  %v2284_v19 = vld [vmem:[%s3456_s3 + $0x70] sm:$0xff] }
  0xaa   : > { %997 = vmatpush.msrb.mxu1 %v2284_v19 }
  0xab   : > { %vm512_vm1 = vcmp.ge.f32.partialorder %v473_v20, 0.0  ;;  %v528_v21 = vmul.f32 0.01, %v473_v20 }
  0xad   : > { %v544_v22 = vsel %vm512_vm1, %v473_v20, %v528_v21 }
  0xae   : > { %578 = vst.msk [vmem:[#allocation2 + $0x4] sm:$0xff] %vm577_vm2, %v544_v22 }
  0xb0   : > { %v474_v23 = vpop.f32.mrf.mxu0 }
  0xb1   : > { %v475_v24 = vadd.f32 %v2663_v18, %v474_v23  ;;  %v2283_v23 = vld [vmem:[%s3456_s3 + $0x68] sm:$0xff] }
  0xb2   : > { %998 = vmatpush.msrb.mxu1 %v2283_v23 }
  0xb3   : > { %vm513_vm3 = vcmp.ge.f32.partialorder %v475_v24, 0.0  ;;  %v529_v25 = vmul.f32 0.01, %v475_v24 }
  0xb5   : > { %v611_v26 = vld [vmem:[#allocation2] sm:$0xff]  ;;  %v545_v27 = vsel %vm513_vm3, %v475_v24, %v529_v25 }
  0xb6   : > { %v613_v28 = vrot.slane %v611_v26, 4  ;;  %1213 = vst.msk [vmem:[#allocation2] sm:$0xff] %vm560_vm0, %v2531_v16 }
  0xb7   : > { %579 = vst.msk [vmem:[#allocation2 + $0xc] sm:$0xff] %vm577_vm2, %v545_v27  ;;  %v2282_v27 = vld [vmem:[%s3456_s3 + $0x60] sm:$0xff] }
  0xb8   : > { %v615_v29 = vmax.f32 %v611_v26, %v613_v28  ;;  %v477_v30 = vpop.f32.mrf.mxu0  ;;  %999 = vmatpush.msrb.mxu1 %v2282_v27 }
  0xb9   : > { %v478_v31 = vadd.f32 %v2663_v18, %v477_v30 }
  0xba   : > { %v617_v32 = vrot.slane %v615_v29, 2 }
  0xbb   : > { %vm514_vm4 = vcmp.ge.f32.partialorder %v478_v31, 0.0  ;;  %v530_v33 = vmul.f32 0.01, %v478_v31 }
  0xbc   : > { %v619_v34 = vmax.f32 %v615_v29, %v617_v32 }
  0xbd   : > { %v546_v36 = vsel %vm514_vm4, %v478_v31, %v530_v33 }
  0xbe   : > { %v621_v37 = vrot.slane %v619_v34, 1  ;;  %v626_v38 = vld [vmem:[#allocation2 + $0x8] sm:$0xff]  ;;  %580 = vst.msk [vmem:[#allocation2 + $0x14] sm:$0xff] %vm577_vm2, %v546_v36 }
  0xbf   : > { %v628_v40 = vrot.slane %v626_v38, 4  ;;  %1214 = vst.msk [vmem:[#allocation2 + $0x8] sm:$0xff] %vm560_vm0, %v2531_v16 }
  0xc0   : > { %v623_v41 = vmax.f32 %v619_v34, %v621_v37  ;;  %v479_v42 = vpop.f32.mrf.mxu0 }
  0xc1   : > { %v480_v44 = vadd.f32 %v2663_v18, %v479_v42  ;;  %v630_v45 = vmax.f32 %v626_v38, %v628_v40 }
  0xc2   : > { %625 = vst.msk [vmem:[#allocation3 + $0x4] sm:$0x1] %vm624_vm5, %v623_v41 }
  0xc3   : > { %vm515_vm6 = vcmp.ge.f32.partialorder %v480_v44, 0.0  ;;  %v531_v47 = vmul.f32 0.01, %v480_v44  ;;  %v632_v48 = vrot.slane %v630_v45, 2 }
  0xc5   : > { %v640_v50 = vld [vmem:[#allocation2 + $0x10] sm:$0xff]  ;;  %v547_v51 = vsel %vm515_vm6, %v480_v44, %v531_v47  ;;  %v634_v52 = vmax.f32 %v630_v45, %v632_v48  ;;  %vm593_vm6 = vcmask 257024  }
  0xc6   : > { %v642_v53 = vrot.slane %v640_v50, 4  ;;  %1215 = vst.msk [vmem:[#allocation2 + $0x10] sm:$0xff] %vm560_vm0, %v2531_v16 }
  0xc7   : > { %581 = vst.msk [vmem:[#allocation2 + $0x1c] sm:$0xff] %vm577_vm2, %v547_v51  ;;  %v636_v55 = vrot.slane %v634_v52, 1 }
  0xc8   : > { %v644_v56 = vmax.f32 %v640_v50, %v642_v53  ;;  %v482_v57 = vpop.f32.mrf.mxu0 }
  0xc9   : > { %v483_v59 = vadd.f32 %v2663_v18, %v482_v57  ;;  %v638_v60 = vmax.f32 %v634_v52, %v636_v55 }
  0xca   : > { %v646_v61 = vrot.slane %v644_v56, 2 }
  0xcb   : > { %vm516_vm7 = vcmp.ge.f32.partialorder %v483_v59, 0.0  ;;  %v532_v63 = vmul.f32 0.01, %v483_v59  ;;  %639 = vst.msk [vmem:[#allocation3 + $0x5] sm:$0x1] %vm624_vm5, %v638_v60 }
  0xcc   : > { %v648_v0 = vmax.f32 %v644_v56, %v646_v61 }
  0xcd   : > { %v548_v1 = vsel %vm516_vm7, %v483_v59, %v532_v63 }
  0xce   : > { %v650_v2 = vrot.slane %v648_v0, 1  ;;  %v654_v3 = vld [vmem:[#allocation2 + $0x18] sm:$0xff]  ;;  %582 = vst.msk [vmem:[#allocation2 + $0x24] sm:$0xff] %vm577_vm2, %v548_v1 }
  0xcf   : > { %v656_v4 = vrot.slane %v654_v3, 4  ;;  %1216 = vst.msk [vmem:[#allocation2 + $0x18] sm:$0xff] %vm560_vm0, %v2531_v16 }
  0xd0   : > { %v652_v5 = vmax.f32 %v648_v0, %v650_v2  ;;  %v484_v6 = vpop.f32.mrf.mxu0 }
  0xd1   : > { %v485_v7 = vadd.f32 %v2663_v18, %v484_v6  ;;  %v658_v8 = vmax.f32 %v654_v3, %v656_v4 }
  0xd2   : > { %653 = vst.msk [vmem:[#allocation3 + $0x6] sm:$0x1] %vm624_vm5, %v652_v5 }
  0xd3   : > { %vm517_vm8 = vcmp.ge.f32.partialorder %v485_v7, 0.0  ;;  %v533_v9 = vmul.f32 0.01, %v485_v7  ;;  %v660_v10 = vrot.slane %v658_v8, 2 }
  0xd5   : > { %v668_v12 = vld [vmem:[#allocation2 + $0x20] sm:$0xff]  ;;  %v549_v13 = vsel %vm517_vm8, %v485_v7, %v533_v9  ;;  %v662_v14 = vmax.f32 %v658_v8, %v660_v10  ;;  %vm1231_vm8 = vcmask 516096  }
  0xd6   : > { %v670_v17 = vrot.slane %v668_v12, 4  ;;  %1217 = vst.msk [vmem:[#allocation2 + $0x20] sm:$0xff] %vm560_vm0, %v2531_v16 }
  0xd7   : > { %2075 = vst.msk [vmem:[#allocation2 + $0x20] sm:$0xff] %vm560_vm0, %v2530_v15  ;;  %v664_v20 = vrot.slane %v662_v14, 1 }
  0xd8   : > { %v672_v21 = vmax.f32 %v668_v12, %v670_v17  ;;  %583 = vst.msk [vmem:[#allocation2 + $0x2c] sm:$0xff] %vm577_vm2, %v549_v13  ;;  %v487_v22 = vpop.f32.mrf.mxu0 }
  0xd9   : > { %v488_v24 = vadd.f32 %v2663_v18, %v487_v22  ;;  %v666_v25 = vmax.f32 %v662_v14, %v664_v20 }
  0xda   : > { %v674_v26 = vrot.slane %v672_v21, 2 }
  0xdb   : > { %vm518_vm9 = vcmp.ge.f32.partialorder %v488_v24, 0.0  ;;  %v534_v28 = vmul.f32 0.01, %v488_v24  ;;  %667 = vst.msk [vmem:[#allocation3 + $0x7] sm:$0x1] %vm624_vm5, %v666_v25 }
  0xdc   : > { %v676_v29 = vmax.f32 %v672_v21, %v674_v26 }
  0xdd   : > { %v550_v30 = vsel %vm518_vm9, %v488_v24, %v534_v28 }
  0xde   : > { %v678_v31 = vrot.slane %v676_v29, 1  ;;  %584 = vst.msk [vmem:[#allocation2 + $0x34] sm:$0xff] %vm577_vm2, %v550_v30 }
  0xdf   : > { %v682_v32 = vld [vmem:[#allocation2 + $0x28] sm:$0xff] }
  0xe0   : > { %v680_v33 = vmax.f32 %v676_v29, %v678_v31  ;;  %v684_v34 = vrot.slane %v682_v32, 4  ;;  %1218 = vst.msk [vmem:[#allocation2 + $0x28] sm:$0xff] %vm560_vm0, %v2531_v16  ;;  %v489_v35 = vpop.f32.mrf.mxu0 }
  0xe1   : > { %2076 = vst.msk [vmem:[#allocation2 + $0x28] sm:$0xff] %vm560_vm0, %v2530_v15  ;;  %v490_v36 = vadd.f32 %v2663_v18, %v489_v35 }
  0xe2   : > { %681 = vst.msk [vmem:[#allocation3 + $0x8] sm:$0x1] %vm624_vm5, %v680_v33  ;;  %v686_v37 = vmax.f32 %v682_v32, %v684_v34  ;;  %v836_v38 = vld [vmem:[#allocation3] sm:$0xff] }
  0xe3   : > { %vm519_vm10 = vcmp.ge.f32.partialorder %v490_v36, 0.0  ;;  %v535_v39 = vmul.f32 0.01, %v490_v36  ;;  %2272 = vmatmul.msk.f32.vlgmr.msra.gmra.mxu2 %vm577_vm2, %v836_v38  ;;  %v2292_v38 = vld [vmem:[%s3456_s3 + $0x98] sm:$0xff] }
  0xe4   : > { %v688_v40 = vrot.slane %v686_v37, 2  ;;  %1042 = vmatpush.msrb.mxu2 %v2292_v38 }
  0xe5   : > { %v696_v41 = vld [vmem:[#allocation2 + $0x30] sm:$0xff]  ;;  %v551_v42 = vsel %vm519_vm10, %v490_v36, %v535_v39 }
  0xe6   : > { %v690_v43 = vmax.f32 %v686_v37, %v688_v40  ;;  %v698_v44 = vrot.slane %v696_v41, 4  ;;  %1219 = vst.msk [vmem:[#allocation2 + $0x30] sm:$0xff] %vm560_vm0, %v2531_v16 }
  0xe7   : > { %2077 = vst.msk [vmem:[#allocation2 + $0x30] sm:$0xff] %vm560_vm0, %v2530_v15 }
  0xe8   : > { %v692_v45 = vrot.slane %v690_v43, 1  ;;  %v700_v46 = vmax.f32 %v696_v41, %v698_v44  ;;  %585 = vst.msk [vmem:[#allocation2 + $0x3c] sm:$0xff] %vm577_vm2, %v551_v42  ;;  %v492_v47 = vpop.f32.mrf.mxu0  ;;  %v2291_v41 = vld [vmem:[%s3456_s3 + $0x90] sm:$0xff] }
  0xe9   : > { %v493_v48 = vadd.f32 %v2663_v18, %v492_v47  ;;  %v843_v49 = vld [vmem:[#allocation3 + $0x1] sm:$0xff]  ;;  %1043 = vmatpush.msrb.mxu2 %v2291_v41 }
  0xea   : > { %v694_v50 = vmax.f32 %v690_v43, %v692_v45  ;;  %v702_v51 = vrot.slane %v700_v46, 2  ;;  %2269 = vmatmul.msk.f32.vlgmr.msra.gmra.mxu1 %vm577_vm2, %v843_v49  ;;  %v2289_v49 = vld [vmem:[%s3456_s3 + $0x80] sm:$0xff]  ;;  %v2297_v41 = vld [vmem:[%s3456_s3 + $0xa8] sm:$0xff] }
  0xeb   : > { %vm520_vm11 = vcmp.ge.f32.partialorder %v493_v48, 0.0  ;;  %v536_v52 = vmul.f32 0.01, %v493_v48 }
  0xec   : > { %695 = vst.msk [vmem:[#allocation3 + $0x9] sm:$0x1] %vm624_vm5, %v694_v50  ;;  %v704_v53 = vmax.f32 %v700_v46, %v702_v51  ;;  %v2290_v46 = vld [vmem:[%s3456_s3 + $0x88] sm:$0xff] }
  0xed   : > { %v552_v54 = vsel %vm520_vm11, %v493_v48, %v536_v52  ;;  %1044 = vmatpush.msrb.mxu2 %v2290_v46  ;;  %v2278_v52 = vld [vmem:[%s3456_s3 + $0x58] sm:$0xff] }
  0xee   : > { %v706_v55 = vrot.slane %v704_v53, 1  ;;  %586 = vst.msk [vmem:[#allocation2 + $0x44] sm:$0xff] %vm577_vm2, %v552_v54  ;;  %950 = vmatpush.msrb.mxu3 %v2278_v52 }
  0xef   : > { %v710_v56 = vld [vmem:[#allocation2 + $0x38] sm:$0xff]  ;;  %1045 = vmatpush.msrb.mxu2 %v2289_v49 }
  0xf0   : > { %v708_v57 = vmax.f32 %v704_v53, %v706_v55  ;;  %v712_v58 = vrot.slane %v710_v56, 4  ;;  %1220 = vst.msk [vmem:[#allocation2 + $0x38] sm:$0xff] %vm560_vm0, %v2531_v16  ;;  %v494_v59 = vpop.f32.mrf.mxu0 }
  0xf1   : > { %2078 = vst.msk [vmem:[#allocation2 + $0x38] sm:$0xff] %vm560_vm0, %v2530_v15  ;;  %v495_v60 = vadd.f32 %v2663_v18, %v494_v59 }
  0xf2   : > { %709 = vst.msk [vmem:[#allocation3 + $0xa] sm:$0x1] %vm624_vm5, %v708_v57  ;;  %v714_v61 = vmax.f32 %v710_v56, %v712_v58  ;;  %v2277_v57 = vld [vmem:[%s3456_s3 + $0x50] sm:$0xff] }
  0xf3   : > { %vm521_vm12 = vcmp.ge.f32.partialorder %v495_v60, 0.0  ;;  %v537_v62 = vmul.f32 0.01, %v495_v60  ;;  %951 = vmatpush.msrb.mxu3 %v2277_v57 }
  0xf4   : > { %v716_v63 = vrot.slane %v714_v61, 2 }
  0xf5   : > { %v724_v0 = vld [vmem:[#allocation2 + $0x40] sm:$0xff]  ;;  %v553_v1 = vsel %vm521_vm12, %v495_v60, %v537_v62  ;;  %vm1660_vm12 = vcmask 517120  }
  0xf6   : > { %v718_v2 = vmax.f32 %v714_v61, %v716_v63  ;;  %v726_v3 = vrot.slane %v724_v0, 4  ;;  %1221 = vst.msk [vmem:[#allocation2 + $0x40] sm:$0xff] %vm560_vm0, %v2531_v16  ;;  %v2276_v61 = vld [vmem:[%s3456_s3 + $0x48] sm:$0xff] }
  0xf7   : > { %2079 = vst.msk [vmem:[#allocation2 + $0x40] sm:$0xff] %vm560_vm0, %v2530_v15  ;;  %v2812_v63 = vld [vmem:[#allocation3 + $0x2] sm:$0xff]  ;;  %952 = vmatpush.msrb.mxu3 %v2276_v61 }
  0xf8   : > { %v720_v4 = vrot.slane %v718_v2, 1  ;;  %v728_v5 = vmax.f32 %v724_v0, %v726_v3  ;;  %587 = vst.msk [vmem:[#allocation2 + $0x4c] sm:$0xff] %vm577_vm2, %v553_v1  ;;  %v497_v6 = vpop.f32.mrf.mxu0 }
  0xf9   : > { %v498_v7 = vadd.f32 %v2663_v18, %v497_v6  ;;  %v967_v8 = vld [vmem:[#allocation3 + $0x3] sm:$0xff] }
  0xfa   : > { %v722_v9 = vmax.f32 %v718_v2, %v720_v4  ;;  %v730_v10 = vrot.slane %v728_v5, 2  ;;  %2286 = vmatmul.msk.f32.vlgmr.msrb.gmra.mxu1 %vm577_vm2, %v967_v8  ;;  %v2275_v6 = vld [vmem:[%s3456_s3 + $0x40] sm:$0xff] }
  0xfb   : > { %vm522_vm13 = vcmp.ge.f32.partialorder %v498_v7, 0.0  ;;  %v538_v11 = vmul.f32 0.01, %v498_v7  ;;  %953 = vmatpush.msrb.mxu3 %v2275_v6 }
  0xfc   : > { %723 = vst.msk [vmem:[#allocation3 + $0xb] sm:$0x1] %vm624_vm5, %v722_v9  ;;  %v732_v12 = vmax.f32 %v728_v5, %v730_v10  ;;  %v2313_v9 = vld [vmem:[%s3456_s3 + $0xf8] sm:$0xff] }
  0xfd   : > { %v554_v13 = vsel %vm522_vm13, %v498_v7, %v538_v11  ;;  %1180 = vmatpush.msra.mxu2 %v2313_v9 }
  0xfe   : > { %v734_v14 = vrot.slane %v732_v12, 1  ;;  %588 = vst.msk [vmem:[#allocation2 + $0x54] sm:$0xff] %vm577_vm2, %v554_v13 }
  0xff   : > { %v738_v17 = vld [vmem:[#allocation2 + $0x48] sm:$0xff] }
 0x100   : > { %v736_v19 = vmax.f32 %v732_v12, %v734_v14  ;;  %v740_v20 = vrot.slane %v738_v17, 4  ;;  %1222 = vst.msk [vmem:[#allocation2 + $0x48] sm:$0xff] %vm560_vm0, %v2531_v16  ;;  %v499_v21 = vpop.f32.mrf.mxu0 }
 0x101   : > { %2080 = vst.msk [vmem:[#allocation2 + $0x48] sm:$0xff] %vm560_vm0, %v2530_v15  ;;  %v500_v22 = vadd.f32 %v2663_v18, %v499_v21 }
 0x102   : > { %737 = vst.msk [vmem:[#allocation3 + $0xc] sm:$0x1] %vm624_vm5, %v736_v19  ;;  %v742_v23 = vmax.f32 %v738_v17, %v740_v20 }
 0x103   : > { %vm523_vm14 = vcmp.ge.f32.partialorder %v500_v22, 0.0  ;;  %v539_v24 = vmul.f32 0.01, %v500_v22  ;;  %v2810_v62 = vld [vmem:[#allocation3 + $0x4] sm:$0xff] }
 0x104   : > { %v744_v25 = vrot.slane %v742_v23, 2 }
 0x105   : > { %v752_v26 = vld [vmem:[#allocation2 + $0x50] sm:$0xff]  ;;  %v555_v27 = vsel %vm523_vm14, %v500_v22, %v539_v24 }
 0x106   : > { %v746_v28 = vmax.f32 %v742_v23, %v744_v25  ;;  %v754_v29 = vrot.slane %v752_v26, 4  ;;  %1223 = vst.msk [vmem:[#allocation2 + $0x50] sm:$0xff] %vm560_vm0, %v2531_v16 }
 0x107   : > { %2081 = vst.msk [vmem:[#allocation2 + $0x50] sm:$0xff] %vm560_vm0, %v2530_v15 }
 0x108   : > { %v748_v30 = vrot.slane %v746_v28, 1  ;;  %v756_v31 = vmax.f32 %v752_v26, %v754_v29  ;;  %589 = vst.msk [vmem:[#allocation2 + $0x5c] sm:$0xff] %vm577_vm2, %v555_v27  ;;  %v502_v32 = vpop.f32.mrf.mxu0  ;;  %v2306_v26 = vld [vmem:[%s3456_s3 + $0xd8] sm:$0xff]  ;;  %v2305_v29 = vld [vmem:[%s3456_s3 + $0xd0] sm:$0xff] }
 0x109   : > { %v503_v33 = vadd.f32 %v2663_v18, %v502_v32  ;;  %v2817_v2 = vld [vmem:[#allocation3 + $0x5] sm:$0xff]  ;;  %1134 = vmatpush.msra.mxu1 %v2306_v26 }
 0x10a   : > { %v750_v34 = vmax.f32 %v746_v28, %v748_v30  ;;  %v758_v35 = vrot.slane %v756_v31, 2  ;;  %v2304_v30 = vld [vmem:[%s3456_s3 + $0xc8] sm:$0xff]  ;;  %v2335_v26 = vld [vmem:[%s3458_s5 + $0xa0] sm:$0xff] }
 0x10b   : > { %vm524_vm15 = vcmp.ge.f32.partialorder %v503_v33, 0.0  ;;  %v540_v36 = vmul.f32 0.01, %v503_v33  ;;  %1135 = vmatpush.msra.mxu1 %v2305_v29  ;;  %v2319_v29 = vld [vmem:[%s3458_s5 + $0x50] sm:$0xff] }
 0x10c   : > { %751 = vst.msk [vmem:[#allocation3 + $0xd] sm:$0x1] %vm624_vm5, %v750_v34  ;;  %v760_v37 = vmax.f32 %v756_v31, %v758_v35 }
 0x10d   : > { %v556_v39 = vsel %vm524_vm15, %v503_v33, %v540_v36  ;;  %v2299_v33 = vld [vmem:[%s3456_s3 + $0xb8] sm:$0xff]  ;;  %v2303_v36 = vld [vmem:[%s3456_s3 + $0xc0] sm:$0xff]  ;;  %1136 = vmatpush.msra.mxu1 %v2304_v30  ;;  %v1238_v30 = vld [vmem:[%s3458_s5 + $0x10] sm:$0xff] }
 0x10e   : > { %v762_v40 = vrot.slane %v760_v37, 1  ;;  %590 = vst.msk [vmem:[#allocation2 + $0x64] sm:$0xff] %vm577_vm2, %v556_v39  ;;  %v2298_v39 = vld [vmem:[%s3456_s3 + $0xb0] sm:$0xff] }
 0x10f   : > { %v766_v42 = vld [vmem:[#allocation2 + $0x58] sm:$0xff]  ;;  %1137 = vmatpush.msra.mxu1 %v2303_v36  ;;  %v2332_v36 = vld [vmem:[%s3458_s5 + $0x88] sm:$0xff] }
 0x110   : > { %v764_v43 = vmax.f32 %v760_v37, %v762_v40  ;;  %v768_v44 = vrot.slane %v766_v42, 4  ;;  %1224 = vst.msk [vmem:[#allocation2 + $0x58] sm:$0xff] %vm560_vm0, %v2531_v16  ;;  %v504_v45 = vpop.f32.mrf.mxu0 }
 0x111   : > { %2082 = vst.msk [vmem:[#allocation2 + $0x58] sm:$0xff] %vm560_vm0, %v2530_v15  ;;  %v505_v47 = vadd.f32 %v2663_v18, %v504_v45  ;;  %v2296_v45 = vld [vmem:[%s3456_s3 + $0xa0] sm:$0xff] }
 0x112   : > { %765 = vst.msk [vmem:[#allocation3 + $0xe] sm:$0x1] %vm624_vm5, %v764_v43  ;;  %v770_v48 = vmax.f32 %v766_v42, %v768_v44  ;;  %v2311_v42 = vld [vmem:[%s3456_s3 + $0xe8] sm:$0xff]  ;;  %v2310_v43 = vld [vmem:[%s3456_s3 + $0xe0] sm:$0xff] }
 0x113   : > { %vm525_vm1 = vcmp.ge.f32.partialorder %v505_v47, 0.0  ;;  %v541_v50 = vmul.f32 0.01, %v505_v47  ;;  %v2815_v1 = vld [vmem:[#allocation3 + $0x6] sm:$0xff] }
 0x114   : > { %v772_v51 = vrot.slane %v770_v48, 2 }
 0x115   : > { %v780_v53 = vld [vmem:[#allocation2 + $0x60] sm:$0xff]  ;;  %v557_v54 = vsel %vm525_vm1, %v505_v47, %v541_v50 }
 0x116   : > { %v774_v55 = vmax.f32 %v770_v48, %v772_v51  ;;  %v782_v56 = vrot.slane %v780_v53, 4  ;;  %1225 = vst.msk [vmem:[#allocation2 + $0x60] sm:$0xff] %vm560_vm0, %v2531_v16 }
 0x117   : > { %2083 = vst.msk [vmem:[#allocation2 + $0x60] sm:$0xff] %vm560_vm0, %v2530_v15 }
 0x118   : > { %v776_v58 = vrot.slane %v774_v55, 1  ;;  %v784_v59 = vmax.f32 %v780_v53, %v782_v56  ;;  %591 = vst.msk [vmem:[#allocation2 + $0x6c] sm:$0xff] %vm577_vm2, %v557_v54  ;;  %v507_v60 = vpop.f32.mrf.mxu0 }
 0x119   : > { %v508_v0 = vadd.f32 %v2663_v18, %v507_v60  ;;  %v2819_v3 = vld [vmem:[#allocation3 + $0x7] sm:$0xff] }
 0x11a   : > { %v778_v4 = vmax.f32 %v774_v55, %v776_v58  ;;  %v786_v5 = vrot.slane %v784_v59, 2  ;;  %1642 = vst.msk [vmem:[#allocation3] sm:$0xff] %vm560_vm0, %v2531_v16 }
 0x11b   : > { %vm526_vm3 = vcmp.ge.f32.partialorder %v508_v0, 0.0  ;;  %v542_v7 = vmul.f32 0.01, %v508_v0 }
 0x11c   : > { %779 = vst.msk [vmem:[#allocation3 + $0xf] sm:$0x1] %vm624_vm5, %v778_v4  ;;  %v788_v8 = vmax.f32 %v784_v59, %v786_v5  ;;  %v1061_v4 = vld [vmem:[#allocation3 + $0x15] sm:$0x1]  ;;  %v1153_v5 = vld [vmem:[#allocation3 + $0x17] sm:$0x1] }
 0x11d   : > { %v558_v10 = vsel %vm526_vm3, %v508_v0, %v542_v7  ;;  %v1015_v0 = vld [vmem:[#allocation3 + $0x14] sm:$0x1] }
 0x11e   : > { %v790_v11 = vrot.slane %v788_v8, 1  ;;  %592 = vst.msk [vmem:[#allocation2 + $0x74] sm:$0xff] %vm577_vm2, %v558_v10  ;;  %v2323_v7 = vld [vmem:[%s3458_s5 + $0x70] sm:$0xff] }
 0x11f   : > { %v794_v12 = vld [vmem:[#allocation2 + $0x68] sm:$0xff] }
 0x120   : > { %v792_v13 = vmax.f32 %v788_v8, %v790_v11  ;;  %v796_v14 = vrot.slane %v794_v12, 4  ;;  %1226 = vst.msk [vmem:[#allocation2 + $0x68] sm:$0xff] %vm560_vm0, %v2531_v16  ;;  %v509_v17 = vpop.f32.mrf.mxu0  ;;  %v1243_v11 = vld [vmem:[%s3458_s5 + $0x38] sm:$0xff] }
 0x121   : > { %2084 = vst.msk [vmem:[#allocation2 + $0x68] sm:$0xff] %vm560_vm0, %v2530_v15  ;;  %v510_v19 = vadd.f32 %v2663_v18, %v509_v17  ;;  %v2312_v18 = vld [vmem:[%s3456_s3 + $0xf0] sm:$0xff]  ;;  %1308 = vmatpush.msrb.mxu1 %v1243_v11  ;;  %v2343_v11 = vld [vmem:[%s3458_s5 + $0xc8] sm:$0xff] }
 0x122   : > { %793 = vst.msk [vmem:[#allocation3 + $0x10] sm:$0x1] %vm624_vm5, %v792_v13  ;;  %v798_v20 = vmax.f32 %v794_v12, %v796_v14  ;;  %1181 = vmatpush.msra.mxu2 %v2312_v18  ;;  %v2338_v12 = vld [vmem:[%s3458_s5 + $0xb8] sm:$0xff]  ;;  %v1242_v13 = vld [vmem:[%s3458_s5 + $0x30] sm:$0xff] }
 0x123   : > { %vm527_vm4 = vcmp.ge.f32.partialorder %v510_v19, 0.0  ;;  %v543_v21 = vmul.f32 0.01, %v510_v19  ;;  %v837_v22 = vld [vmem:[#allocation3 + $0x8] sm:$0xff]  ;;  %v2337_v14 = vld [vmem:[%s3458_s5 + $0xb0] sm:$0xff]  ;;  %1309 = vmatpush.msrb.mxu1 %v1242_v13  ;;  %v2320_v18 = vld [vmem:[%s3458_s5 + $0x58] sm:$0xff] }
 0x124   : > { %v800_v23 = vrot.slane %v798_v20, 2  ;;  %2273 = vmatmul.msk.f32.gmra.mxu2 %vm577_vm2, %v837_v22  ;;  %v2336_v22 = vld [vmem:[%s3458_s5 + $0xa8] sm:$0xff] }
 0x125   : > { %v808_v24 = vld [vmem:[#allocation2 + $0x70] sm:$0xff]  ;;  %v559_v25 = vsel %vm527_vm4, %v510_v19, %v543_v21  ;;  %1182 = vmatpush.msra.mxu2 %v2311_v42  ;;  %v1241_v21 = vld [vmem:[%s3458_s5 + $0x28] sm:$0xff] }
 0x126   : > { %v802_v27 = vmax.f32 %v798_v20, %v800_v23  ;;  %v810_v28 = vrot.slane %v808_v24, 4  ;;  %1227 = vst.msk [vmem:[#allocation2 + $0x70] sm:$0xff] %vm560_vm0, %v2531_v16  ;;  %v2322_v20 = vld [vmem:[%s3458_s5 + $0x68] sm:$0xff]  ;;  %1310 = vmatpush.msrb.mxu1 %v1241_v21 }
 0x127   : > { %2085 = vst.msk [vmem:[#allocation2 + $0x70] sm:$0xff] %vm560_vm0, %v2530_v15  ;;  %1183 = vmatpush.msra.mxu2 %v2310_v43 }
 0x128   : > { %v804_v31 = vrot.slane %v802_v27, 1  ;;  %v812_v32 = vmax.f32 %v808_v24, %v810_v28  ;;  %594 = vst.msk [vmem:[#allocation2 + $0x7c] sm:$0xf] %vm593_vm6, %v559_v25  ;;  %v2321_v24 = vld [vmem:[%s3458_s5 + $0x60] sm:$0xff]  ;;  %v2334_v28 = vld [vmem:[%s3458_s5 + $0x98] sm:$0xff] }
 0x129   : > { %v844_v34 = vld [vmem:[#allocation3 + $0x9] sm:$0xff]  ;;  %v1240_v25 = vld [vmem:[%s3458_s5 + $0x20] sm:$0xff] }
 0x12a   : > { %v838_v35 = vld [vmem:[#allocation3 + $0x10] sm:$0x1]  ;;  %v806_v37 = vmax.f32 %v802_v27, %v804_v31  ;;  %v814_v38 = vrot.slane %v812_v32, 2  ;;  %2270 = vmatmul.msk.f32.vlgmr.msra.gmra.mxu3 %vm577_vm2, %v844_v34  ;;  %1311 = vmatpush.msrb.mxu1 %v1240_v25  ;;  %v1239_v27 = vld [vmem:[%s3458_s5 + $0x18] sm:$0xff]  ;;  %v2318_v34 = vld [vmem:[%s3458_s5 + $0x48] sm:$0xff] }
 0x12b   : > { %1088 = vmatpush.msra.mxu3 %v2299_v33  ;;  %v2333_v31 = vld [vmem:[%s3458_s5 + $0x90] sm:$0xff]  ;;  %v2353_v25 = vld [vmem:[%s3458_s5 + $0x100] sm:$0xff] }
 0x12c   : > { %807 = vst.msk [vmem:[#allocation3 + $0x11] sm:$0x1] %vm624_vm5, %v806_v37  ;;  %v816_v40 = vmax.f32 %v812_v32, %v814_v38  ;;  %2274 = vmatmul.msk.f32.gmra.mxu2 %vm577_vm2, %v838_v35  ;;  %1312 = vmatpush.msrb.mxu1 %v1239_v27  ;;  %v1237_v35 = vld [vmem:[%s3458_s5 + $0x8] sm:$0xff]  ;;  %v2317_v37 = vld [vmem:[%s3458_s5 + $0x40] sm:$0xff] }
 0x12d   : > { %1089 = vmatpush.msra.mxu3 %v2298_v39  ;;  %v1236_v38 = vld [vmem:[%s3458_s5] sm:$0xff] }
 0x12e   : > { %v818_v44 = vrot.slane %v816_v40, 1  ;;  %1313 = vmatpush.msrb.mxu1 %v1238_v30  ;;  %v2331_v39 = vld [vmem:[%s3458_s5 + $0x80] sm:$0xff] }
 0x12f   : > { %v822_v46 = vld [vmem:[#allocation2 + $0x78] sm:$0xff]  ;;  %1090 = vmatpush.msra.mxu3 %v2297_v41 }
 0x130   : > { %v820_v47 = vmax.f32 %v816_v40, %v818_v44  ;;  %v824_v48 = vrot.slane %v822_v46, 4  ;;  %1228 = vst.msk [vmem:[#allocation2 + $0x78] sm:$0xff] %vm560_vm0, %v2531_v16  ;;  %1314 = vmatpush.msrb.mxu1 %v1237_v35 }
 0x131   : > { %2086 = vst.msk [vmem:[#allocation2 + $0x78] sm:$0xff] %vm560_vm0, %v2530_v15  ;;  %1091 = vmatpush.msra.mxu3 %v2296_v45 }
 0x132   : > { %821 = vst.msk [vmem:[#allocation3 + $0x12] sm:$0x1] %vm624_vm5, %v820_v47  ;;  %v826_v49 = vmax.f32 %v822_v46, %v824_v48  ;;  %1315 = vmatpush.msrb.mxu1 %v1236_v38  ;;  %v2349_v46 = vld [vmem:[%s3458_s5 + $0xf8] sm:$0xff]  ;;  %v2348_v47 = vld [vmem:[%s3458_s5 + $0xf0] sm:$0xff] }
 0x133   : > { %v845_v50 = vld [vmem:[#allocation3 + $0x11] sm:$0x1]  ;;  %v2382_v38 = vld [vmem:[%s3458_s5 + $0x1b8] sm:$0xff] }
 0x134   : > { %v828_v51 = vrot.slane %v826_v49, 2  ;;  %2271 = vmatmul.msk.f32.gmra.mxu3 %vm577_vm2, %v845_v50  ;;  %2293 = vmatmul.msk.f32.vlgmr.msrb.gmra.mxu2 %vm577_vm2, %v2810_v62  ;;  %v922_v56 = vld [vmem:[#allocation3 + $0xa] sm:$0xff]  ;;  %v2371_v50 = vld [vmem:[%s3458_s5 + $0x178] sm:$0xff] }
 0x135   : > { %1355 = vmatpush.msrb.mxu2 %v2338_v12 }
 0x136   : > { %v830_v52 = vmax.f32 %v826_v49, %v828_v51  ;;  %v2360_v49 = vld [vmem:[%s3458_s5 + $0x138] sm:$0xff] }
 0x137   : > { %1356 = vmatpush.msrb.mxu2 %v2337_v14 }
 0x138   : > { %v832_v53 = vrot.slane %v830_v52, 1 }
 0x139   : > { %v968_v54 = vld [vmem:[#allocation3 + $0xb] sm:$0xff]  ;;  %1357 = vmatpush.msrb.mxu2 %v2336_v22  ;;  %v2342_v22 = vld [vmem:[%s3458_s5 + $0xc0] sm:$0xff] }
 0x13a   : > { %v834_v55 = vmax.f32 %v830_v52, %v832_v53  ;;  %2287 = vmatmul.msk.f32.gmra.mxu1 %vm577_vm2, %v968_v54  ;;  %v923_v62 = vld [vmem:[#allocation3 + $0x12] sm:$0x1]  ;;  %v2347_v52 = vld [vmem:[%s3458_s5 + $0xe8] sm:$0xff] }
 0x13b   : > { %1358 = vmatpush.msrb.mxu2 %v2335_v26  ;;  %v2359_v53 = vld [vmem:[%s3458_s5 + $0x130] sm:$0xff]  ;;  %v2364_v26 = vld [vmem:[%s3458_s5 + $0x140] sm:$0xff] }
 0x13c   : > { %835 = vst.msk [vmem:[#allocation3 + $0x13] sm:$0x1] %vm624_vm5, %v834_v55  ;;  %2279 = vmatmul.msk.f32.vlgmr.msrb.gmra.mxu3 %vm577_vm2, %v2812_v63  ;;  %v1107_v63 = vld [vmem:[#allocation3 + $0x16] sm:$0x1] }
 0x13d   : > { %1359 = vmatpush.msrb.mxu2 %v2334_v28  ;;  %v2370_v54 = vld [vmem:[%s3458_s5 + $0x170] sm:$0xff] }
 0x13f   : > { %1360 = vmatpush.msrb.mxu2 %v2333_v31 }
 0x141   : > { %1361 = vmatpush.msrb.mxu2 %v2332_v36 }
 0x143   : > { %v969_v57 = vld [vmem:[#allocation3 + $0x13] sm:$0x1]  ;;  %1362 = vmatpush.msrb.mxu2 %v2331_v39 }
 0x144   : > { %v1014_v58 = vld [vmem:[#allocation3 + $0xc] sm:$0xff]  ;;  %2280 = vmatmul.msk.f32.gmra.mxu3 %vm577_vm2, %v922_v56  ;;  %2288 = vmatmul.msk.f32.gmra.mxu1 %vm577_vm2, %v969_v57 }
 0x145   : > { %v1106_v59 = vld [vmem:[#allocation3 + $0xe] sm:$0xff]  ;;  %2294 = vmatmul.msk.f32.gmra.mxu2 %vm577_vm2, %v1014_v58 }
 0x146   : > { %v1060_v60 = vld [vmem:[#allocation3 + $0xd] sm:$0xff] }
 0x147   : > { %v1152_v61 = vld [vmem:[#allocation3 + $0xf] sm:$0xff] }
 0x148   : > { %1643 = vst.msk [vmem:[#allocation3 + $0x8] sm:$0xff] %vm560_vm0, %v2531_v16  ;;  %v2358_v57 = vld [vmem:[%s3458_s5 + $0x128] sm:$0xff] }
 0x149   : > { %1644 = vst.msk [vmem:[#allocation3 + $0x10] sm:$0xff] %vm560_vm0, %v2531_v16  ;;  %v2369_v58 = vld [vmem:[%s3458_s5 + $0x168] sm:$0xff] }
 0x14c   : > { %2281 = vmatmul.msk.f32.gmra.mxu3 %vm577_vm2, %v923_v62  ;;  %2307 = vmatmul.msk.f32.vlgmr.msra.gmra.mxu1 %vm577_vm2, %v2815_v1 }
 0x14d   : > { %2295 = vmatmul.msk.f32.gmra.mxu2 %vm577_vm2, %v1015_v0  ;;  %1455 = vmatpush.msra.mxu1 %v2360_v49  ;;  %v2357_v0 = vld [vmem:[%s3458_s5 + $0x120] sm:$0xff] }
 0x14f   : > { %1456 = vmatpush.msra.mxu1 %v2359_v53  ;;  %v2378_v53 = vld [vmem:[%s3458_s5 + $0x198] sm:$0xff] }
 0x151   : > { %1457 = vmatpush.msra.mxu1 %v2358_v57 }
 0x153   : > { %1458 = vmatpush.msra.mxu1 %v2357_v0 }
 0x154   : > { %2300 = vmatmul.msk.f32.vlgmr.msra.gmra.mxu3 %vm577_vm2, %v2817_v2  ;;  %2308 = vmatmul.msk.f32.gmra.mxu1 %vm577_vm2, %v1106_v59 }
 0x155   : > { %2314 = vmatmul.msk.f32.vlgmr.msra.gmra.mxu2 %vm577_vm2, %v2819_v3  ;;  %v2324_v3 = vld [vmem:[%s3458_s5 + $0x78] sm:$0xff] }
 0x156   : > { %1273 = vmatpush.msrb.mxu3 %v2324_v3  ;;  %1505 = vmatpush.msra.mxu2 %v2371_v50  ;;  %v2391_v50 = vld [vmem:[%s3458_s5 + $0x1e8] sm:$0xff] }
 0x158   : > { %1274 = vmatpush.msrb.mxu3 %v2323_v7  ;;  %1506 = vmatpush.msra.mxu2 %v2370_v54  ;;  %v2356_v7 = vld [vmem:[%s3458_s5 + $0x118] sm:$0xff]  ;;  %v2390_v54 = vld [vmem:[%s3458_s5 + $0x1e0] sm:$0xff] }
 0x159   : > { %1459 = vmatpush.msra.mxu1 %v2356_v7  ;;  %v2387_v7 = vld [vmem:[%s3458_s5 + $0x1c8] sm:$0xff] }
 0x15a   : > { %1275 = vmatpush.msrb.mxu3 %v2322_v20  ;;  %1507 = vmatpush.msra.mxu2 %v2369_v58 }
 0x15c   : > { %2301 = vmatmul.msk.f32.gmra.mxu3 %vm577_vm2, %v1060_v60  ;;  %2309 = vmatmul.msk.f32.gmra.mxu1 %vm577_vm2, %v1107_v63  ;;  %v2346_v60 = vld [vmem:[%s3458_s5 + $0xe0] sm:$0xff] }
 0x15d   : > { %2315 = vmatmul.msk.f32.gmra.mxu2 %vm577_vm2, %v1152_v61  ;;  %1276 = vmatpush.msrb.mxu3 %v2321_v24 }
 0x15f   : > { %1277 = vmatpush.msrb.mxu3 %v2320_v18 }
 0x161   : > { %1278 = vmatpush.msrb.mxu3 %v2319_v29 }
 0x163   : > { %1279 = vmatpush.msrb.mxu3 %v2318_v34 }
 0x164   : > { %2302 = vmatmul.msk.f32.gmra.mxu3 %vm577_vm2, %v1061_v4  ;;  %v2368_v4 = vld [vmem:[%s3458_s5 + $0x160] sm:$0xff] }
 0x165   : > { %2316 = vmatmul.msk.f32.gmra.mxu2 %vm577_vm2, %v1153_v5  ;;  %1280 = vmatpush.msrb.mxu3 %v2317_v37  ;;  %v2345_v5 = vld [vmem:[%s3458_s5 + $0xd8] sm:$0xff] }
 0x166   : > { %v912_v16 = vpop.f32.mrf.mxu2  ;;  %1508 = vmatpush.msra.mxu2 %v2368_v4 }
 0x167   : > { %v877_v2 = vpop.f32.mrf.mxu1  ;;  %1405 = vmatpush.msra.mxu3 %v2349_v46  ;;  %v2393_v46 = vld [vmem:[%s3458_s5 + $0x1f8] sm:$0xff] }
 0x168   : > { %v913_v41 = vadd.f32 %v912_v16, %v877_v2 }
 0x169   : > { %1406 = vmatpush.msra.mxu3 %v2348_v47  ;;  %v2392_v47 = vld [vmem:[%s3458_s5 + $0x1f0] sm:$0xff] }
 0x16b   : > { %1407 = vmatpush.msra.mxu3 %v2347_v52 }
 0x16d   : > { %1408 = vmatpush.msra.mxu3 %v2346_v60  ;;  %v2389_v60 = vld [vmem:[%s3458_s5 + $0x1d8] sm:$0xff] }
 0x16f   : > { %1409 = vmatpush.msra.mxu3 %v2345_v5  ;;  %v2375_v5 = vld [vmem:[%s3458_s5 + $0x180] sm:$0xff] }
 0x177   : > { %v1001_v10 = vpop.f32.mrf.mxu1 }
 0x1a7   : > { %v2911_v1 = vpop.f32.mrf.mxu2 }
 0x1ad   : > { %v2913_v6 = vpop.f32.mrf.mxu3 }
 0x1ae   : > { %v916_v48 = vadd.f32 %v2911_v1, %v2913_v6  ;;  %v3044_v1 = vld [vmem:[%s3457_s4] ss:$0 sm:$0xff]  ;;  %v2344_v6 = vld [vmem:[%s3458_s5 + $0xd0] sm:$0xff] }
 0x1af   : > { %v2921_v8 = vpop.f32.mrf.mxu2  ;;  %1410 = vmatpush.msra.mxu3 %v2344_v6 }
 0x1b1   : > { %1411 = vmatpush.msra.mxu3 %v2343_v11 }
 0x1b3   : > { %1412 = vmatpush.msra.mxu3 %v2342_v22 }
 0x1b7   : > { %v2923_v9 = vpop.f32.mrf.mxu3  ;;  %v1047_v19 = vpop.f32.mrf.mxu2 }
 0x1b8   : > { %v2946_v23 = vpop.f32.mrf.mxu1  ;;  %v919_v2 = vadd.f32 %v2921_v8, %v2923_v9  ;;  %v2355_v8 = vld [vmem:[%s3458_s5 + $0x110] sm:$0xff] }
 0x1b9   : > { %v2366_v9 = vld [vmem:[%s3458_s5 + $0x150] sm:$0xff]  ;;  %1460 = vmatpush.msra.mxu1 %v2355_v8  ;;  %v2386_v8 = vld [vmem:[%s3458_s5 + $0x1c0] sm:$0xff] }
 0x1bf   : > { %v955_v17 = vpop.f32.mrf.mxu3 }
 0x1c0   : > { %v964_v42 = vadd.f32 %v955_v17, %v913_v41  ;;  %v2354_v17 = vld [vmem:[%s3458_s5 + $0x108] sm:$0xff] }
 0x1c1   : > { %v2995_v40 = vpop.f32.mrf.mxu1  ;;  %1461 = vmatpush.msra.mxu1 %v2354_v17  ;;  %v1478_v17 = vld [vmem:[#allocation2 + $0x15] sm:$0x3] }
 0x1c2   : > { %v1010_v45 = vadd.f32 %v1001_v10, %v964_v42  ;;  %v2367_v10 = vld [vmem:[%s3458_s5 + $0x158] sm:$0xff] }
 0x1c3   : > { %1509 = vmatpush.msra.mxu2 %v2367_v10  ;;  %1462 = vmatpush.msra.mxu1 %v2353_v25  ;;  %v2448_v25 = vld [vmem:[%s3460_s7 + $0x160] sm:$0xff] }
 0x1c4   : > { %v1056_v56 = vadd.f32 %v1047_v19, %v1010_v45  ;;  %v2365_v19 = vld [vmem:[%s3458_s5 + $0x148] sm:$0xff] }
 0x1c5   : > { %1510 = vmatpush.msra.mxu2 %v2366_v9 }
 0x1c7   : > { %v958_v32 = vpop.f32.mrf.mxu3  ;;  %1511 = vmatpush.msra.mxu2 %v2365_v19  ;;  %v1578_v19 = vld [vmem:[#allocation2 + $0x17] sm:$0x3] }
 0x1c8   : > { %v2975_v33 = vpop.f32.mrf.mxu2  ;;  %v965_v55 = vadd.f32 %v958_v32, %v916_v48  ;;  %v2380_v48 = vld [vmem:[%s3458_s5 + $0x1a8] sm:$0xff]  ;;  %2074 = vst.msk [vmem:[#allocation2 + $0x18] sm:$0xff] %vm560_vm0, %v2530_v15 }
 0x1c9   : > { %v1139_v51 = vpop.f32.mrf.mxu1  ;;  %1512 = vmatpush.msra.mxu2 %v2364_v26 }
 0x1ca   : > { %v1011_v63 = vadd.f32 %v2946_v23, %v965_v55 }
 0x1cc   : > { %v1057_v12 = vadd.f32 %v2975_v33, %v1011_v63 }
 0x1cf   : > { %v961_v43 = vpop.f32.mrf.mxu3 }
 0x1d0   : > { %v2997_v44 = vpop.f32.mrf.mxu2  ;;  %v966_v13 = vadd.f32 %v961_v43, %v919_v2 }
 0x1d1   : > { %v1142_v20 = vpop.f32.mrf.mxu1 }
 0x1d2   : > { %v1012_v27 = vadd.f32 %v2995_v40, %v966_v13 }
 0x1d4   : > { %v1058_v31 = vadd.f32 %v2997_v44, %v1012_v27  ;;  %v2381_v44 = vld [vmem:[%s3458_s5 + $0x1b0] sm:$0xff] }
 0x1d7   : > { %v1093_v59 = vpop.f32.mrf.mxu3 }
 0x1d8   : > { %v1102_v61 = vadd.f32 %v1093_v59, %v1056_v56  ;;  %v1185_v62 = vpop.f32.mrf.mxu2  ;;  %v2377_v59 = vld [vmem:[%s3458_s5 + $0x190] sm:$0xff] }
 0x1d9   : > { %v1145_v34 = vpop.f32.mrf.mxu1 }
 0x1da   : > { %v1148_v16 = vadd.f32 %v1139_v51, %v1102_v61  ;;  %v2379_v51 = vld [vmem:[%s3458_s5 + $0x1a0] sm:$0xff]  ;;  %v2376_v61 = vld [vmem:[%s3458_s5 + $0x188] sm:$0xff] }
 0x1dc   : > { %v1194_v3 = vadd.f32 %v1185_v62, %v1148_v16  ;;  %v2388_v62 = vld [vmem:[%s3458_s5 + $0x1d0] sm:$0xff] }
 0x1de   : > { %v1201_v14 = vadd.f32 %v3044_v1, %v1194_v3 }
 0x1df   : > { %v1096_v21 = vpop.f32.mrf.mxu3 }
 0x1e0   : > { %vm1204_vm2 = vcmp.ge.f32.partialorder %v1201_v14, 0.0  ;;  %v1207_v23 = vmul.f32 0.01, %v1201_v14  ;;  %v1103_v24 = vadd.f32 %v1096_v21, %v1057_v12  ;;  %v1188_v18 = vpop.f32.mrf.mxu2  ;;  %v2450_v21 = vld [vmem:[%s3460_s7 + $0x170] sm:$0xff] }
 0x1e2   : > { %v1210_v28 = vsel %vm1204_vm2, %v1201_v14, %v1207_v23  ;;  %v1149_v29 = vadd.f32 %v1142_v20, %v1103_v24  ;;  %v2451_v20 = vld [vmem:[%s3460_s7 + $0x178] sm:$0xff]  ;;  %v1528_v23 = vld [vmem:[#allocation2 + $0x16] sm:$0x3] }
 0x1e3   : > { %1229 = vst.msk [vmem:[#allocation2 + $0x4] sm:$0xff] %vm560_vm0, %v1210_v28  ;;  %1934 = vmatpush.msrb.mxu0 %v2451_v20  ;;  %v2447_v28 = vld [vmem:[%s3460_s7 + $0x158] sm:$0xff]  ;;  %v2426_v20 = vld [vmem:[%s3460_s7 + $0xe0] sm:$0xff] }
 0x1e4   : > { %v1195_v30 = vadd.f32 %v1188_v18, %v1149_v29 }
 0x1e5   : > { %1935 = vmatpush.msrb.mxu0 %v2450_v21 }
 0x1e6   : > { %v1202_v32 = vadd.f32 %v3044_v1, %v1195_v30  ;;  %v2404_v30 = vld [vmem:[%s3460_s7 + $0x78] sm:$0xff] }
 0x1e7   : > { %v1099_v33 = vpop.f32.mrf.mxu3 }
 0x1e8   : > { %vm1205_vm5 = vcmp.ge.f32.partialorder %v1202_v32, 0.0  ;;  %v1208_v35 = vmul.f32 0.01, %v1202_v32  ;;  %v1104_v36 = vadd.f32 %v1099_v33, %v1058_v31  ;;  %v1191_v37 = vpop.f32.mrf.mxu2 }
 0x1ea   : > { %v1211_v39 = vsel %vm1205_vm5, %v1202_v32, %v1208_v35  ;;  %v1150_v40 = vadd.f32 %v1145_v34, %v1104_v36  ;;  %v1244_v41 = vld [vmem:[#allocation2 + $0x1] sm:$0xff]  ;;  %v2403_v32 = vld [vmem:[%s3460_s7 + $0x70] sm:$0xff] }
 0x1eb   : > { %v1233_v42 = vld [vmem:[#allocation2] sm:$0xff]  ;;  %1230 = vst.msk [vmem:[#allocation2 + $0xc] sm:$0xff] %vm560_vm0, %v1211_v39  ;;  %2325 = vmatmul.msk.f32.vlgmr.msrb.gmra.mxu3 %vm560_vm0, %v1244_v41 }
 0x1ec   : > { %v1326_v43 = vld [vmem:[#allocation2 + $0x2] sm:$0xff]  ;;  %2328 = vmatmul.msk.f32.vlgmr.msrb.gmra.mxu1 %vm560_vm0, %v1233_v42  ;;  %v1196_v45 = vadd.f32 %v1191_v37, %v1150_v40  ;;  %1555 = vmatpush.msrb.mxu3 %v2382_v38  ;;  %v1672_v37 = vld [vmem:[%s3460_s7 + $0x38] sm:$0xff]  ;;  %v1671_v42 = vld [vmem:[%s3460_s7 + $0x30] sm:$0xff] }
 0x1ed   : > { %2339 = vmatmul.msk.f32.vlgmr.msrb.gmra.mxu2 %vm560_vm0, %v1326_v43  ;;  %1605 = vmatpush.msrb.mxu1 %v2393_v46  ;;  %v1376_v0 = vld [vmem:[#allocation2 + $0x3] sm:$0xff]  ;;  %v2418_v38 = vld [vmem:[%s3460_s7 + $0xb8] sm:$0xff]  ;;  %v2417_v43 = vld [vmem:[%s3460_s7 + $0xb0] sm:$0xff] }
 0x1ee   : > { %v1203_v49 = vadd.f32 %v3044_v1, %v1196_v45  ;;  %1556 = vmatpush.msrb.mxu3 %v2381_v44  ;;  %v1426_v4 = vld [vmem:[#allocation2 + $0x4] sm:$0xff]  ;;  %1702 = vmatpush.msrb.mxu2 %v2404_v30  ;;  %v2400_v45 = vld [vmem:[%s3460_s7 + $0x58] sm:$0xff] }
 0x1ef   : > { %1606 = vmatpush.msrb.mxu1 %v2392_v47  ;;  %v2402_v40 = vld [vmem:[%s3460_s7 + $0x68] sm:$0xff]  ;;  %v2401_v41 = vld [vmem:[%s3460_s7 + $0x60] sm:$0xff] }
 0x1f0   : > { %vm1206_vm7 = vcmp.ge.f32.partialorder %v1203_v49, 0.0  ;;  %v1209_v52 = vmul.f32 0.01, %v1203_v49  ;;  %1557 = vmatpush.msrb.mxu3 %v2380_v48  ;;  %1703 = vmatpush.msrb.mxu2 %v2403_v32  ;;  %v1670_v44 = vld [vmem:[%s3460_s7 + $0x28] sm:$0xff]  ;;  %v1669_v47 = vld [vmem:[%s3460_s7 + $0x20] sm:$0xff] }
 0x1f1   : > { %1607 = vmatpush.msrb.mxu1 %v2391_v50  ;;  %v2416_v46 = vld [vmem:[%s3460_s7 + $0xa8] sm:$0xff]  ;;  %v2415_v48 = vld [vmem:[%s3460_s7 + $0xa0] sm:$0xff] }
 0x1f2   : > { %v1212_v55 = vsel %vm1206_vm7, %v1203_v49, %v1209_v52  ;;  %v1245_v56 = vld [vmem:[#allocation2 + $0x9] sm:$0xff]  ;;  %1558 = vmatpush.msrb.mxu3 %v2379_v51  ;;  %v1246_v63 = vld [vmem:[#allocation2 + $0x11] sm:$0x3]  ;;  %1704 = vmatpush.msrb.mxu2 %v2402_v40  ;;  %v1668_v51 = vld [vmem:[%s3460_s7 + $0x18] sm:$0xff] }
 0x1f3   : > { %v1234_v57 = vld [vmem:[#allocation2 + $0x8] sm:$0xff]  ;;  %1232 = vst.msk [vmem:[#allocation2 + $0x14] sm:$0x1] %vm1231_vm8, %v1212_v55  ;;  %2326 = vmatmul.msk.f32.gmra.mxu3 %vm560_vm0, %v1245_v56  ;;  %1608 = vmatpush.msrb.mxu1 %v2390_v54  ;;  %v1235_v2 = vld [vmem:[#allocation2 + $0x10] sm:$0x3]  ;;  %v2414_v52 = vld [vmem:[%s3460_s7 + $0x98] sm:$0xff] }
 0x1f4   : > { %v1327_v58 = vld [vmem:[#allocation2 + $0xa] sm:$0xff]  ;;  %2329 = vmatmul.msk.f32.gmra.mxu1 %vm560_vm0, %v1234_v57  ;;  %1559 = vmatpush.msrb.mxu3 %v2378_v53  ;;  %v1328_v3 = vld [vmem:[#allocation2 + $0x12] sm:$0x3]  ;;  %v2459_v30 = vld [vmem:[%s3460_s7 + $0x1a0] sm:$0xff] }
 0x1f5   : > { %2340 = vmatmul.msk.f32.gmra.mxu2 %vm560_vm0, %v1327_v58  ;;  %1609 = vmatpush.msrb.mxu1 %v2389_v60  ;;  %v1476_v16 = vld [vmem:[#allocation2 + $0x5] sm:$0xff]  ;;  %v2446_v54 = vld [vmem:[%s3460_s7 + $0x150] sm:$0xff] }
 0x1f6   : > { %1560 = vmatpush.msrb.mxu3 %v2377_v59  ;;  %v1526_v1 = vld [vmem:[#allocation2 + $0x6] sm:$0xff]  ;;  %1705 = vmatpush.msrb.mxu2 %v2401_v41  ;;  %v2399_v55 = vld [vmem:[%s3460_s7 + $0x50] sm:$0xff] }
 0x1f7   : > { %v1576_v6 = vld [vmem:[#allocation2 + $0x7] sm:$0xff]  ;;  %1610 = vmatpush.msrb.mxu1 %v2388_v62  ;;  %v1667_v57 = vld [vmem:[%s3460_s7 + $0x10] sm:$0xff] }
 0x1f8   : > { %1561 = vmatpush.msrb.mxu3 %v2376_v61  ;;  %2071 = vst.msk [vmem:[#allocation2] sm:$0xff] %vm560_vm0, %v2530_v15  ;;  %v1377_v10 = vld [vmem:[#allocation2 + $0xb] sm:$0xff]  ;;  %1706 = vmatpush.msrb.mxu2 %v2400_v45  ;;  %v2397_v60 = vld [vmem:[%s3460_s7 + $0x40] sm:$0xff] }
 0x1f9   : > { %v1427_v11 = vld [vmem:[#allocation2 + $0xc] sm:$0xff]  ;;  %1611 = vmatpush.msrb.mxu1 %v2387_v7 }
 0x1fa   : > { %1562 = vmatpush.msrb.mxu3 %v2375_v5  ;;  %v1477_v9 = vld [vmem:[#allocation2 + $0xd] sm:$0xff]  ;;  %1707 = vmatpush.msrb.mxu2 %v2399_v55  ;;  %v2411_v5 = vld [vmem:[%s3460_s7 + $0x80] sm:$0xff] }
 0x1fb   : > { %2327 = vmatmul.msk.f32.gmra.mxu3 %vm560_vm0, %v1246_v63  ;;  %v1527_v12 = vld [vmem:[#allocation2 + $0xe] sm:$0xff]  ;;  %1612 = vmatpush.msrb.mxu1 %v2386_v8  ;;  %v2433_v55 = vld [vmem:[%s3460_s7 + $0x100] sm:$0xff] }
 0x1fc   : > { %2330 = vmatmul.msk.f32.gmra.mxu1 %vm560_vm0, %v1235_v2  ;;  %v1577_v13 = vld [vmem:[#allocation2 + $0xf] sm:$0xff]  ;;  %v2429_v2 = vld [vmem:[%s3460_s7 + $0xf8] sm:$0xff] }
 0x1fd   : > { %2341 = vmatmul.msk.f32.gmra.mxu2 %vm560_vm0, %v1328_v3  ;;  %2072 = vst.msk [vmem:[#allocation2 + $0x8] sm:$0xff] %vm560_vm0, %v2530_v15  ;;  %v1378_v14 = vld [vmem:[#allocation2 + $0x13] sm:$0x3]  ;;  %v2398_v56 = vld [vmem:[%s3460_s7 + $0x48] sm:$0xff] }
 0x1fe   : > { %v1428_v22 = vld [vmem:[#allocation2 + $0x14] sm:$0x3]  ;;  %v1666_v61 = vld [vmem:[%s3460_s7 + $0x8] sm:$0xff]  ;;  %1708 = vmatpush.msrb.mxu2 %v2398_v56  ;;  %v2455_v56 = vld [vmem:[%s3460_s7 + $0x180] sm:$0xff] }
 0x1ff   : > { %2073 = vst.msk [vmem:[#allocation2 + $0x10] sm:$0xff] %vm560_vm0, %v2530_v15  ;;  %v2449_v15 = vld [vmem:[%s3460_s7 + $0x168] sm:$0xff]  ;;  %v2413_v58 = vld [vmem:[%s3460_s7 + $0x90] sm:$0xff] }
 0x200   : > { %1936 = vmatpush.msrb.mxu0 %v2449_v15  ;;  %v2412_v62 = vld [vmem:[%s3460_s7 + $0x88] sm:$0xff]  ;;  %1709 = vmatpush.msrb.mxu2 %v2397_v60  ;;  %v2428_v3 = vld [vmem:[%s3460_s7 + $0xf0] sm:$0xff]  ;;  %v2469_v60 = vld [vmem:[%s3460_s7 + $0x1d8] sm:$0xff] }
 0x201   : > { %v2445_v7 = vld [vmem:[%s3460_s7 + $0x148] sm:$0xff]  ;;  %v2435_v40 = vld [vmem:[%s3460_s7 + $0x110] sm:$0xff] }
 0x202   : > { %1937 = vmatpush.msrb.mxu0 %v2448_v25  ;;  %v2427_v8 = vld [vmem:[%s3460_s7 + $0xe8] sm:$0xff]  ;;  %v2425_v25 = vld [vmem:[%s3460_s7 + $0xd8] sm:$0xff]  ;;  %v2457_v41 = vld [vmem:[%s3460_s7 + $0x190] sm:$0xff] }
 0x203   : > { %2350 = vmatmul.msk.f32.vlgmr.msra.gmra.mxu3 %vm560_vm0, %v1376_v0  ;;  %v2460_v15 = vld [vmem:[%s3460_s7 + $0x1a8] sm:$0xff] }
 0x204   : > { %2361 = vmatmul.msk.f32.vlgmr.msra.gmra.mxu1 %vm560_vm0, %v1426_v4  ;;  %1938 = vmatpush.msrb.mxu0 %v2447_v28  ;;  %v1665_v4 = vld [vmem:[%s3460_s7] sm:$0xff] }
 0x205   : > { %2372 = vmatmul.msk.f32.vlgmr.msra.gmra.mxu2 %vm560_vm0, %v1476_v16  ;;  %1737 = vmatpush.msra.mxu3 %v1672_v37  ;;  %v2437_v28 = vld [vmem:[%s3460_s7 + $0x120] sm:$0xff]  ;;  %v2423_v37 = vld [vmem:[%s3460_s7 + $0xc8] sm:$0xff] }
 0x206   : > { %1784 = vmatpush.msra.mxu1 %v2418_v38  ;;  %1939 = vmatpush.msrb.mxu0 %v2446_v54 }
 0x207   : > { %1738 = vmatpush.msra.mxu3 %v1671_v42  ;;  %1834 = vmatpush.msra.mxu2 %v2429_v2  ;;  %v2472_v42 = vld [vmem:[%s3460_s7 + $0x1f0] sm:$0xff] }
 0x208   : > { %1785 = vmatpush.msra.mxu1 %v2417_v43  ;;  %1940 = vmatpush.msrb.mxu0 %v2445_v7  ;;  %v2422_v43 = vld [vmem:[%s3460_s7 + $0xc0] sm:$0xff] }
 0x209   : > { %1739 = vmatpush.msra.mxu3 %v1670_v44  ;;  %1835 = vmatpush.msra.mxu2 %v2428_v3  ;;  %v2471_v44 = vld [vmem:[%s3460_s7 + $0x1e8] sm:$0xff] }
 0x20a   : > { %1786 = vmatpush.msra.mxu1 %v2416_v46 }
 0x20b   : > { %2351 = vmatmul.msk.f32.gmra.mxu3 %vm560_vm0, %v1377_v10  ;;  %1836 = vmatpush.msra.mxu2 %v2427_v8 }
 0x20c   : > { %2362 = vmatmul.msk.f32.gmra.mxu1 %vm560_vm0, %v1427_v11  ;;  %1740 = vmatpush.msra.mxu3 %v1669_v47  ;;  %v2444_v11 = vld [vmem:[%s3460_s7 + $0x140] sm:$0xff] }
 0x20d   : > { %2373 = vmatmul.msk.f32.gmra.mxu2 %vm560_vm0, %v1477_v9  ;;  %1787 = vmatpush.msra.mxu1 %v2415_v48  ;;  %v2440_v9 = vld [vmem:[%s3460_s7 + $0x138] sm:$0xff]  ;;  %v2434_v48 = vld [vmem:[%s3460_s7 + $0x108] sm:$0xff] }
 0x20e   : > { %1741 = vmatpush.msra.mxu3 %v1668_v51  ;;  %1941 = vmatpush.msrb.mxu0 %v2444_v11 }
 0x20f   : > { %1788 = vmatpush.msra.mxu1 %v2414_v52  ;;  %1837 = vmatpush.msra.mxu2 %v2426_v20  ;;  %v2470_v52 = vld [vmem:[%s3460_s7 + $0x1e0] sm:$0xff] }
 0x210   : > { %1742 = vmatpush.msra.mxu3 %v1667_v57 }
 0x211   : > { %1789 = vmatpush.msra.mxu1 %v2413_v58  ;;  %1838 = vmatpush.msra.mxu2 %v2425_v25 }
 0x212   : > { %1743 = vmatpush.msra.mxu3 %v1666_v61 }
 0x213   : > { %2352 = vmatmul.msk.f32.gmra.mxu3 %vm560_vm0, %v1378_v14  ;;  %1790 = vmatpush.msra.mxu1 %v2412_v62  ;;  %v2439_v14 = vld [vmem:[%s3460_s7 + $0x130] sm:$0xff] }
 0x214   : > { %2363 = vmatmul.msk.f32.gmra.mxu1 %vm560_vm0, %v1428_v22  ;;  %1744 = vmatpush.msra.mxu3 %v1665_v4  ;;  %v2468_v62 = vld [vmem:[%s3460_s7 + $0x1d0] sm:$0xff] }
 0x215   : > { %2374 = vmatmul.msk.f32.gmra.mxu2 %vm560_vm0, %v1478_v17  ;;  %1791 = vmatpush.msra.mxu1 %v2411_v5  ;;  %v2461_v17 = vld [vmem:[%s3460_s7 + $0x1b0] sm:$0xff] }
 0x21b   : > { %2383 = vmatmul.msk.f32.vlgmr.msrb.gmra.mxu3 %vm560_vm0, %v1526_v1 }
 0x21c   : > { %2394 = vmatmul.msk.f32.vlgmr.msrb.gmra.mxu1 %vm560_vm0, %v1576_v6  ;;  %1884 = vmatpush.msrb.mxu3 %v2440_v9 }
 0x21e   : > { %1885 = vmatpush.msrb.mxu3 %v2439_v14 }
 0x223   : > { %2384 = vmatmul.msk.f32.gmra.mxu3 %vm560_vm0, %v1527_v12  ;;  %v2462_v12 = vld [vmem:[%s3460_s7 + $0x1b8] sm:$0xff] }
 0x224   : > { %2395 = vmatmul.msk.f32.gmra.mxu1 %vm560_vm0, %v1577_v13 }
 0x225   : > { %1984 = vmatpush.msrb.mxu1 %v2462_v12 }
 0x227   : > { %1985 = vmatpush.msrb.mxu1 %v2461_v17 }
 0x229   : > { %1986 = vmatpush.msrb.mxu1 %v2460_v15 }
 0x22b   : > { %2385 = vmatmul.msk.f32.gmra.mxu3 %vm560_vm0, %v1528_v23  ;;  %v2438_v23 = vld [vmem:[%s3460_s7 + $0x128] sm:$0xff]  ;;  %1987 = vmatpush.msrb.mxu1 %v2459_v30 }
 0x22c   : > { %2396 = vmatmul.msk.f32.gmra.mxu1 %vm560_vm0, %v1578_v19  ;;  %1886 = vmatpush.msrb.mxu3 %v2438_v23 }
 0x22e   : > { %1887 = vmatpush.msrb.mxu3 %v2437_v28 }
 0x269   : > { %v1317_v24 = vpop.f32.mrf.mxu1 }
 0x26e   : > { %v1282_v26 = vpop.f32.mrf.mxu3 }
 0x26f   : > { %v1318_v53 = vadd.f32 %v1317_v24, %v1282_v26 }
 0x270   : > { %v1364_v31 = vpop.f32.mrf.mxu2 }
 0x271   : > { %v3182_v18 = vpop.f32.mrf.mxu1  ;;  %v1373_v0 = vadd.f32 %v1364_v31, %v1318_v53 }
 0x276   : > { %v3184_v27 = vpop.f32.mrf.mxu3 }
 0x277   : > { %v1321_v1 = vadd.f32 %v3182_v18, %v3184_v27  ;;  %v3325_v27 = vld [vmem:[%s3459_s6] ss:$0 sm:$0xff] }
 0x278   : > { %v3199_v35 = vpop.f32.mrf.mxu2 }
 0x279   : > { %v3189_v29 = vpop.f32.mrf.mxu1  ;;  %v1374_v13 = vadd.f32 %v3199_v35, %v1321_v1  ;;  %v3346_v35 = vld [vmem:[%s3460_s7 + $0x1f8] sm:$0xff]  ;;  %v2466_v1 = vld [vmem:[%s3460_s7 + $0x1c0] sm:$0xff] }
 0x27a   : > { %2034 = vmatpush.msra.mxu0 %v3346_v35 }
 0x27c   : > { %2035 = vmatpush.msra.mxu0 %v2472_v42 }
 0x27e   : > { %v3197_v33 = vpop.f32.mrf.mxu3  ;;  %2036 = vmatpush.msra.mxu0 %v2471_v44 }
 0x27f   : > { %v1324_v26 = vadd.f32 %v3189_v29, %v3197_v33  ;;  %v2424_v29 = vld [vmem:[%s3460_s7 + $0xd0] sm:$0xff]  ;;  %v2436_v33 = vld [vmem:[%s3460_s7 + $0x118] sm:$0xff] }
 0x280   : > { %v3236_v49 = vpop.f32.mrf.mxu2  ;;  %1839 = vmatpush.msra.mxu2 %v2424_v29  ;;  %1888 = vmatpush.msrb.mxu3 %v2436_v33  ;;  %v1957_v29 = vld [vmem:[#allocation3 + $0x16] sm:$0x7] }
 0x281   : > { %v1464_v34 = vpop.f32.mrf.mxu1  ;;  %v1375_v38 = vadd.f32 %v3236_v49, %v1324_v26  ;;  %v2456_v49 = vld [vmem:[%s3460_s7 + $0x188] sm:$0xff]  ;;  %2037 = vmatpush.msra.mxu0 %v2470_v52 }
 0x282   : > { %1840 = vmatpush.msra.mxu2 %v2423_v37  ;;  %1889 = vmatpush.msrb.mxu3 %v2435_v40 }
 0x283   : > { %2038 = vmatpush.msra.mxu0 %v2469_v60 }
 0x284   : > { %1841 = vmatpush.msra.mxu2 %v2422_v43  ;;  %1890 = vmatpush.msrb.mxu3 %v2434_v48 }
 0x285   : > { %2039 = vmatpush.msra.mxu0 %v2468_v62 }
 0x286   : > { %v1414_v36 = vpop.f32.mrf.mxu3  ;;  %1891 = vmatpush.msrb.mxu3 %v2433_v55 }
 0x287   : > { %v1423_v63 = vadd.f32 %v1414_v36, %v1373_v0 }
 0x288   : > { %v1514_v6 = vpop.f32.mrf.mxu2 }
 0x289   : > { %v3207_v39 = vpop.f32.mrf.mxu1  ;;  %v1473_v10 = vadd.f32 %v1464_v34, %v1423_v63  ;;  %v2458_v34 = vld [vmem:[%s3460_s7 + $0x198] sm:$0xff] }
 0x28a   : > { %1988 = vmatpush.msrb.mxu1 %v2458_v34  ;;  %v2007_v34 = vld [vmem:[#allocation3 + $0x17] sm:$0x7] }
 0x28b   : > { %v1523_v21 = vadd.f32 %v1514_v6, %v1473_v10 }
 0x28c   : > { %1989 = vmatpush.msrb.mxu1 %v2457_v41 }
 0x28e   : > { %v1417_v50 = vpop.f32.mrf.mxu3  ;;  %1990 = vmatpush.msrb.mxu1 %v2456_v49 }
 0x28f   : > { %v1424_v22 = vadd.f32 %v1417_v50, %v1374_v13 }
 0x290   : > { %v1517_v36 = vpop.f32.mrf.mxu2  ;;  %1991 = vmatpush.msrb.mxu1 %v2455_v56 }
 0x291   : > { %v3259_v59 = vpop.f32.mrf.mxu1  ;;  %v1474_v31 = vadd.f32 %v3207_v39, %v1424_v22 }
 0x293   : > { %v1524_v45 = vadd.f32 %v1517_v36, %v1474_v31 }
 0x296   : > { %v3276_v16 = vpop.f32.mrf.mxu3 }
 0x297   : > { %v1425_v46 = vadd.f32 %v3276_v16, %v1375_v38 }
 0x298   : > { %v1520_v61 = vpop.f32.mrf.mxu2 }
 0x299   : > { %v1614_v19 = vpop.f32.mrf.mxu1  ;;  %v1475_v57 = vadd.f32 %v3259_v59, %v1425_v46  ;;  %v2467_v59 = vld [vmem:[%s3460_s7 + $0x1c8] sm:$0xff] }
 0x29a   : > { %2040 = vmatpush.msra.mxu0 %v2467_v59 }
 0x29b   : > { %v1525_v4 = vadd.f32 %v1520_v61, %v1475_v57  ;;  %v2521_v57 = vld [vmem:[%s3461_s8] ss:$0 sm:$0xff] }
 0x29c   : > { %2041 = vmatpush.msra.mxu0 %v2466_v1 }
 0x29e   : > { %v1564_v24 = vpop.f32.mrf.mxu3 }
 0x29f   : > { %v1573_v18 = vadd.f32 %v1564_v24, %v1523_v21 }
 0x2a1   : > { %v1623_v32 = vadd.f32 %v1614_v19, %v1573_v18  ;;  %v1617_v50 = vpop.f32.mrf.mxu1 }
 0x2a3   : > { %v1630_v39 = vadd.f32 %v3325_v27, %v1623_v32 }
 0x2a5   : > { %vm1633_vm9 = vcmp.ge.f32.partialorder %v1630_v39, 0.0  ;;  %v1636_v47 = vmul.f32 0.01, %v1630_v39 }
 0x2a6   : > { %v1567_v51 = vpop.f32.mrf.mxu3 }
 0x2a7   : > { %v1639_v53 = vsel %vm1633_vm9, %v1630_v39, %v1636_v47  ;;  %v1574_v54 = vadd.f32 %v1567_v51, %v1524_v45 }
 0x2a8   : > { %1658 = vst.msk [vmem:[#allocation3 + $0x4] sm:$0xff] %vm560_vm0, %v1639_v53 }
 0x2a9   : > { %v1624_v58 = vadd.f32 %v1617_v50, %v1574_v54  ;;  %v1620_v16 = vpop.f32.mrf.mxu1 }
 0x2ab   : > { %v1631_v0 = vadd.f32 %v3325_v27, %v1624_v58 }
 0x2ad   : > { %vm1634_vm10 = vcmp.ge.f32.partialorder %v1631_v0, 0.0  ;;  %v1637_v5 = vmul.f32 0.01, %v1631_v0 }
 0x2ae   : > { %v1570_v63 = vpop.f32.mrf.mxu3 }
 0x2af   : > { %v1640_v6 = vsel %vm1634_vm10, %v1631_v0, %v1637_v5  ;;  %v1575_v2 = vadd.f32 %v1570_v63, %v1525_v4  ;;  %v1673_v3 = vld [vmem:[#allocation3 + $0x1] sm:$0xff] }
 0x2b0   : > { %v1662_v7 = vld [vmem:[#allocation3] sm:$0xff]  ;;  %1659 = vst.msk [vmem:[#allocation3 + $0xc] sm:$0xff] %vm560_vm0, %v1640_v6  ;;  %2405 = vmatmul.msk.f32.vlgmr.msrb.gmra.mxu2 %vm560_vm0, %v1673_v3 }
 0x2b1   : > { %v1755_v10 = vld [vmem:[#allocation3 + $0x2] sm:$0xff]  ;;  %2408 = vmatmul.msk.f32.vlgmr.msra.gmra.mxu3 %vm560_vm0, %v1662_v7  ;;  %v1625_v11 = vadd.f32 %v1620_v16, %v1575_v2  ;;  %2500 = vmatpush.msrb.mxu2 %v3346_v35 }
 0x2b2   : > { %2419 = vmatmul.msk.f32.vlgmr.msra.gmra.mxu1 %vm560_vm0, %v1755_v10  ;;  %v1805_v15 = vld [vmem:[#allocation3 + $0x3] sm:$0xff] }
 0x2b3   : > { %v1632_v8 = vadd.f32 %v3325_v27, %v1625_v11  ;;  %2501 = vmatpush.msrb.mxu2 %v2472_v42  ;;  %v1855_v24 = vld [vmem:[#allocation3 + $0x4] sm:$0xff] }
 0x2b5   : > { %vm1635_vm11 = vcmp.ge.f32.partialorder %v1632_v8, 0.0  ;;  %v1638_v9 = vmul.f32 0.01, %v1632_v8  ;;  %2502 = vmatpush.msrb.mxu2 %v2471_v44 }
 0x2b7   : > { %v1641_v12 = vsel %vm1635_vm11, %v1632_v8, %v1638_v9  ;;  %v1674_v13 = vld [vmem:[#allocation3 + $0x9] sm:$0xff]  ;;  %2503 = vmatpush.msrb.mxu2 %v2470_v52  ;;  %v1675_v20 = vld [vmem:[#allocation3 + $0x11] sm:$0x7] }
 0x2b8   : > { %v1663_v14 = vld [vmem:[#allocation3 + $0x8] sm:$0xff]  ;;  %1661 = vst.msk [vmem:[#allocation3 + $0x14] sm:$0x3] %vm1660_vm12, %v1641_v12  ;;  %2406 = vmatmul.msk.f32.gmra.mxu2 %vm560_vm0, %v1674_v13  ;;  %v1664_v21 = vld [vmem:[#allocation3 + $0x10] sm:$0x7] }
 0x2b9   : > { %v1756_v17 = vld [vmem:[#allocation3 + $0xa] sm:$0xff]  ;;  %2409 = vmatmul.msk.f32.gmra.mxu3 %vm560_vm0, %v1663_v14  ;;  %2504 = vmatpush.msrb.mxu2 %v2469_v60 }
 0x2ba   : > { %v1905_v19 = vld [vmem:[#allocation3 + $0x5] sm:$0xff]  ;;  %2420 = vmatmul.msk.f32.gmra.mxu1 %vm560_vm0, %v1756_v17 }
 0x2bb   : > { %2452 = vmatmul.msk.f32.vlgmr.msrb.gmra.mxu0 %vm560_vm0, %v1905_v19  ;;  %2505 = vmatpush.msrb.mxu2 %v2468_v62  ;;  %v1955_v26 = vld [vmem:[#allocation3 + $0x6] sm:$0xff] }
 0x2bc   : > { %v1806_v18 = vld [vmem:[#allocation3 + $0xb] sm:$0xff] }
 0x2bd   : > { %2506 = vmatpush.msrb.mxu2 %v2467_v59  ;;  %v1856_v27 = vld [vmem:[#allocation3 + $0xc] sm:$0xff] }
 0x2be   : > { %v2005_v30 = vld [vmem:[#allocation3 + $0x7] sm:$0xff] }
 0x2bf   : > { %v1757_v22 = vld [vmem:[#allocation3 + $0x12] sm:$0x7]  ;;  %2507 = vmatpush.msrb.mxu2 %v2466_v1  ;;  %v1907_v25 = vld [vmem:[#allocation3 + $0x15] sm:$0x7] }
 0x2c0   : > { %v1906_v23 = vld [vmem:[#allocation3 + $0xd] sm:$0xff]  ;;  %2407 = vmatmul.msk.f32.gmra.mxu2 %vm560_vm0, %v1675_v20 }
 0x2c1   : > { %2410 = vmatmul.msk.f32.gmra.mxu3 %vm560_vm0, %v1664_v21  ;;  %v1956_v28 = vld [vmem:[#allocation3 + $0xe] sm:$0xff] }
 0x2c2   : > { %2421 = vmatmul.msk.f32.gmra.mxu1 %vm560_vm0, %v1757_v22  ;;  %v1807_v31 = vld [vmem:[#allocation3 + $0x13] sm:$0x7] }
 0x2c3   : > { %2453 = vmatmul.msk.f32.gmra.mxu0 %vm560_vm0, %v1906_v23  ;;  %v1857_v32 = vld [vmem:[#allocation3 + $0x14] sm:$0x7] }
 0x2c4   : > { %v2006_v33 = vld [vmem:[#allocation3 + $0xf] sm:$0xff] }
 0x2c8   : > { %2430 = vmatmul.msk.f32.vlgmr.msra.gmra.mxu2 %vm560_vm0, %v1805_v15 }
 0x2c9   : > { %2441 = vmatmul.msk.f32.vlgmr.msrb.gmra.mxu3 %vm560_vm0, %v1855_v24 }
 0x2ca   : > { %2463 = vmatmul.msk.f32.vlgmr.msrb.gmra.mxu1 %vm560_vm0, %v1955_v26 }
 0x2cb   : > { %2454 = vmatmul.msk.f32.gmra.mxu0 %vm560_vm0, %v1907_v25 }
 0x2d0   : > { %2431 = vmatmul.msk.f32.gmra.mxu2 %vm560_vm0, %v1806_v18 }
 0x2d1   : > { %2442 = vmatmul.msk.f32.gmra.mxu3 %vm560_vm0, %v1856_v27 }
 0x2d2   : > { %2464 = vmatmul.msk.f32.gmra.mxu1 %vm560_vm0, %v1956_v28 }
 0x2d3   : > { %2474 = vmatmul.msk.f32.vlgmr.msra.gmra.mxu0 %vm560_vm0, %v2005_v30 }
 0x2d8   : > { %2432 = vmatmul.msk.f32.gmra.mxu2 %vm560_vm0, %v1807_v31 }
 0x2d9   : > { %2443 = vmatmul.msk.f32.gmra.mxu3 %vm560_vm0, %v1857_v32 }
 0x2da   : > { %2465 = vmatmul.msk.f32.gmra.mxu1 %vm560_vm0, %v1957_v29 }
 0x2e0   : > { %2475 = vmatmul.msk.f32.vlgmr.msrb.gmra.mxu2 %vm560_vm0, %v2006_v33 }
 0x2e8   : > { %2476 = vmatmul.msk.f32.gmra.mxu2 %vm560_vm0, %v2007_v34 }
 0x32f   : > { %v1793_v35 = vpop.f32.mrf.mxu1 }
 0x333   : > { %v1711_v36 = vpop.f32.mrf.mxu2 }
 0x334   : > { %v1746_v37 = vpop.f32.mrf.mxu3 }
 0x335   : > { %v1747_v45 = vadd.f32 %v1746_v37, %v1711_v36 }
 0x337   : > { %v1796_v41 = vpop.f32.mrf.mxu1  ;;  %v1802_v48 = vadd.f32 %v1793_v35, %v1747_v45 }
 0x338   : > { %v1943_v38 = vpop.f32.mrf.mxu0 }
 0x33b   : > { %v1714_v39 = vpop.f32.mrf.mxu2 }
 0x33c   : > { %v1749_v40 = vpop.f32.mrf.mxu3 }
 0x33d   : > { %v1750_v53 = vadd.f32 %v1749_v40, %v1714_v39 }
 0x33f   : > { %v1799_v46 = vpop.f32.mrf.mxu1  ;;  %v1803_v62 = vadd.f32 %v1796_v41, %v1750_v53 }
 0x340   : > { %v1946_v42 = vpop.f32.mrf.mxu0 }
 0x343   : > { %v1717_v43 = vpop.f32.mrf.mxu2 }
 0x344   : > { %v1752_v44 = vpop.f32.mrf.mxu3 }
 0x345   : > { %v1753_v5 = vadd.f32 %v1752_v44, %v1717_v43 }
 0x347   : > { %v1993_v55 = vpop.f32.mrf.mxu1  ;;  %v1804_v2 = vadd.f32 %v1799_v46, %v1753_v5 }
 0x348   : > { %v1949_v47 = vpop.f32.mrf.mxu0 }
 0x34b   : > { %v1843_v49 = vpop.f32.mrf.mxu2 }
 0x34c   : > { %v1852_v50 = vadd.f32 %v1843_v49, %v1802_v48  ;;  %v1893_v51 = vpop.f32.mrf.mxu3 }
 0x34e   : > { %v1902_v52 = vadd.f32 %v1893_v51, %v1852_v50 }
 0x34f   : > { %v1996_v10 = vpop.f32.mrf.mxu1 }
 0x350   : > { %v1952_v54 = vadd.f32 %v1943_v38, %v1902_v52  ;;  %v2043_v58 = vpop.f32.mrf.mxu0 }
 0x352   : > { %v2002_v56 = vadd.f32 %v1993_v55, %v1952_v54 }
 0x353   : > { %v1846_v60 = vpop.f32.mrf.mxu2 }
 0x354   : > { %v2052_v61 = vadd.f32 %v2043_v58, %v2002_v56  ;;  %v1853_v59 = vadd.f32 %v1846_v60, %v1803_v62  ;;  %v1896_v4 = vpop.f32.mrf.mxu3 }
 0x356   : > { %v2059_v0 = vadd.f32 %v2521_v57, %v2052_v61  ;;  %v1903_v1 = vadd.f32 %v1896_v4, %v1853_v59 }
 0x357   : > { %v1999_v26 = vpop.f32.mrf.mxu1 }
 0x358   : > { %vm2062_vm13 = vcmp.ge.f32.partialorder %v2059_v0, 0.0  ;;  %v2065_v63 = vmul.f32 0.01, %v2059_v0  ;;  %v1953_v3 = vadd.f32 %v1946_v42, %v1903_v1 }
 0x35a   : > { %v2068_v16 = vsel %vm2062_vm13, %v2059_v0, %v2065_v63  ;;  %v2003_v13 = vadd.f32 %v1996_v10, %v1953_v3 }
 0x35b   : > { %2087 = vst.msk [vmem:[#allocation2 + $0x2] sm:$0xff] %vm560_vm0, %v2068_v16  ;;  %v1849_v6 = vpop.f32.mrf.mxu2 }
 0x35c   : > { %v1854_v7 = vadd.f32 %v1849_v6, %v1804_v2  ;;  %v1899_v11 = vpop.f32.mrf.mxu3 }
 0x35e   : > { %v1904_v12 = vadd.f32 %v1899_v11, %v1854_v7 }
 0x360   : > { %v1954_v23 = vadd.f32 %v1949_v47, %v1904_v12 }
 0x362   : > { %v2090_v8 = vld [vmem:[#allocation2] sm:$0xf]  ;;  %v2100_v9 = vld [vmem:[#allocation2 + $0x4] sm:$0xf]  ;;  %v2004_v30 = vadd.f32 %v1999_v26, %v1954_v23 }
 0x363   : > { %v2092_v14 = vrot.slane %v2090_v8, 2  ;;  %v2102_v17 = vrot.slane %v2100_v9, 2  ;;  %v2046_v19 = vpop.f32.mrf.mxu2 }
 0x364   : > { %v2053_v20 = vadd.f32 %v2046_v19, %v2003_v13 }
 0x365   : > { %v2094_v21 = vmax.f32 %v2090_v8, %v2092_v14  ;;  %v2104_v22 = vmax.f32 %v2100_v9, %v2102_v17 }
 0x366   : > { %v2060_v15 = vadd.f32 %v2521_v57, %v2053_v20 }
 0x367   : > { %v2096_v24 = vrot.slane %v2094_v21, 1  ;;  %v2106_v25 = vrot.slane %v2104_v22, 1 }
 0x368   : > { %vm2063_vm14 = vcmp.ge.f32.partialorder %v2060_v15, 0.0  ;;  %v2066_v18 = vmul.f32 0.01, %v2060_v15 }
 0x369   : > { %v2098_v27 = vmax.f32 %v2094_v21, %v2096_v24  ;;  %v2108_v28 = vmax.f32 %v2104_v22, %v2106_v25 }
 0x36a   : > { %v2069_v29 = vsel %vm2063_vm14, %v2060_v15, %v2066_v18 }
 0x36b   : > { %2099 = vst.msk [vmem:[%s3436_s20] sm:$0x1] %vm1231_vm8, %v2098_v27  ;;  %v2049_v31 = vpop.f32.mrf.mxu2 }
 0x36c   : > { %2109 = vst.msk [vmem:[%s3436_s20 + $0x1] sm:$0x1] %vm1231_vm8, %v2108_v28  ;;  %v2054_v32 = vadd.f32 %v2049_v31, %v2004_v30 }
 0x36d   : > { %2088 = vst.msk [vmem:[#allocation2 + $0xa] sm:$0xff] %vm560_vm0, %v2069_v29 }
 0x36e   : > { %v2061_v33 = vadd.f32 %v2521_v57, %v2054_v32 }
 0x370   : > { %vm2064_vm15 = vcmp.ge.f32.partialorder %v2061_v33, 0.0  ;;  %v2067_v34 = vmul.f32 0.01, %v2061_v33 }
 0x372   : > { %v2070_v35 = vsel %vm2064_vm15, %v2061_v33, %v2067_v34 }
 0x373   : > { %2089 = vst.msk [vmem:[#allocation2 + $0x12] sm:$0x3] %vm1660_vm12, %v2070_v35 }
 0x374   : > { %v2110_v36 = vld [vmem:[#allocation2 + $0x8] sm:$0xf]  ;;  %v2120_v37 = vld [vmem:[#allocation2 + $0xc] sm:$0xf] }
 0x375   : > { %v2112_v38 = vrot.slane %v2110_v36, 2  ;;  %v2122_v39 = vrot.slane %v2120_v37, 2 }
 0x377   : > { %v2114_v40 = vmax.f32 %v2110_v36, %v2112_v38  ;;  %v2124_v41 = vmax.f32 %v2120_v37, %v2122_v39 }
 0x379   : > { %v2116_v42 = vrot.slane %v2114_v40, 1  ;;  %v2126_v43 = vrot.slane %v2124_v41, 1 }
 0x37a   : > { %v2130_v44 = vld [vmem:[#allocation2 + $0x10] sm:$0xf] }
 0x37b   : > { %v2118_v45 = vmax.f32 %v2114_v40, %v2116_v42  ;;  %v2128_v46 = vmax.f32 %v2124_v41, %v2126_v43  ;;  %v2132_v47 = vrot.slane %v2130_v44, 2 }
 0x37d   : > { %2119 = vst.msk [vmem:[%s3436_s20 + $0x2] sm:$0x1] %vm1231_vm8, %v2118_v45  ;;  %v2134_v48 = vmax.f32 %v2130_v44, %v2132_v47 }
 0x37e   : > { %2129 = vst.msk [vmem:[%s3436_s20 + $0x3] sm:$0x1] %vm1231_vm8, %v2128_v46 }
 0x37f   : > { %v2136_v49 = vrot.slane %v2134_v48, 1 }
 0x381   : > { %v2138_v50 = vmax.f32 %v2134_v48, %v2136_v49 }
 0x383   : > { %2139 = vst.msk [vmem:[%s3436_s20 + $0x4] sm:$0x1] %vm1231_vm8, %v2138_v50 }
 0x384 PF: > { %s19_s30 = sadd.s32 1, %s2528_s30  }
 0x385   : > { %p16_p4 = scmp.ge.s32.totalorder %s19_s30, 4  }
 0x387   :  { %18 = sbr.rel (!%p16_p4) target bundleno = 1 (0x1), region = 107 }

</bundles_post_ra>
